<compile_context>
chip_gen: v7x
topology: tpu7x:2x2x1
jax: 0.10.0
libtpu: 0.0.40
codegen_flags: <defaults>
</compile_context>

<pallas_src>
import functools

import jax
import jax.numpy as jnp
from jax.experimental import pallas as pl
from jax.experimental.pallas import tpu as pltpu

_BN_EPS = 1e-5  # torch BatchNorm2d default


# ----------------------------------------------------------------------------
# Pallas kernels
# ----------------------------------------------------------------------------
def _conv_bn_relu_kernel(p_ref, w_ref, b_ref, g_ref, be_ref, o_ref):
    """Fused: im2col GEMM (+conv bias) -> BN(train-mode batch stats) -> ReLU."""
    # Whole-M GEMM on the MXU: bf16 operands, f32 accumulation.
    y = (jnp.dot(p_ref[...], w_ref[...], preferred_element_type=jnp.float32)
         + b_ref[...])
    # BatchNorm2d training-mode statistics: per-channel mean / biased variance
    # over all (N*Ho*Wo) rows, computed in-VMEM (no HBM round trip).
    mean = jnp.mean(y, axis=0, keepdims=True)
    var = jnp.mean(jnp.square(y - mean), axis=0, keepdims=True)
    scale = g_ref[...] * jax.lax.rsqrt(var + _BN_EPS)
    shift = be_ref[...] - mean * scale
    o_ref[...] = jnp.maximum(y * scale + shift, 0.0)


def _make_conv_bn_relu_linear_softmax_kernel(n, hw, c, o):
    """Conv3 block fused with the flatten->Linear->softmax head.

    Patch rows are ordered (h, w, n), so rows [r*n:(r+1)*n] are the batch rows
    of spatial position r.  The linear weight is pre-permuted so that block
    rows [r*c:(r+1)*c] hold the weights for spatial position r.
    """
    def kernel(p_ref, w_ref, b_ref, g_ref, be_ref, wl_ref, bl_ref, out_ref):
        # conv3 GEMM + BN + ReLU (same math as _conv_bn_relu_kernel).
        y = (jnp.dot(p_ref[...], w_ref[...], preferred_element_type=jnp.float32)
             + b_ref[...])
        mean = jnp.mean(y, axis=0, keepdims=True)
        var = jnp.mean(jnp.square(y - mean), axis=0, keepdims=True)
        scale = g_ref[...] * jax.lax.rsqrt(var + _BN_EPS)
        shift = be_ref[...] - mean * scale
        a = jnp.maximum(y * scale + shift, 0.0)          # (hw*n, c), rows (r, n)

        # Fused Linear: logits[n_, o_] = bias + sum_r a[(r, n_), :] @ WL[r].
        wl = wl_ref[...]                                  # (hw*c, o)
        logits = jnp.zeros((n, o), jnp.float32) + bl_ref[...]
        for r in range(hw):                               # static unroll, tiny dots
            logits = logits + jnp.dot(
                a[r * n:(r + 1) * n, :],
                wl[r * c:(r + 1) * c, :],
                preferred_element_type=jnp.float32)

        # Numerically-stable softmax over dim=1 (matches F.softmax on 2-D).
        m = jnp.max(logits, axis=-1, keepdims=True)
        e = jnp.exp(logits - m)
        out_ref[...] = e * pl.reciprocal(jnp.sum(e, axis=-1, keepdims=True),
                                         approx=False)
    return kernel


# ----------------------------------------------------------------------------
# Pallas wrappers (grid=(1,), full arrays resident in VMEM — everything fits)
# ----------------------------------------------------------------------------
def pallas_conv_bn_relu(patches, w_mat, b, g, be):
    """patches: (M, K) bf16, w_mat: (K, C) bf16, b/g/be: (C,) f32 -> (M, C) f32."""
    M, K = patches.shape
    C = w_mat.shape[1]
    return pl.pallas_call(
        _conv_bn_relu_kernel,
        out_shape=jax.ShapeDtypeStruct((M, C), jnp.float32),
        grid=(1,),
        in_specs=[
            pl.BlockSpec((M, K), lambda i: (0, 0)),
            pl.BlockSpec((K, C), lambda i: (0, 0)),
            pl.BlockSpec((1, C), lambda i: (0, 0)),
            pl.BlockSpec((1, C), lambda i: (0, 0)),
            pl.BlockSpec((1, C), lambda i: (0, 0)),
        ],
        out_specs=pl.BlockSpec((M, C), lambda i: (0, 0)),
        compiler_params=pltpu.CompilerParams(dimension_semantics=("arbitrary",)),
    )(patches, w_mat, b.reshape(1, C), g.reshape(1, C), be.reshape(1, C))


def pallas_conv_bn_relu_linear_softmax(patches, w_mat, b, g, be, wl_perm, bl,
                                       *, n, hw):
    """Conv3 + BN + ReLU + flatten + Linear + softmax in one kernel."""
    M, K = patches.shape
    C = w_mat.shape[1]
    O = wl_perm.shape[1]
    assert M == n * hw and wl_perm.shape[0] == hw * C
    kernel = _make_conv_bn_relu_linear_softmax_kernel(n, hw, C, O)
    return pl.pallas_call(
        kernel,
        out_shape=jax.ShapeDtypeStruct((n, O), jnp.float32),
        grid=(1,),
        in_specs=[
            pl.BlockSpec((M, K), lambda i: (0, 0)),
            pl.BlockSpec((K, C), lambda i: (0, 0)),
            pl.BlockSpec((1, C), lambda i: (0, 0)),
            pl.BlockSpec((1, C), lambda i: (0, 0)),
            pl.BlockSpec((1, C), lambda i: (0, 0)),
            pl.BlockSpec((hw * C, O), lambda i: (0, 0)),
            pl.BlockSpec((1, O), lambda i: (0, 0)),
        ],
        out_specs=pl.BlockSpec((n, O), lambda i: (0, 0)),
        compiler_params=pltpu.CompilerParams(dimension_semantics=("arbitrary",)),
    )(patches, w_mat, b.reshape(1, C), g.reshape(1, C), be.reshape(1, C),
      wl_perm, bl.reshape(1, O))


# ----------------------------------------------------------------------------
# Conv lowering glue (index/reshape work between kernels; tiny at these shapes)
# ----------------------------------------------------------------------------
def _im2col_nhwc(x, k, stride, pad):
    """x: (N,H,W,C) -> patches (N,Ho,Wo,k*k*C), tap-major (ki,kj,c) column order."""
    N, H, W, C = x.shape
    xp = jnp.pad(x, ((0, 0), (pad, pad), (pad, pad), (0, 0)))
    Ho = (H - k + 2 * pad) // stride + 1
    Wo = (W - k + 2 * pad) // stride + 1
    cols = [xp[:, ki:ki + stride * Ho:stride, kj:kj + stride * Wo:stride, :]
            for ki in range(k) for kj in range(k)]
    return jnp.concatenate(cols, axis=-1), Ho, Wo


def _conv_weight_matrix(w_oihw):
    """(Cout,Cin,kh,kw) -> (kh*kw*Cin, Cout), matching the (ki,kj,c) patch order."""
    Cout, Cin, kh, kw = w_oihw.shape
    return jnp.transpose(w_oihw, (2, 3, 1, 0)).reshape(kh * kw * Cin, Cout)


# ----------------------------------------------------------------------------
# Full model
# ----------------------------------------------------------------------------
def _calc_out(l, k, s, p):
    return (l - k + 2 * p) // s + 1


def init_dqn_params(key, side_length, outputs, in_channels=1,
                    features=(32, 64, 128)):
    ks = jax.random.split(key, 8)
    f1, f2, f3 = features
    s = side_length
    s = _calc_out(s, 5, 2, 2)
    s = _calc_out(s, 5, 2, 2)
    s = _calc_out(s, 5, 1, 2)
    flat = s * s * f3
    return {
        "w1": 0.05 * jax.random.normal(ks[0], (f1, in_channels, 5, 5), jnp.float32),
        "b1": 0.01 * jax.random.normal(ks[1], (f1,), jnp.float32),
        "g1": jnp.ones((f1,), jnp.float32),
        "be1": jnp.zeros((f1,), jnp.float32),
        "w2": 0.05 * jax.random.normal(ks[2], (f2, f1, 5, 5), jnp.float32),
        "b2": 0.01 * jax.random.normal(ks[3], (f2,), jnp.float32),
        "g2": jnp.ones((f2,), jnp.float32),
        "be2": jnp.zeros((f2,), jnp.float32),
        "w3": 0.05 * jax.random.normal(ks[4], (f3, f2, 5, 5), jnp.float32),
        "b3": 0.01 * jax.random.normal(ks[5], (f3,), jnp.float32),
        "g3": jnp.ones((f3,), jnp.float32),
        "be3": jnp.zeros((f3,), jnp.float32),
        # stored as (flat, outputs) == torch linear.weight.T, flat in (c,h,w) order
        "wl": 0.05 * jax.random.normal(ks[6], (flat, outputs), jnp.float32),
        "bl": 0.01 * jax.random.normal(ks[7], (outputs,), jnp.float32),
    }


@jax.jit
def dqn_cnn_forward(x_nchw, params):
    # Input is NCHW (PyTorch convention); work in NHWC internally.
    x = jnp.transpose(x_nchw, (0, 2, 3, 1)).astype(jnp.float32)
    N = x.shape[0]

    # --- block 1: conv(5x5, s=2, p=2) + BN + ReLU, one fused kernel ---------
    p1, H1, W1 = _im2col_nhwc(x, 5, 2, 2)
    f1 = params["w1"].shape[0]
    y1 = pallas_conv_bn_relu(
        p1.reshape(N * H1 * W1, -1).astype(jnp.bfloat16),
        _conv_weight_matrix(params["w1"]).astype(jnp.bfloat16),
        params["b1"], params["g1"], params["be1"])
    x1 = y1.reshape(N, H1, W1, f1)

    # --- block 2: conv(5x5, s=2, p=2) + BN + ReLU, one fused kernel ---------
    p2, H2, W2 = _im2col_nhwc(x1, 5, 2, 2)
    f2 = params["w2"].shape[0]
    y2 = pallas_conv_bn_relu(
        p2.reshape(N * H2 * W2, -1).astype(jnp.bfloat16),
        _conv_weight_matrix(params["w2"]).astype(jnp.bfloat16),
        params["b2"], params["g2"], params["be2"])
    x2 = y2.reshape(N, H2, W2, f2)

    # --- block 3 + flatten + Linear + softmax, fully fused ------------------
    p3, H3, W3 = _im2col_nhwc(x2, 5, 1, 2)
    f3 = params["w3"].shape[0]
    hw = H3 * W3
    # Rows ordered (h, w, n) so each spatial position's batch rows are a
    # contiguous block inside the kernel for the fused Linear.
    p3_rn = jnp.transpose(p3, (1, 2, 0, 3)).reshape(hw * N, -1)
    # Fold torch's NCHW flatten (flat = c*hw + r) into the linear weight so the
    # activation never needs a transpose between kernels:
    #   wl_perm[r*f3 + c, o] = wl[c*hw + r, o]
    O = params["wl"].shape[1]
    wl_perm = (params["wl"].reshape(f3, hw, O)
               .transpose(1, 0, 2).reshape(hw * f3, O))

    return pallas_conv_bn_relu_linear_softmax(
        p3_rn.astype(jnp.bfloat16),
        _conv_weight_matrix(params["w3"]).astype(jnp.bfloat16),
        params["b3"], params["g3"], params["be3"],
        wl_perm, params["bl"], n=N, hw=hw)


if __name__ == "__main__":
    key = jax.random.PRNGKey(0)
    k_param, k_x = jax.random.split(key)

    batch, in_channels, side, outputs = 2, 1, 16, 4
    params = init_dqn_params(k_param, side, outputs, in_channels=in_channels)
    x = jax.random.normal(k_x, (batch, in_channels, side, side), jnp.float32)

    probs = dqn_cnn_forward(x, params)
    probs = jax.block_until_ready(probs)

    assert probs.shape == (batch, outputs)
    # rows of a softmax sum to 1
    assert bool(jnp.all(jnp.abs(jnp.sum(probs, axis=-1) - 1.0) < 1e-3))
    print("KERNEL_OK")
</pallas_src>

<mosaic_0001>
module attributes {stable_mosaic.version = 11 : i64} {
  func.func @_conv_bn_relu_kernel(%arg0: i32, %arg1: memref<128x25xbf16, #tpu.memory_space<vmem>>, %arg2: memref<25x32xbf16, #tpu.memory_space<vmem>>, %arg3: memref<1x32xf32, #tpu.memory_space<vmem>>, %arg4: memref<1x32xf32, #tpu.memory_space<vmem>>, %arg5: memref<1x32xf32, #tpu.memory_space<vmem>>, %arg6: memref<128x32xf32, #tpu.memory_space<vmem>>) attributes {dimension_semantics = [#tpu.dimension_semantics<arbitrary>], iteration_bounds = array<i64: 1>, scalar_prefetch = 0 : i64, scratch_operands = 0 : i64, tpu.core_type = #tpu.core_type<tc>, window_params = [{pipeline_mode = #tpu.pipeline_mode<synchronous>, transform_indices = @transform_0, window_bounds = array<i64: 128, 25>}, {pipeline_mode = #tpu.pipeline_mode<synchronous>, transform_indices = @transform_1, window_bounds = array<i64: 25, 32>}, {pipeline_mode = #tpu.pipeline_mode<synchronous>, transform_indices = @transform_2, window_bounds = array<i64: 1, 32>}, {pipeline_mode = #tpu.pipeline_mode<synchronous>, transform_indices = @transform_3, window_bounds = array<i64: 1, 32>}, {pipeline_mode = #tpu.pipeline_mode<synchronous>, transform_indices = @transform_4, window_bounds = array<i64: 1, 32>}, {pipeline_mode = #tpu.pipeline_mode<synchronous>, transform_indices = @transform_5, window_bounds = array<i64: 128, 32>}]} {
    %c0 = arith.constant 0 : index
    %c0_0 = arith.constant 0 : index
    %0 = vector.load %arg1[%c0, %c0_0] : memref<128x25xbf16, #tpu.memory_space<vmem>>, vector<128x25xbf16>
    %c0_1 = arith.constant 0 : index
    %c0_2 = arith.constant 0 : index
    %1 = vector.load %arg2[%c0_1, %c0_2] : memref<25x32xbf16, #tpu.memory_space<vmem>>, vector<25x32xbf16>
    %cst = arith.constant dense<0.000000e+00> : vector<128x32xf32>
    %2 = tpu.matmul %0, %1, %cst {dimension_numbers = #tpu.dot_dimension_numbers<[1], [0], [0], [1], [0, 0, 1, 1], [], []>} : vector<128x25xbf16>, vector<25x32xbf16>, vector<128x32xf32> -> vector<128x32xf32>
    %c0_3 = arith.constant 0 : index
    %c0_4 = arith.constant 0 : index
    %3 = vector.load %arg3[%c0_3, %c0_4] : memref<1x32xf32, #tpu.memory_space<vmem>>, vector<1x32xf32>
    %4 = vector.broadcast %3 : vector<1x32xf32> to vector<128x32xf32>
    %5 = arith.addf %2, %4 : vector<128x32xf32>
    %cst_5 = arith.constant dense<0.000000e+00> : vector<32xf32>
    %6 = vector.multi_reduction <add>, %5, %cst_5 [0] : vector<128x32xf32> to vector<32xf32>
    %7 = vector.shape_cast %6 : vector<32xf32> to vector<1x32xf32>
    %cst_6 = arith.constant 1.280000e+02 : f32
    %8 = vector.broadcast %cst_6 : f32 to vector<1x32xf32>
    %9 = arith.divf %7, %8 : vector<1x32xf32>
    %10 = vector.broadcast %9 : vector<1x32xf32> to vector<128x32xf32>
    %11 = arith.subf %5, %10 : vector<128x32xf32>
    %12 = arith.mulf %11, %11 : vector<128x32xf32>
    %cst_7 = arith.constant dense<0.000000e+00> : vector<32xf32>
    %13 = vector.multi_reduction <add>, %12, %cst_7 [0] : vector<128x32xf32> to vector<32xf32>
    %14 = vector.shape_cast %13 : vector<32xf32> to vector<1x32xf32>
    %cst_8 = arith.constant 1.280000e+02 : f32
    %15 = vector.broadcast %cst_8 : f32 to vector<1x32xf32>
    %16 = arith.divf %14, %15 : vector<1x32xf32>
    %c0_9 = arith.constant 0 : index
    %c0_10 = arith.constant 0 : index
    %17 = vector.load %arg4[%c0_9, %c0_10] : memref<1x32xf32, #tpu.memory_space<vmem>>, vector<1x32xf32>
    %cst_11 = arith.constant 9.99999974E-6 : f32
    %18 = vector.broadcast %cst_11 : f32 to vector<1x32xf32>
    %19 = arith.addf %16, %18 : vector<1x32xf32>
    %20 = math.rsqrt %19 : vector<1x32xf32>
    %21 = arith.mulf %17, %20 : vector<1x32xf32>
    %c0_12 = arith.constant 0 : index
    %c0_13 = arith.constant 0 : index
    %22 = vector.load %arg5[%c0_12, %c0_13] : memref<1x32xf32, #tpu.memory_space<vmem>>, vector<1x32xf32>
    %23 = arith.mulf %9, %21 : vector<1x32xf32>
    %24 = arith.subf %22, %23 : vector<1x32xf32>
    %25 = vector.broadcast %21 : vector<1x32xf32> to vector<128x32xf32>
    %26 = arith.mulf %5, %25 : vector<128x32xf32>
    %27 = vector.broadcast %24 : vector<1x32xf32> to vector<128x32xf32>
    %28 = arith.addf %26, %27 : vector<128x32xf32>
    %cst_14 = arith.constant 0.000000e+00 : f32
    %29 = vector.broadcast %cst_14 : f32 to vector<128x32xf32>
    %30 = arith.maximumf %28, %29 : vector<128x32xf32>
    %c0_15 = arith.constant 0 : index
    %c0_16 = arith.constant 0 : index
    %31 = vector.load %arg6[%c0_15, %c0_16] : memref<128x32xf32, #tpu.memory_space<vmem>>, vector<128x32xf32>
    tpu.vector_store %arg6[%c0_15, %c0_16], %30 {strides = array<i32>} : memref<128x32xf32, #tpu.memory_space<vmem>>, vector<128x32xf32>,
    return
  }
  func.func @transform_0(%arg0: i32) -> (i32, i32) {
    %c0_i32 = arith.constant 0 : i32
    %c0_i32_0 = arith.constant 0 : i32
    %c0_i32_1 = arith.constant 0 : i32
    return %c0_i32, %c0_i32_0 : i32, i32
  }
  func.func @transform_1(%arg0: i32) -> (i32, i32) {
    %c0_i32 = arith.constant 0 : i32
    %c0_i32_0 = arith.constant 0 : i32
    %c0_i32_1 = arith.constant 0 : i32
    return %c0_i32, %c0_i32_0 : i32, i32
  }
  func.func @transform_2(%arg0: i32) -> (i32, i32) {
    %c0_i32 = arith.constant 0 : i32
    %c0_i32_0 = arith.constant 0 : i32
    %c0_i32_1 = arith.constant 0 : i32
    return %c0_i32, %c0_i32_0 : i32, i32
  }
  func.func @transform_3(%arg0: i32) -> (i32, i32) {
    %c0_i32 = arith.constant 0 : i32
    %c0_i32_0 = arith.constant 0 : i32
    %c0_i32_1 = arith.constant 0 : i32
    return %c0_i32, %c0_i32_0 : i32, i32
  }
  func.func @transform_4(%arg0: i32) -> (i32, i32) {
    %c0_i32 = arith.constant 0 : i32
    %c0_i32_0 = arith.constant 0 : i32
    %c0_i32_1 = arith.constant 0 : i32
    return %c0_i32, %c0_i32_0 : i32, i32
  }
  func.func @transform_5(%arg0: i32) -> (i32, i32) {
    %c0_i32 = arith.constant 0 : i32
    %c0_i32_0 = arith.constant 0 : i32
    %c0_i32_1 = arith.constant 0 : i32
    return %c0_i32, %c0_i32_0 : i32, i32
  }
}

module attributes {stable_mosaic.version = 11 : i64} {
  func.func @_conv_bn_relu_kernel(%arg0: i32, %arg1: memref<32x800xbf16, #tpu.memory_space<vmem>>, %arg2: memref<800x64xbf16, #tpu.memory_space<vmem>>, %arg3: memref<1x64xf32, #tpu.memory_space<vmem>>, %arg4: memref<1x64xf32, #tpu.memory_space<vmem>>, %arg5: memref<1x64xf32, #tpu.memory_space<vmem>>, %arg6: memref<32x64xf32, #tpu.memory_space<vmem>>) attributes {dimension_semantics = [#tpu.dimension_semantics<arbitrary>], iteration_bounds = array<i64: 1>, scalar_prefetch = 0 : i64, scratch_operands = 0 : i64, tpu.core_type = #tpu.core_type<tc>, window_params = [{pipeline_mode = #tpu.pipeline_mode<synchronous>, transform_indices = @transform_0, window_bounds = array<i64: 32, 800>}, {pipeline_mode = #tpu.pipeline_mode<synchronous>, transform_indices = @transform_1, window_bounds = array<i64: 800, 64>}, {pipeline_mode = #tpu.pipeline_mode<synchronous>, transform_indices = @transform_2, window_bounds = array<i64: 1, 64>}, {pipeline_mode = #tpu.pipeline_mode<synchronous>, transform_indices = @transform_3, window_bounds = array<i64: 1, 64>}, {pipeline_mode = #tpu.pipeline_mode<synchronous>, transform_indices = @transform_4, window_bounds = array<i64: 1, 64>}, {pipeline_mode = #tpu.pipeline_mode<synchronous>, transform_indices = @transform_5, window_bounds = array<i64: 32, 64>}]} {
    %c0 = arith.constant 0 : index
    %c0_0 = arith.constant 0 : index
    %0 = vector.load %arg1[%c0, %c0_0] : memref<32x800xbf16, #tpu.memory_space<vmem>>, vector<32x800xbf16>
    %c0_1 = arith.constant 0 : index
    %c0_2 = arith.constant 0 : index
    %1 = vector.load %arg2[%c0_1, %c0_2] : memref<800x64xbf16, #tpu.memory_space<vmem>>, vector<800x64xbf16>
    %cst = arith.constant dense<0.000000e+00> : vector<32x64xf32>
    %2 = tpu.matmul %0, %1, %cst {dimension_numbers = #tpu.dot_dimension_numbers<[1], [0], [0], [1], [0, 0, 1, 1], [], []>} : vector<32x800xbf16>, vector<800x64xbf16>, vector<32x64xf32> -> vector<32x64xf32>
    %c0_3 = arith.constant 0 : index
    %c0_4 = arith.constant 0 : index
    %3 = vector.load %arg3[%c0_3, %c0_4] : memref<1x64xf32, #tpu.memory_space<vmem>>, vector<1x64xf32>
    %4 = vector.broadcast %3 : vector<1x64xf32> to vector<32x64xf32>
    %5 = arith.addf %2, %4 : vector<32x64xf32>
    %cst_5 = arith.constant dense<0.000000e+00> : vector<64xf32>
    %6 = vector.multi_reduction <add>, %5, %cst_5 [0] : vector<32x64xf32> to vector<64xf32>
    %7 = vector.shape_cast %6 : vector<64xf32> to vector<1x64xf32>
    %cst_6 = arith.constant 3.200000e+01 : f32
    %8 = vector.broadcast %cst_6 : f32 to vector<1x64xf32>
    %9 = arith.divf %7, %8 : vector<1x64xf32>
    %10 = vector.broadcast %9 : vector<1x64xf32> to vector<32x64xf32>
    %11 = arith.subf %5, %10 : vector<32x64xf32>
    %12 = arith.mulf %11, %11 : vector<32x64xf32>
    %cst_7 = arith.constant dense<0.000000e+00> : vector<64xf32>
    %13 = vector.multi_reduction <add>, %12, %cst_7 [0] : vector<32x64xf32> to vector<64xf32>
    %14 = vector.shape_cast %13 : vector<64xf32> to vector<1x64xf32>
    %cst_8 = arith.constant 3.200000e+01 : f32
    %15 = vector.broadcast %cst_8 : f32 to vector<1x64xf32>
    %16 = arith.divf %14, %15 : vector<1x64xf32>
    %c0_9 = arith.constant 0 : index
    %c0_10 = arith.constant 0 : index
    %17 = vector.load %arg4[%c0_9, %c0_10] : memref<1x64xf32, #tpu.memory_space<vmem>>, vector<1x64xf32>
    %cst_11 = arith.constant 9.99999974E-6 : f32
    %18 = vector.broadcast %cst_11 : f32 to vector<1x64xf32>
    %19 = arith.addf %16, %18 : vector<1x64xf32>
    %20 = math.rsqrt %19 : vector<1x64xf32>
    %21 = arith.mulf %17, %20 : vector<1x64xf32>
    %c0_12 = arith.constant 0 : index
    %c0_13 = arith.constant 0 : index
    %22 = vector.load %arg5[%c0_12, %c0_13] : memref<1x64xf32, #tpu.memory_space<vmem>>, vector<1x64xf32>
    %23 = arith.mulf %9, %21 : vector<1x64xf32>
    %24 = arith.subf %22, %23 : vector<1x64xf32>
    %25 = vector.broadcast %21 : vector<1x64xf32> to vector<32x64xf32>
    %26 = arith.mulf %5, %25 : vector<32x64xf32>
    %27 = vector.broadcast %24 : vector<1x64xf32> to vector<32x64xf32>
    %28 = arith.addf %26, %27 : vector<32x64xf32>
    %cst_14 = arith.constant 0.000000e+00 : f32
    %29 = vector.broadcast %cst_14 : f32 to vector<32x64xf32>
    %30 = arith.maximumf %28, %29 : vector<32x64xf32>
    %c0_15 = arith.constant 0 : index
    %c0_16 = arith.constant 0 : index
    %31 = vector.load %arg6[%c0_15, %c0_16] : memref<32x64xf32, #tpu.memory_space<vmem>>, vector<32x64xf32>
    tpu.vector_store %arg6[%c0_15, %c0_16], %30 {strides = array<i32>} : memref<32x64xf32, #tpu.memory_space<vmem>>, vector<32x64xf32>,
    return
  }
  func.func @transform_0(%arg0: i32) -> (i32, i32) {
    %c0_i32 = arith.constant 0 : i32
    %c0_i32_0 = arith.constant 0 : i32
    %c0_i32_1 = arith.constant 0 : i32
    return %c0_i32, %c0_i32_0 : i32, i32
  }
  func.func @transform_1(%arg0: i32) -> (i32, i32) {
    %c0_i32 = arith.constant 0 : i32
    %c0_i32_0 = arith.constant 0 : i32
    %c0_i32_1 = arith.constant 0 : i32
    return %c0_i32, %c0_i32_0 : i32, i32
  }
  func.func @transform_2(%arg0: i32) -> (i32, i32) {
    %c0_i32 = arith.constant 0 : i32
    %c0_i32_0 = arith.constant 0 : i32
    %c0_i32_1 = arith.constant 0 : i32
    return %c0_i32, %c0_i32_0 : i32, i32
  }
  func.func @transform_3(%arg0: i32) -> (i32, i32) {
    %c0_i32 = arith.constant 0 : i32
    %c0_i32_0 = arith.constant 0 : i32
    %c0_i32_1 = arith.constant 0 : i32
    return %c0_i32, %c0_i32_0 : i32, i32
  }
  func.func @transform_4(%arg0: i32) -> (i32, i32) {
    %c0_i32 = arith.constant 0 : i32
    %c0_i32_0 = arith.constant 0 : i32
    %c0_i32_1 = arith.constant 0 : i32
    return %c0_i32, %c0_i32_0 : i32, i32
  }
  func.func @transform_5(%arg0: i32) -> (i32, i32) {
    %c0_i32 = arith.constant 0 : i32
    %c0_i32_0 = arith.constant 0 : i32
    %c0_i32_1 = arith.constant 0 : i32
    return %c0_i32, %c0_i32_0 : i32, i32
  }
}

module attributes {stable_mosaic.version = 11 : i64} {
  func.func @kernel(%arg0: i32, %arg1: memref<32x1600xbf16, #tpu.memory_space<vmem>>, %arg2: memref<1600x128xbf16, #tpu.memory_space<vmem>>, %arg3: memref<1x128xf32, #tpu.memory_space<vmem>>, %arg4: memref<1x128xf32, #tpu.memory_space<vmem>>, %arg5: memref<1x128xf32, #tpu.memory_space<vmem>>, %arg6: memref<2048x4xf32, #tpu.memory_space<vmem>>, %arg7: memref<1x4xf32, #tpu.memory_space<vmem>>, %arg8: memref<2x4xf32, #tpu.memory_space<vmem>>) attributes {dimension_semantics = [#tpu.dimension_semantics<arbitrary>], iteration_bounds = array<i64: 1>, scalar_prefetch = 0 : i64, scratch_operands = 0 : i64, tpu.core_type = #tpu.core_type<tc>, window_params = [{pipeline_mode = #tpu.pipeline_mode<synchronous>, transform_indices = @transform_0, window_bounds = array<i64: 32, 1600>}, {pipeline_mode = #tpu.pipeline_mode<synchronous>, transform_indices = @transform_1, window_bounds = array<i64: 1600, 128>}, {pipeline_mode = #tpu.pipeline_mode<synchronous>, transform_indices = @transform_2, window_bounds = array<i64: 1, 128>}, {pipeline_mode = #tpu.pipeline_mode<synchronous>, transform_indices = @transform_3, window_bounds = array<i64: 1, 128>}, {pipeline_mode = #tpu.pipeline_mode<synchronous>, transform_indices = @transform_4, window_bounds = array<i64: 1, 128>}, {pipeline_mode = #tpu.pipeline_mode<synchronous>, transform_indices = @transform_5, window_bounds = array<i64: 2048, 4>}, {pipeline_mode = #tpu.pipeline_mode<synchronous>, transform_indices = @transform_6, window_bounds = array<i64: 1, 4>}, {pipeline_mode = #tpu.pipeline_mode<synchronous>, transform_indices = @transform_7, window_bounds = array<i64: 2, 4>}]} {
    %c0 = arith.constant 0 : index
    %c0_0 = arith.constant 0 : index
    %0 = vector.load %arg1[%c0, %c0_0] : memref<32x1600xbf16, #tpu.memory_space<vmem>>, vector<32x1600xbf16>
    %c0_1 = arith.constant 0 : index
    %c0_2 = arith.constant 0 : index
    %1 = vector.load %arg2[%c0_1, %c0_2] : memref<1600x128xbf16, #tpu.memory_space<vmem>>, vector<1600x128xbf16>
    %cst = arith.constant dense<0.000000e+00> : vector<32x128xf32>
    %2 = tpu.matmul %0, %1, %cst {dimension_numbers = #tpu.dot_dimension_numbers<[1], [0], [0], [1], [0, 0, 1, 1], [], []>} : vector<32x1600xbf16>, vector<1600x128xbf16>, vector<32x128xf32> -> vector<32x128xf32>
    %c0_3 = arith.constant 0 : index
    %c0_4 = arith.constant 0 : index
    %3 = vector.load %arg3[%c0_3, %c0_4] : memref<1x128xf32, #tpu.memory_space<vmem>>, vector<1x128xf32>
    %4 = vector.broadcast %3 : vector<1x128xf32> to vector<32x128xf32>
    %5 = arith.addf %2, %4 : vector<32x128xf32>
    %cst_5 = arith.constant dense<0.000000e+00> : vector<128xf32>
    %6 = vector.multi_reduction <add>, %5, %cst_5 [0] : vector<32x128xf32> to vector<128xf32>
    %7 = vector.shape_cast %6 : vector<128xf32> to vector<1x128xf32>
    %cst_6 = arith.constant 3.200000e+01 : f32
    %8 = vector.broadcast %cst_6 : f32 to vector<1x128xf32>
    %9 = arith.divf %7, %8 : vector<1x128xf32>
    %10 = vector.broadcast %9 : vector<1x128xf32> to vector<32x128xf32>
    %11 = arith.subf %5, %10 : vector<32x128xf32>
    %12 = arith.mulf %11, %11 : vector<32x128xf32>
    %cst_7 = arith.constant dense<0.000000e+00> : vector<128xf32>
    %13 = vector.multi_reduction <add>, %12, %cst_7 [0] : vector<32x128xf32> to vector<128xf32>
    %14 = vector.shape_cast %13 : vector<128xf32> to vector<1x128xf32>
    %cst_8 = arith.constant 3.200000e+01 : f32
    %15 = vector.broadcast %cst_8 : f32 to vector<1x128xf32>
    %16 = arith.divf %14, %15 : vector<1x128xf32>
    %c0_9 = arith.constant 0 : index
    %c0_10 = arith.constant 0 : index
    %17 = vector.load %arg4[%c0_9, %c0_10] : memref<1x128xf32, #tpu.memory_space<vmem>>, vector<1x128xf32>
    %cst_11 = arith.constant 9.99999974E-6 : f32
    %18 = vector.broadcast %cst_11 : f32 to vector<1x128xf32>
    %19 = arith.addf %16, %18 : vector<1x128xf32>
    %20 = math.rsqrt %19 : vector<1x128xf32>
    %21 = arith.mulf %17, %20 : vector<1x128xf32>
    %c0_12 = arith.constant 0 : index
    %c0_13 = arith.constant 0 : index
    %22 = vector.load %arg5[%c0_12, %c0_13] : memref<1x128xf32, #tpu.memory_space<vmem>>, vector<1x128xf32>
    %23 = arith.mulf %9, %21 : vector<1x128xf32>
    %24 = arith.subf %22, %23 : vector<1x128xf32>
    %25 = vector.broadcast %21 : vector<1x128xf32> to vector<32x128xf32>
    %26 = arith.mulf %5, %25 : vector<32x128xf32>
    %27 = vector.broadcast %24 : vector<1x128xf32> to vector<32x128xf32>
    %28 = arith.addf %26, %27 : vector<32x128xf32>
    %cst_14 = arith.constant 0.000000e+00 : f32
    %29 = vector.broadcast %cst_14 : f32 to vector<32x128xf32>
    %30 = arith.maximumf %28, %29 : vector<32x128xf32>
    %c0_15 = arith.constant 0 : index
    %c0_16 = arith.constant 0 : index
    %31 = vector.load %arg6[%c0_15, %c0_16] : memref<2048x4xf32, #tpu.memory_space<vmem>>, vector<2048x4xf32>
    %cst_17 = arith.constant 0.000000e+00 : f32
    %32 = vector.broadcast %cst_17 : f32 to vector<2x4xf32>
    %c0_18 = arith.constant 0 : index
    %c0_19 = arith.constant 0 : index
    %33 = vector.load %arg7[%c0_18, %c0_19] : memref<1x4xf32, #tpu.memory_space<vmem>>, vector<1x4xf32>
    %34 = vector.broadcast %33 : vector<1x4xf32> to vector<2x4xf32>
    %35 = arith.addf %32, %34 : vector<2x4xf32>
    %36 = vector.extract_strided_slice %30 {offsets = [0, 0], sizes = [2, 128], strides = [1, 1]} : vector<32x128xf32> to vector<2x128xf32>
    %37 = vector.extract_strided_slice %31 {offsets = [0, 0], sizes = [128, 4], strides = [1, 1]} : vector<2048x4xf32> to vector<128x4xf32>
    %cst_20 = arith.constant dense<0.000000e+00> : vector<2x4xf32>
    %38 = tpu.matmul %36, %37, %cst_20 {dimension_numbers = #tpu.dot_dimension_numbers<[1], [0], [0], [1], [0, 0, 1, 1], [], []>} : vector<2x128xf32>, vector<128x4xf32>, vector<2x4xf32> -> vector<2x4xf32>
    %39 = arith.addf %35, %38 : vector<2x4xf32>
    %40 = vector.extract_strided_slice %30 {offsets = [2, 0], sizes = [2, 128], strides = [1, 1]} : vector<32x128xf32> to vector<2x128xf32>
    %41 = vector.extract_strided_slice %31 {offsets = [128, 0], sizes = [128, 4], strides = [1, 1]} : vector<2048x4xf32> to vector<128x4xf32>
    %cst_21 = arith.constant dense<0.000000e+00> : vector<2x4xf32>
    %42 = tpu.matmul %40, %41, %cst_21 {dimension_numbers = #tpu.dot_dimension_numbers<[1], [0], [0], [1], [0, 0, 1, 1], [], []>} : vector<2x128xf32>, vector<128x4xf32>, vector<2x4xf32> -> vector<2x4xf32>
    %43 = arith.addf %39, %42 : vector<2x4xf32>
    %44 = vector.extract_strided_slice %30 {offsets = [4, 0], sizes = [2, 128], strides = [1, 1]} : vector<32x128xf32> to vector<2x128xf32>
    %45 = vector.extract_strided_slice %31 {offsets = [256, 0], sizes = [128, 4], strides = [1, 1]} : vector<2048x4xf32> to vector<128x4xf32>
    %cst_22 = arith.constant dense<0.000000e+00> : vector<2x4xf32>
    %46 = tpu.matmul %44, %45, %cst_22 {dimension_numbers = #tpu.dot_dimension_numbers<[1], [0], [0], [1], [0, 0, 1, 1], [], []>} : vector<2x128xf32>, vector<128x4xf32>, vector<2x4xf32> -> vector<2x4xf32>
    %47 = arith.addf %43, %46 : vector<2x4xf32>
    %48 = vector.extract_strided_slice %30 {offsets = [6, 0], sizes = [2, 128], strides = [1, 1]} : vector<32x128xf32> to vector<2x128xf32>
    %49 = vector.extract_strided_slice %31 {offsets = [384, 0], sizes = [128, 4], strides = [1, 1]} : vector<2048x4xf32> to vector<128x4xf32>
    %cst_23 = arith.constant dense<0.000000e+00> : vector<2x4xf32>
    %50 = tpu.matmul %48, %49, %cst_23 {dimension_numbers = #tpu.dot_dimension_numbers<[1], [0], [0], [1], [0, 0, 1, 1], [], []>} : vector<2x128xf32>, vector<128x4xf32>, vector<2x4xf32> -> vector<2x4xf32>
    %51 = arith.addf %47, %50 : vector<2x4xf32>
    %52 = vector.extract_strided_slice %30 {offsets = [8, 0], sizes = [2, 128], strides = [1, 1]} : vector<32x128xf32> to vector<2x128xf32>
    %53 = vector.extract_strided_slice %31 {offsets = [512, 0], sizes = [128, 4], strides = [1, 1]} : vector<2048x4xf32> to vector<128x4xf32>
    %cst_24 = arith.constant dense<0.000000e+00> : vector<2x4xf32>
    %54 = tpu.matmul %52, %53, %cst_24 {dimension_numbers = #tpu.dot_dimension_numbers<[1], [0], [0], [1], [0, 0, 1, 1], [], []>} : vector<2x128xf32>, vector<128x4xf32>, vector<2x4xf32> -> vector<2x4xf32>
    %55 = arith.addf %51, %54 : vector<2x4xf32>
    %56 = vector.extract_strided_slice %30 {offsets = [10, 0], sizes = [2, 128], strides = [1, 1]} : vector<32x128xf32> to vector<2x128xf32>
    %57 = vector.extract_strided_slice %31 {offsets = [640, 0], sizes = [128, 4], strides = [1, 1]} : vector<2048x4xf32> to vector<128x4xf32>
    %cst_25 = arith.constant dense<0.000000e+00> : vector<2x4xf32>
    %58 = tpu.matmul %56, %57, %cst_25 {dimension_numbers = #tpu.dot_dimension_numbers<[1], [0], [0], [1], [0, 0, 1, 1], [], []>} : vector<2x128xf32>, vector<128x4xf32>, vector<2x4xf32> -> vector<2x4xf32>
    %59 = arith.addf %55, %58 : vector<2x4xf32>
    %60 = vector.extract_strided_slice %30 {offsets = [12, 0], sizes = [2, 128], strides = [1, 1]} : vector<32x128xf32> to vector<2x128xf32>
    %61 = vector.extract_strided_slice %31 {offsets = [768, 0], sizes = [128, 4], strides = [1, 1]} : vector<2048x4xf32> to vector<128x4xf32>
    %cst_26 = arith.constant dense<0.000000e+00> : vector<2x4xf32>
    %62 = tpu.matmul %60, %61, %cst_26 {dimension_numbers = #tpu.dot_dimension_numbers<[1], [0], [0], [1], [0, 0, 1, 1], [], []>} : vector<2x128xf32>, vector<128x4xf32>, vector<2x4xf32> -> vector<2x4xf32>
    %63 = arith.addf %59, %62 : vector<2x4xf32>
    %64 = vector.extract_strided_slice %30 {offsets = [14, 0], sizes = [2, 128], strides = [1, 1]} : vector<32x128xf32> to vector<2x128xf32>
    %65 = vector.extract_strided_slice %31 {offsets = [896, 0], sizes = [128, 4], strides = [1, 1]} : vector<2048x4xf32> to vector<128x4xf32>
    %cst_27 = arith.constant dense<0.000000e+00> : vector<2x4xf32>
    %66 = tpu.matmul %64, %65, %cst_27 {dimension_numbers = #tpu.dot_dimension_numbers<[1], [0], [0], [1], [0, 0, 1, 1], [], []>} : vector<2x128xf32>, vector<128x4xf32>, vector<2x4xf32> -> vector<2x4xf32>
    %67 = arith.addf %63, %66 : vector<2x4xf32>
    %68 = vector.extract_strided_slice %30 {offsets = [16, 0], sizes = [2, 128], strides = [1, 1]} : vector<32x128xf32> to vector<2x128xf32>
    %69 = vector.extract_strided_slice %31 {offsets = [1024, 0], sizes = [128, 4], strides = [1, 1]} : vector<2048x4xf32> to vector<128x4xf32>
    %cst_28 = arith.constant dense<0.000000e+00> : vector<2x4xf32>
    %70 = tpu.matmul %68, %69, %cst_28 {dimension_numbers = #tpu.dot_dimension_numbers<[1], [0], [0], [1], [0, 0, 1, 1], [], []>} : vector<2x128xf32>, vector<128x4xf32>, vector<2x4xf32> -> vector<2x4xf32>
    %71 = arith.addf %67, %70 : vector<2x4xf32>
    %72 = vector.extract_strided_slice %30 {offsets = [18, 0], sizes = [2, 128], strides = [1, 1]} : vector<32x128xf32> to vector<2x128xf32>
    %73 = vector.extract_strided_slice %31 {offsets = [1152, 0], sizes = [128, 4], strides = [1, 1]} : vector<2048x4xf32> to vector<128x4xf32>
    %cst_29 = arith.constant dense<0.000000e+00> : vector<2x4xf32>
    %74 = tpu.matmul %72, %73, %cst_29 {dimension_numbers = #tpu.dot_dimension_numbers<[1], [0], [0], [1], [0, 0, 1, 1], [], []>} : vector<2x128xf32>, vector<128x4xf32>, vector<2x4xf32> -> vector<2x4xf32>
    %75 = arith.addf %71, %74 : vector<2x4xf32>
    %76 = vector.extract_strided_slice %30 {offsets = [20, 0], sizes = [2, 128], strides = [1, 1]} : vector<32x128xf32> to vector<2x128xf32>
    %77 = vector.extract_strided_slice %31 {offsets = [1280, 0], sizes = [128, 4], strides = [1, 1]} : vector<2048x4xf32> to vector<128x4xf32>
    %cst_30 = arith.constant dense<0.000000e+00> : vector<2x4xf32>
    %78 = tpu.matmul %76, %77, %cst_30 {dimension_numbers = #tpu.dot_dimension_numbers<[1], [0], [0], [1], [0, 0, 1, 1], [], []>} : vector<2x128xf32>, vector<128x4xf32>, vector<2x4xf32> -> vector<2x4xf32>
    %79 = arith.addf %75, %78 : vector<2x4xf32>
    %80 = vector.extract_strided_slice %30 {offsets = [22, 0], sizes = [2, 128], strides = [1, 1]} : vector<32x128xf32> to vector<2x128xf32>
    %81 = vector.extract_strided_slice %31 {offsets = [1408, 0], sizes = [128, 4], strides = [1, 1]} : vector<2048x4xf32> to vector<128x4xf32>
    %cst_31 = arith.constant dense<0.000000e+00> : vector<2x4xf32>
    %82 = tpu.matmul %80, %81, %cst_31 {dimension_numbers = #tpu.dot_dimension_numbers<[1], [0], [0], [1], [0, 0, 1, 1], [], []>} : vector<2x128xf32>, vector<128x4xf32>, vector<2x4xf32> -> vector<2x4xf32>
    %83 = arith.addf %79, %82 : vector<2x4xf32>
    %84 = vector.extract_strided_slice %30 {offsets = [24, 0], sizes = [2, 128], strides = [1, 1]} : vector<32x128xf32> to vector<2x128xf32>
    %85 = vector.extract_strided_slice %31 {offsets = [1536, 0], sizes = [128, 4], strides = [1, 1]} : vector<2048x4xf32> to vector<128x4xf32>
    %cst_32 = arith.constant dense<0.000000e+00> : vector<2x4xf32>
    %86 = tpu.matmul %84, %85, %cst_32 {dimension_numbers = #tpu.dot_dimension_numbers<[1], [0], [0], [1], [0, 0, 1, 1], [], []>} : vector<2x128xf32>, vector<128x4xf32>, vector<2x4xf32> -> vector<2x4xf32>
    %87 = arith.addf %83, %86 : vector<2x4xf32>
    %88 = vector.extract_strided_slice %30 {offsets = [26, 0], sizes = [2, 128], strides = [1, 1]} : vector<32x128xf32> to vector<2x128xf32>
    %89 = vector.extract_strided_slice %31 {offsets = [1664, 0], sizes = [128, 4], strides = [1, 1]} : vector<2048x4xf32> to vector<128x4xf32>
    %cst_33 = arith.constant dense<0.000000e+00> : vector<2x4xf32>
    %90 = tpu.matmul %88, %89, %cst_33 {dimension_numbers = #tpu.dot_dimension_numbers<[1], [0], [0], [1], [0, 0, 1, 1], [], []>} : vector<2x128xf32>, vector<128x4xf32>, vector<2x4xf32> -> vector<2x4xf32>
    %91 = arith.addf %87, %90 : vector<2x4xf32>
    %92 = vector.extract_strided_slice %30 {offsets = [28, 0], sizes = [2, 128], strides = [1, 1]} : vector<32x128xf32> to vector<2x128xf32>
    %93 = vector.extract_strided_slice %31 {offsets = [1792, 0], sizes = [128, 4], strides = [1, 1]} : vector<2048x4xf32> to vector<128x4xf32>
    %cst_34 = arith.constant dense<0.000000e+00> : vector<2x4xf32>
    %94 = tpu.matmul %92, %93, %cst_34 {dimension_numbers = #tpu.dot_dimension_numbers<[1], [0], [0], [1], [0, 0, 1, 1], [], []>} : vector<2x128xf32>, vector<128x4xf32>, vector<2x4xf32> -> vector<2x4xf32>
    %95 = arith.addf %91, %94 : vector<2x4xf32>
    %96 = vector.extract_strided_slice %30 {offsets = [30, 0], sizes = [2, 128], strides = [1, 1]} : vector<32x128xf32> to vector<2x128xf32>
    %97 = vector.extract_strided_slice %31 {offsets = [1920, 0], sizes = [128, 4], strides = [1, 1]} : vector<2048x4xf32> to vector<128x4xf32>
    %cst_35 = arith.constant dense<0.000000e+00> : vector<2x4xf32>
    %98 = tpu.matmul %96, %97, %cst_35 {dimension_numbers = #tpu.dot_dimension_numbers<[1], [0], [0], [1], [0, 0, 1, 1], [], []>} : vector<2x128xf32>, vector<128x4xf32>, vector<2x4xf32> -> vector<2x4xf32>
    %99 = arith.addf %95, %98 : vector<2x4xf32>
    %cst_36 = arith.constant dense<0xFF800000> : vector<2xf32>
    %100 = vector.multi_reduction <maximumf>, %99, %cst_36 [1] : vector<2x4xf32> to vector<2xf32>
    %101 = vector.shape_cast %100 : vector<2xf32> to vector<2x1xf32>
    %102 = vector.broadcast %101 : vector<2x1xf32> to vector<2x4xf32>
    %103 = arith.subf %99, %102 : vector<2x4xf32>
    %104 = math.exp %103 : vector<2x4xf32>
    %cst_37 = arith.constant dense<0.000000e+00> : vector<2xf32>
    %105 = vector.multi_reduction <add>, %104, %cst_37 [1] : vector<2x4xf32> to vector<2xf32>
    %106 = vector.shape_cast %105 : vector<2xf32> to vector<2x1xf32>
    %107 = tpu.reciprocal %106 : vector<2x1xf32> -> vector<2x1xf32>
    %108 = vector.broadcast %107 : vector<2x1xf32> to vector<2x4xf32>
    %109 = arith.mulf %104, %108 : vector<2x4xf32>
    %c0_38 = arith.constant 0 : index
    %c0_39 = arith.constant 0 : index
    %110 = vector.load %arg8[%c0_38, %c0_39] : memref<2x4xf32, #tpu.memory_space<vmem>>, vector<2x4xf32>
    tpu.vector_store %arg8[%c0_38, %c0_39], %109 {strides = array<i32>} : memref<2x4xf32, #tpu.memory_space<vmem>>, vector<2x4xf32>,
    return
  }
  func.func @transform_0(%arg0: i32) -> (i32, i32) {
    %c0_i32 = arith.constant 0 : i32
    %c0_i32_0 = arith.constant 0 : i32
    %c0_i32_1 = arith.constant 0 : i32
    return %c0_i32, %c0_i32_0 : i32, i32
  }
  func.func @transform_1(%arg0: i32) -> (i32, i32) {
    %c0_i32 = arith.constant 0 : i32
    %c0_i32_0 = arith.constant 0 : i32
    %c0_i32_1 = arith.constant 0 : i32
    return %c0_i32, %c0_i32_0 : i32, i32
  }
  func.func @transform_2(%arg0: i32) -> (i32, i32) {
    %c0_i32 = arith.constant 0 : i32
    %c0_i32_0 = arith.constant 0 : i32
    %c0_i32_1 = arith.constant 0 : i32
    return %c0_i32, %c0_i32_0 : i32, i32
  }
  func.func @transform_3(%arg0: i32) -> (i32, i32) {
    %c0_i32 = arith.constant 0 : i32
    %c0_i32_0 = arith.constant 0 : i32
    %c0_i32_1 = arith.constant 0 : i32
    return %c0_i32, %c0_i32_0 : i32, i32
  }
  func.func @transform_4(%arg0: i32) -> (i32, i32) {
    %c0_i32 = arith.constant 0 : i32
    %c0_i32_0 = arith.constant 0 : i32
    %c0_i32_1 = arith.constant 0 : i32
    return %c0_i32, %c0_i32_0 : i32, i32
  }
  func.func @transform_5(%arg0: i32) -> (i32, i32) {
    %c0_i32 = arith.constant 0 : i32
    %c0_i32_0 = arith.constant 0 : i32
    %c0_i32_1 = arith.constant 0 : i32
    return %c0_i32, %c0_i32_0 : i32, i32
  }
  func.func @transform_6(%arg0: i32) -> (i32, i32) {
    %c0_i32 = arith.constant 0 : i32
    %c0_i32_0 = arith.constant 0 : i32
    %c0_i32_1 = arith.constant 0 : i32
    return %c0_i32, %c0_i32_0 : i32, i32
  }
  func.func @transform_7(%arg0: i32) -> (i32, i32) {
    %c0_i32 = arith.constant 0 : i32
    %c0_i32_0 = arith.constant 0 : i32
    %c0_i32_1 = arith.constant 0 : i32
    return %c0_i32, %c0_i32_0 : i32, i32
  }
}

</mosaic_0001>

<bundles_post_ra>
// kernel: dqn_cnn_forward.3
= control target key start
LH: loop header
LB: loop body
LE: loop exit
PB: predicated region body
PF: predicated region fallthrough
CT: control target
= control target key end

     0   :  { %vm124_vm0 = vcmask 1043456   ;;  %vm125_vm1 = vcmask 1044480   ;;  %vm99_vm2 = vcmask 203776   ;;  %v491_v1 = vmov 65535   ;;  %s764_s1 = inlined_call_operand.vmem [shape: bf16[25,32], index: 1, kind: input, shape index: {}]   ;;  %s765_s0 = inlined_call_operand.vmem [shape: bf16[128,25], index: 0, kind: input, shape index: {}]   ;;  %s766_s2 = inlined_call_operand.vmem [shape: f32[1,32], index: 2, kind: input, shape index: {}]   ;;  %s767_s3 = inlined_call_operand.vmem [shape: f32[1,32], index: 3, kind: input, shape index: {}]   ;;  %s768_s4 = inlined_call_operand.vmem [shape: f32[1,32], index: 4, kind: input, shape index: {}]   ;;  %s769_s5 = inlined_call_operand.vmem [shape: f32[128,32], index: 5, kind: output, shape index: {}]  }
   0x1   :  { %v479_v0 = vld [vmem:[%s764_s1] sm:$0xff]   ;;  %v126_v2 = vsel %vm124_vm0, 4294967295, %v491_v1  ;;  %v480_v3 = vld [vmem:[%s764_s1 + $0x8] sm:$0x1f]   ;;  %v483_v8 = vld [vmem:[%s765_s0 + $0x10] sm:$0xff]   ;;  %vm228_vm3 = vcmask 261120  }
   0x2   :  { %454 = vmatprep.subr.bf16.mxu0 %v479_v0  ;;  %v127_v4 = vsel %vm125_vm1, %v126_v2, 0  ;;  %v481_v5 = vld [vmem:[%s765_s0] sm:$0xff]   ;;  %474 = vmatprep.subr.bf16.mxu1 %v479_v0  ;;  %v482_v7 = vld [vmem:[%s765_s0 + $0x8] sm:$0xff]   ;;  %v487_v11 = vld [vmem:[%s765_s0 + $0x30] sm:$0xff]  }
   0x3   :  { %455 = vmatpush3.bf16.msra.mxu0 %v479_v0  ;;  %v129_v6 = vand.u32 %v480_v3, %v127_v4  ;;  %476 = vmatpush3.bf16.msra.mxu1 %v479_v0  ;;  %v485_v9 = vld [vmem:[%s765_s0 + $0x20] sm:$0xff]   ;;  %v486_v10 = vld [vmem:[%s765_s0 + $0x28] sm:$0xff]   ;;  %v484_v12 = vld [vmem:[%s765_s0 + $0x18] sm:$0xff]  }
   0x4   :  { %458 = vmatprep.mubr.msk.bf16.mxu0 %vm99_vm2, %v481_v5  ;;  %466 = vmatprep.mubr.msk.bf16.mxu1 %vm99_vm2, %v485_v9  ;;  %v488_v13 = vld [vmem:[%s765_s0 + $0x38] sm:$0xff]   ;;  %v425_v14 = vld [vmem:[%s766_s2] ss:$0 sm:$0xff] }
   0x5   :  { %456 = vmatprep.subr.bf16.mxu0 %v129_v6  ;;  %475 = vmatprep.subr.bf16.mxu1 %v129_v6 }
   0x7   :  { %457 = vmatpush3.bf16.msra.mxu0 %v129_v6  ;;  %477 = vmatpush3.bf16.msra.mxu1 %v129_v6 }
   0xa   :  { %459 = vmatmul.mubr.msk.bf16.vlgmr.msra.gmra.mrb[0].mxu0 %vm99_vm2, %v482_v7  ;;  %467 = vmatmul.mubr.msk.bf16.vlgmr.msra.gmra.mrb[0].mxu1 %vm99_vm2, %v486_v10 }
   0xb   :  { %462 = vmatprep.mubr.msk.bf16.mxu0 %vm99_vm2, %v483_v8  ;;  %470 = vmatprep.mubr.msk.bf16.mxu1 %vm99_vm2, %v487_v11 }
  0x12   :  { %463 = vmatmul.mubr.msk.bf16.gmra.mrb[4].mxu0 %vm99_vm2, %v484_v12  ;;  %471 = vmatmul.mubr.msk.bf16.gmra.mrb[4].mxu1 %vm99_vm2, %v488_v13 }
  0xdd   :  { %v460_v15 = vpop.f32.mrb[0].mxu0  ;;  %v468_v16 = vpop.f32.mrb[0].mxu1 }
  0xde   :  { %v165_v17 = vpop.f32.mrb[1].mxu0  ;;  %v197_v18 = vpop.f32.mrb[1].mxu1  ;;  %v565_v24 = vadd.f32 %v460_v15, %v425_v14  ;;  %v601_v57 = vadd.f32 %v468_v16, %v425_v14 }
  0xdf   :  { %v563_v19 = vadd.f32 %v425_v14, %v165_v17  ;;  %v461_v20 = vpop.f32.mrb[2].mxu0  ;;  %v469_v21 = vpop.f32.mrb[2].mxu1  ;;  %v591_v49 = vadd.f32 %v425_v14, %v197_v18 }
  0xe0   :  { %v168_v22 = vpop.f32.mrb[3].mxu0  ;;  %v200_v23 = vpop.f32.mrb[3].mxu1  ;;  %v571_v27 = vadd.f32 %v461_v20, %v425_v14  ;;  %v232_v30 = vsel %vm228_vm3, %v565_v24, 0.0  ;;  %v603_v59 = vadd.f32 %v469_v21, %v425_v14  ;;  %v248_v63 = vsel %vm228_vm3, %v601_v57, 0.0 }
  0xe1   :  { %v567_v25 = vadd.f32 %v425_v14, %v168_v22  ;;  %v229_v26 = vsel %vm228_vm3, %v563_v19, 0.0  ;;  %v244_v54 = vsel %vm228_vm3, %v591_v49, 0.0  ;;  %v599_v55 = vadd.f32 %v425_v14, %v200_v23 }
  0xe2   :  { %v234_v36 = vsel %vm228_vm3, %v571_v27, 0.0  ;;  %v250_v1 = vsel %vm228_vm3, %v603_v59, 0.0 }
  0xe3   :  { %v230_v28 = vsel %vm228_vm3, %v567_v25, 0.0  ;;  %v246_v60 = vsel %vm228_vm3, %v599_v55, 0.0 }
  0xe4   :  { %v231_v29 = vadd.f32 %v230_v28, %v229_v26 }
  0xe5   :  { %v464_v31 = vpop.f32.mrb[4].mxu0  ;;  %v472_v32 = vpop.f32.mrb[4].mxu1 }
  0xe6   :  { %v233_v33 = vadd.f32 %v232_v30, %v231_v29  ;;  %v181_v34 = vpop.f32.mrb[5].mxu0  ;;  %v213_v35 = vpop.f32.mrb[5].mxu1  ;;  %v581_v43 = vadd.f32 %v464_v31, %v425_v14  ;;  %v617_v5 = vadd.f32 %v472_v32, %v425_v14 }
  0xe7   :  { %v579_v37 = vadd.f32 %v425_v14, %v181_v34  ;;  %v465_v38 = vpop.f32.mrb[6].mxu0  ;;  %v473_v39 = vpop.f32.mrb[6].mxu1  ;;  %v607_v61 = vadd.f32 %v425_v14, %v213_v35 }
  0xe8   :  { %v235_v40 = vadd.f32 %v234_v36, %v233_v33  ;;  %v184_v41 = vpop.f32.mrb[7].mxu0  ;;  %v216_v42 = vpop.f32.mrb[7].mxu1  ;;  %v587_v47 = vadd.f32 %v465_v38, %v425_v14  ;;  %v240_v51 = vsel %vm228_vm3, %v581_v43, 0.0  ;;  %v619_v7 = vadd.f32 %v473_v39, %v425_v14 }
  0xe9   :  { %v236_v44 = vsel %vm228_vm3, %v579_v37, 0.0  ;;  %v585_v45 = vadd.f32 %v425_v14, %v184_v41  ;;  %v252_v2 = vsel %vm228_vm3, %v607_v61, 0.0  ;;  %v615_v3 = vadd.f32 %v425_v14, %v216_v42 }
  0xea   :  { %v237_v46 = vadd.f32 %v236_v44, %v235_v40  ;;  %v242_v53 = vsel %vm228_vm3, %v587_v47, 0.0  ;;  %v256_v10 = vsel %vm228_vm3, %v617_v5, 0.0  ;;  %v258_v12 = vsel %vm228_vm3, %v619_v7, 0.0 }
  0xeb   :  { %v238_v48 = vsel %vm228_vm3, %v585_v45, 0.0  ;;  %v254_v8 = vsel %vm228_vm3, %v615_v3, 0.0 }
  0xec   :  { %v239_v50 = vadd.f32 %v238_v48, %v237_v46 }
  0xee   :  { %v241_v52 = vadd.f32 %v240_v51, %v239_v50 }
  0xf0   :  { %v243_v56 = vadd.f32 %v242_v53, %v241_v52 }
  0xf2   :  { %v245_v58 = vadd.f32 %v244_v54, %v243_v56 }
  0xf4   :  { %v247_v62 = vadd.f32 %v246_v60, %v245_v58 }
  0xf6   :  { %v249_v0 = vadd.f32 %v248_v63, %v247_v62 }
  0xf8   :  { %v251_v4 = vadd.f32 %v250_v1, %v249_v0 }
  0xfa   :  { %v253_v6 = vadd.f32 %v252_v2, %v251_v4 }
  0xfc   :  { %v255_v9 = vadd.f32 %v254_v8, %v253_v6 }
  0xfe   :  { %v257_v11 = vadd.f32 %v256_v10, %v255_v9 }
 0x100   :  { %v259_v13 = vadd.f32 %v258_v12, %v257_v11 }
 0x102   :  { %v260_v15 = vrot.slane %v259_v13, 4 }
 0x104   :  { %v261_v16 = vadd.f32 %v260_v15, %v259_v13 }
 0x106   :  { %v262_v17 = vrot.slane %v261_v16, 2 }
 0x108   :  { %v263_v18 = vadd.f32 %v262_v17, %v261_v16 }
 0x10a   :  { %v264_v20 = vrot.slane %v263_v18, 1 }
 0x10c   :  { %v265_v21 = vadd.f32 %v264_v20, %v263_v18 }
 0x10e   :  { %v627_v14 = vmul.f32 0.0078125, %v265_v21 }
 0x110   :  { %v268_v22 = vsub.f32 %v563_v19, %v627_v14  ;;  %v269_v23 = vsub.f32 %v567_v25, %v627_v14  ;;  %v270_v26 = vsub.f32 %v565_v24, %v627_v14  ;;  %v271_v28 = vsub.f32 %v571_v27, %v627_v14 }
 0x111   :  { %v272_v31 = vsub.f32 %v579_v37, %v627_v14  ;;  %v273_v33 = vsub.f32 %v585_v45, %v627_v14  ;;  %v274_v39 = vsub.f32 %v581_v43, %v627_v14  ;;  %v275_v44 = vsub.f32 %v587_v47, %v627_v14 }
 0x112   :  { %v284_v29 = vmul.f32 %v268_v22, %v268_v22  ;;  %v285_v30 = vmul.f32 %v269_v23, %v269_v23  ;;  %v286_v32 = vmul.f32 %v270_v26, %v270_v26  ;;  %v287_v34 = vmul.f32 %v271_v28, %v271_v28 }
 0x113   :  { %v288_v40 = vmul.f32 %v272_v31, %v272_v31  ;;  %v289_v46 = vmul.f32 %v273_v33, %v273_v33  ;;  %v276_v51 = vsub.f32 %v591_v49, %v627_v14  ;;  %v290_v52 = vmul.f32 %v274_v39, %v274_v39 }
 0x114   :  { %v300_v35 = vsel %vm228_vm3, %v284_v29, 0.0  ;;  %v301_v36 = vsel %vm228_vm3, %v285_v30, 0.0  ;;  %v303_v41 = vsel %vm228_vm3, %v286_v32, 0.0  ;;  %v305_v48 = vsel %vm228_vm3, %v287_v34, 0.0 }
 0x115   :  { %v302_v38 = vadd.f32 %v301_v36, %v300_v35  ;;  %v307_v53 = vsel %vm228_vm3, %v288_v40, 0.0  ;;  %v277_v56 = vsub.f32 %v599_v55, %v627_v14  ;;  %v291_v58 = vmul.f32 %v275_v44, %v275_v44 }
 0x116   :  { %v309_v60 = vsel %vm228_vm3, %v289_v46, 0.0  ;;  %v278_v63 = vsub.f32 %v601_v57, %v627_v14  ;;  %v292_v0 = vmul.f32 %v276_v51, %v276_v51  ;;  %v311_v1 = vsel %vm228_vm3, %v290_v52, 0.0 }
 0x117   :  { %v304_v42 = vadd.f32 %v303_v41, %v302_v38  ;;  %v279_v4 = vsub.f32 %v603_v59, %v627_v14  ;;  %v293_v6 = vmul.f32 %v277_v56, %v277_v56  ;;  %v313_v8 = vsel %vm228_vm3, %v291_v58, 0.0  ;;  %v338_v58 = vld [vmem:[%s767_s3] sm:$0x1] }
 0x118   :  { %v280_v10 = vsub.f32 %v607_v61, %v627_v14  ;;  %v294_v11 = vmul.f32 %v278_v63, %v278_v63  ;;  %v315_v12 = vsel %vm228_vm3, %v292_v0, 0.0  ;;  %v281_v15 = vsub.f32 %v615_v3, %v627_v14  ;;  %v342_v0 = vld [vmem:[%s768_s4] sm:$0x1] }
 0x119   :  { %v306_v50 = vadd.f32 %v305_v48, %v304_v42  ;;  %v295_v16 = vmul.f32 %v279_v4, %v279_v4  ;;  %v317_v17 = vsel %vm228_vm3, %v293_v6, 0.0  ;;  %v282_v20 = vsub.f32 %v617_v5, %v627_v14 }
 0x11a   :  { %v296_v21 = vmul.f32 %v280_v10, %v280_v10  ;;  %v319_v22 = vsel %vm228_vm3, %v294_v11, 0.0  ;;  %v283_v26 = vsub.f32 %v619_v7, %v627_v14  ;;  %v297_v28 = vmul.f32 %v281_v15, %v281_v15 }
 0x11b   :  { %v308_v54 = vadd.f32 %v307_v53, %v306_v50  ;;  %v321_v29 = vsel %vm228_vm3, %v295_v16, 0.0  ;;  %v298_v31 = vmul.f32 %v282_v20, %v282_v20 }
 0x11c   :  { %v323_v32 = vsel %vm228_vm3, %v296_v21, 0.0  ;;  %v299_v34 = vmul.f32 %v283_v26, %v283_v26  ;;  %v325_v35 = vsel %vm228_vm3, %v297_v28, 0.0 }
 0x11d   :  { %v310_v62 = vadd.f32 %v309_v60, %v308_v54  ;;  %v327_v38 = vsel %vm228_vm3, %v298_v31, 0.0  ;;  %v346_v54 = vlaneseq }
 0x11e   :  { %v329_v40 = vsel %vm228_vm3, %v299_v34, 0.0 }
 0x11f   :  { %v312_v2 = vadd.f32 %v311_v1, %v310_v62  ;;  %v347_v56 = vshrl.u32 %v346_v54, 7 }
 0x121   :  { %v314_v9 = vadd.f32 %v313_v8, %v312_v2  ;;  %v348_v60 = vsub.s32 0, %v347_v56 }
 0x123   :  { %v316_v13 = vadd.f32 %v315_v12, %v314_v9 }
 0x125   :  { %v318_v18 = vadd.f32 %v317_v17, %v316_v13 }
 0x127   :  { %v320_v23 = vadd.f32 %v319_v22, %v318_v18 }
 0x129   :  { %v322_v30 = vadd.f32 %v321_v29, %v320_v23 }
 0x12b   :  { %v324_v33 = vadd.f32 %v323_v32, %v322_v30 }
 0x12d   :  { %v326_v36 = vadd.f32 %v325_v35, %v324_v33 }
 0x12f   :  { %v328_v39 = vadd.f32 %v327_v38, %v326_v36 }
 0x131   :  { %v330_v41 = vadd.f32 %v329_v40, %v328_v39 }
 0x133   :  { %v331_v42 = vrot.slane %v330_v41, 4 }
 0x135   :  { %v332_v44 = vadd.f32 %v331_v42, %v330_v41 }
 0x137   :  { %v333_v46 = vrot.slane %v332_v44, 2 }
 0x139   :  { %v334_v48 = vadd.f32 %v333_v46, %v332_v44 }
 0x13b   :  { %v335_v50 = vrot.slane %v334_v48, 1 }
 0x13d   :  { %v336_v51 = vadd.f32 %v335_v50, %v334_v48 }
 0x13f   :  { %v337_v52 = vmul.f32 0.0078125, %v336_v51 }
 0x141   :  { %v339_v53 = vadd.f32 1e-05, %v337_v52 }
 0x143   :  { %489 = vrsqrt.f32 %v339_v53 }
 0x14d   :  { %v490_v62 = vpop.eup %489 }
 0x14e   :  { %v341_v63 = vmul.f32 %v490_v62, %v338_v58 }
 0x150   :  { %v343_v1 = vmul.f32 %v341_v63, %v627_v14  ;;  %v349_v2 = vrot.slane %v341_v63, %v348_v60 }
 0x152   :  { %v344_v4 = vsub.f32 %v342_v0, %v343_v1  ;;  %v351_v6 = vmul.f32 %v349_v2, %v563_v19  ;;  %v352_v8 = vmul.f32 %v349_v2, %v567_v25  ;;  %v353_v9 = vmul.f32 %v349_v2, %v565_v24 }
 0x153   :  { %v354_v10 = vmul.f32 %v349_v2, %v571_v27  ;;  %v355_v11 = vmul.f32 %v349_v2, %v579_v37  ;;  %v356_v12 = vmul.f32 %v349_v2, %v585_v45  ;;  %v357_v13 = vmul.f32 %v349_v2, %v581_v43 }
 0x154   :  { %v358_v15 = vmul.f32 %v349_v2, %v587_v47  ;;  %v359_v14 = vmul.f32 %v349_v2, %v591_v49  ;;  %v360_v16 = vmul.f32 %v349_v2, %v599_v55  ;;  %v361_v19 = vmul.f32 %v349_v2, %v601_v57 }
 0x155   :  { %v362_v25 = vmul.f32 %v349_v2, %v603_v59  ;;  %v371_v17 = vrot.slane %v344_v4, %v348_v60  ;;  %v363_v24 = vmul.f32 %v349_v2, %v607_v61  ;;  %v364_v27 = vmul.f32 %v349_v2, %v615_v3 }
 0x156   :  { %v365_v37 = vmul.f32 %v349_v2, %v617_v5  ;;  %v366_v45 = vmul.f32 %v349_v2, %v619_v7 }
 0x157   :  { %v373_v43 = vadd.f32 %v371_v17, %v351_v6  ;;  %v374_v18 = vadd.f32 %v371_v17, %v352_v8  ;;  %v375_v47 = vadd.f32 %v371_v17, %v353_v9  ;;  %v376_v20 = vadd.f32 %v371_v17, %v354_v10 }
 0x158   :  { %v377_v49 = vadd.f32 %v371_v17, %v355_v11  ;;  %v378_v21 = vadd.f32 %v371_v17, %v356_v12  ;;  %v379_v55 = vadd.f32 %v371_v17, %v357_v13  ;;  %v380_v22 = vadd.f32 %v371_v17, %v358_v15 }
 0x159   :  { %v381_v57 = vadd.f32 %v371_v17, %v359_v14  ;;  %v382_v23 = vadd.f32 %v371_v17, %v360_v16  ;;  %v383_v59 = vadd.f32 %v371_v17, %v361_v19  ;;  %v384_v26 = vadd.f32 %v371_v17, %v362_v25 }
 0x15a   :  { %v385_v28 = vadd.f32 %v371_v17, %v363_v24  ;;  %v386_v61 = vadd.f32 %v371_v17, %v364_v27  ;;  %v387_v29 = vadd.f32 %v371_v17, %v365_v37  ;;  %v388_v3 = vadd.f32 %v371_v17, %v366_v45 }
 0x15b   :  { %v389_v30 = vmax.f32 %v373_v43, 0.0  ;;  %v390_v5 = vmax.f32 %v374_v18, 0.0  ;;  %v391_v31 = vmax.f32 %v375_v47, 0.0  ;;  %v392_v7 = vmax.f32 %v376_v20, 0.0 }
 0x15c   :  { %v393_v32 = vmax.f32 %v377_v49, 0.0  ;;  %v394_v33 = vmax.f32 %v378_v21, 0.0  ;;  %v395_v34 = vmax.f32 %v379_v55, 0.0  ;;  %v396_v35 = vmax.f32 %v380_v22, 0.0 }
 0x15d   :  { %v397_v36 = vmax.f32 %v381_v57, 0.0  ;;  %v398_v38 = vmax.f32 %v382_v23, 0.0  ;;  %v399_v39 = vmax.f32 %v383_v59, 0.0  ;;  %v400_v40 = vmax.f32 %v384_v26, 0.0  ;;  %405 = vst.msk [vmem:[%s769_s5] sm:$0xff] %vm228_vm3, %v389_v30  ;;  %406 = vst.msk [vmem:[%s769_s5 + $0x8] sm:$0xff] %vm228_vm3, %v390_v5 }
 0x15e   :  { %407 = vst.msk [vmem:[%s769_s5 + $0x10] sm:$0xff] %vm228_vm3, %v391_v31  ;;  %408 = vst.msk [vmem:[%s769_s5 + $0x18] sm:$0xff] %vm228_vm3, %v392_v7  ;;  %v401_v41 = vmax.f32 %v385_v28, 0.0  ;;  %v402_v42 = vmax.f32 %v386_v61, 0.0  ;;  %v403_v44 = vmax.f32 %v387_v29, 0.0  ;;  %v404_v46 = vmax.f32 %v388_v3, 0.0 }
 0x15f   :  { %409 = vst.msk [vmem:[%s769_s5 + $0x20] sm:$0xff] %vm228_vm3, %v393_v32  ;;  %410 = vst.msk [vmem:[%s769_s5 + $0x28] sm:$0xff] %vm228_vm3, %v394_v33 }
 0x160   :  { %411 = vst.msk [vmem:[%s769_s5 + $0x30] sm:$0xff] %vm228_vm3, %v395_v34  ;;  %412 = vst.msk [vmem:[%s769_s5 + $0x38] sm:$0xff] %vm228_vm3, %v396_v35 }
 0x161   :  { %413 = vst.msk [vmem:[%s769_s5 + $0x40] sm:$0xff] %vm228_vm3, %v397_v36  ;;  %414 = vst.msk [vmem:[%s769_s5 + $0x48] sm:$0xff] %vm228_vm3, %v398_v38 }
 0x162   :  { %415 = vst.msk [vmem:[%s769_s5 + $0x50] sm:$0xff] %vm228_vm3, %v399_v39  ;;  %416 = vst.msk [vmem:[%s769_s5 + $0x58] sm:$0xff] %vm228_vm3, %v400_v40 }
 0x163   :  { %417 = vst.msk [vmem:[%s769_s5 + $0x60] sm:$0xff] %vm228_vm3, %v401_v41  ;;  %418 = vst.msk [vmem:[%s769_s5 + $0x68] sm:$0xff] %vm228_vm3, %v402_v42 }
 0x164   :  { %419 = vst.msk [vmem:[%s769_s5 + $0x70] sm:$0xff] %vm228_vm3, %v403_v44  ;;  %420 = vst.msk [vmem:[%s769_s5 + $0x78] sm:$0xff] %vm228_vm3, %v404_v46 }

// kernel: dqn_cnn_forward.4
= control target key start
LH: loop header
LB: loop body
LE: loop exit
PB: predicated region body
PF: predicated region fallthrough
CT: control target
= control target key end

     0   :  { %vm514_vm0 = vcmask 261120   ;;  %vm717_vm1 = vcmask 523264   ;;  %s1294_s1 = inlined_call_operand.vmem [shape: bf16[800,64], index: 1, kind: input, shape index: {}]   ;;  %s1295_s0 = inlined_call_operand.vmem [shape: bf16[32,800], index: 0, kind: input, shape index: {}]   ;;  %s1296_s2 = inlined_call_operand.vmem [shape: f32[1,64], index: 2, kind: input, shape index: {}]   ;;  %s1297_s3 = inlined_call_operand.vmem [shape: f32[1,64], index: 3, kind: input, shape index: {}]   ;;  %s1298_s4 = inlined_call_operand.vmem [shape: f32[1,64], index: 4, kind: input, shape index: {}]   ;;  %s1299_s5 = inlined_call_operand.vmem [shape: f32[32,64], index: 5, kind: output, shape index: {}]  }
   0x1   :  { %v957_v0 = vld [vmem:[%s1294_s1 + $0x40] sm:$0xff]   ;;  %v961_v4 = vld [vmem:[%s1294_s1 + $0x48] sm:$0xff]   ;;  %v965_v8 = vld [vmem:[%s1294_s1 + $0x50] sm:$0xff]  }
   0x2   :  { %v958_v1 = vld [vmem:[%s1294_s1] sm:$0xff]   ;;  %861 = vmatprep.subr.bf16.mxu0 %v957_v0  ;;  %v962_v5 = vld [vmem:[%s1294_s1 + $0x8] sm:$0xff]   ;;  %v966_v9 = vld [vmem:[%s1294_s1 + $0x10] sm:$0xff]  }
   0x3   :  { %v959_v2 = vld [vmem:[%s1294_s1 + $0xc0] sm:$0xff]   ;;  %862 = vmatpush3.bf16.msra.mxu0 %v958_v1  ;;  %v963_v6 = vld [vmem:[%s1294_s1 + $0xc8] sm:$0xff]   ;;  %v967_v10 = vld [vmem:[%s1294_s1 + $0xd0] sm:$0xff]  }
   0x4   :  { %v960_v3 = vld [vmem:[%s1294_s1 + $0x80] sm:$0xff]   ;;  %889 = vmatprep.subr.bf16.mxu1 %v959_v2  ;;  %863 = vmatprep.subr.bf16.mxu0 %v961_v4  ;;  %v964_v7 = vld [vmem:[%s1294_s1 + $0x88] sm:$0xff]   ;;  %v968_v11 = vld [vmem:[%s1294_s1 + $0x90] sm:$0xff]  }
   0x5   :  { %890 = vmatpush3.bf16.msra.mxu1 %v960_v3  ;;  %v969_v12 = vld [vmem:[%s1294_s1 + $0x58] sm:$0xff]   ;;  %v973_v16 = vld [vmem:[%s1294_s1 + $0x60] sm:$0xff]   ;;  %v977_v20 = vld [vmem:[%s1294_s1 + $0x68] sm:$0xff]  }
   0x6   :  { %891 = vmatprep.subr.bf16.mxu1 %v963_v6  ;;  %v970_v13 = vld [vmem:[%s1294_s1 + $0x18] sm:$0xff]   ;;  %v974_v17 = vld [vmem:[%s1294_s1 + $0x20] sm:$0xff]   ;;  %v978_v21 = vld [vmem:[%s1294_s1 + $0x28] sm:$0xff]  }
   0x7   :  { %864 = vmatpush3.bf16.msra.mxu0 %v962_v5  ;;  %v971_v14 = vld [vmem:[%s1294_s1 + $0xd8] sm:$0xff]   ;;  %v975_v18 = vld [vmem:[%s1294_s1 + $0xe0] sm:$0xff]   ;;  %v979_v22 = vld [vmem:[%s1294_s1 + $0xe8] sm:$0xff]  }
   0x8   :  { %865 = vmatprep.subr.bf16.mxu0 %v965_v8  ;;  %v972_v15 = vld [vmem:[%s1294_s1 + $0x98] sm:$0xff]   ;;  %v976_v19 = vld [vmem:[%s1294_s1 + $0xa0] sm:$0xff]   ;;  %v980_v23 = vld [vmem:[%s1294_s1 + $0xa8] sm:$0xff]  }
   0x9   :  { %892 = vmatpush3.bf16.msra.mxu1 %v964_v7  ;;  %v981_v24 = vld [vmem:[%s1294_s1 + $0x70] sm:$0xff]   ;;  %v985_v28 = vld [vmem:[%s1294_s1 + $0x78] sm:$0xff]   ;;  %v990_v32 = vld [vmem:[%s1295_s0 + $0x4] ss:$28 sps:$4 sm:$0xff]  }
   0xa   :  { %893 = vmatprep.subr.bf16.mxu1 %v967_v10  ;;  %v982_v25 = vld [vmem:[%s1294_s1 + $0x30] sm:$0xff]   ;;  %v986_v29 = vld [vmem:[%s1294_s1 + $0x38] sm:$0xff]   ;;  %553 = vmatprep.mubr.bf16.mxu0 %v990_v32  ;;  %v992_v34 = vld [vmem:[%s1294_s1 + $0x140] sm:$0xff]  }
   0xb   :  { %866 = vmatpush3.bf16.msra.mxu0 %v966_v9  ;;  %v983_v26 = vld [vmem:[%s1294_s1 + $0xf0] sm:$0xff]   ;;  %v987_v30 = vld [vmem:[%s1294_s1 + $0xf8] sm:$0xff]   ;;  %v993_v35 = vld [vmem:[%s1295_s0 + $0x8] ss:$28 sps:$4 sm:$0xff]  }
   0xc   :  { %867 = vmatprep.subr.bf16.mxu0 %v969_v12  ;;  %v984_v27 = vld [vmem:[%s1294_s1 + $0xb0] sm:$0xff]   ;;  %v988_v31 = vld [vmem:[%s1295_s0] ss:$28 sps:$4 sm:$0xff]   ;;  %v995_v36 = vld [vmem:[%s1295_s0 + $0xc] ss:$28 sps:$4 sm:$0xff]  }
   0xd   :  { %894 = vmatpush3.bf16.msra.mxu1 %v968_v11  ;;  %v991_v33 = vld [vmem:[%s1294_s1 + $0xb8] sm:$0xff]   ;;  %v996_v37 = vld [vmem:[%s1294_s1 + $0x100] sm:$0xff]   ;;  %602 = vmatprep.mubr.bf16.mxu1 %v995_v36  ;;  %v997_v38 = vld [vmem:[%s1294_s1 + $0x148] sm:$0xff]  }
   0xe   :  { %895 = vmatprep.subr.bf16.mxu1 %v971_v14  ;;  %v998_v39 = vld [vmem:[%s1294_s1 + $0x108] sm:$0xff]   ;;  %v999_v40 = vld [vmem:[%s1294_s1 + $0x150] sm:$0xff]   ;;  %v1001_v42 = vld [vmem:[%s1294_s1 + $0x158] sm:$0xff]  }
   0xf   :  { %868 = vmatpush3.bf16.msra.mxu0 %v970_v13  ;;  %v1000_v41 = vld [vmem:[%s1294_s1 + $0x110] sm:$0xff]   ;;  %v1005_v43 = vld [vmem:[%s1295_s0 + $0x3c] ss:$28 sps:$4 sm:$0xff]   ;;  %v1003_v46 = vld [vmem:[%s1294_s1 + $0x160] sm:$0xff]  }
  0x10   :  { %869 = vmatprep.subr.bf16.mxu0 %v973_v16  ;;  %v1002_v44 = vld [vmem:[%s1294_s1 + $0x118] sm:$0xff]   ;;  %v1004_v47 = vld [vmem:[%s1294_s1 + $0x120] sm:$0xff]   ;;  %v1007_v51 = vld [vmem:[%s1294_s1 + $0x168] sm:$0xff]  }
  0x11   :  { %896 = vmatpush3.bf16.msra.mxu1 %v972_v15  ;;  %v1008_v45 = vld [vmem:[%s1295_s0 + $0x38] ss:$28 sps:$4 sm:$0xff]   ;;  %v1010_v48 = vld [vmem:[%s1295_s0 + $0x44] ss:$28 sps:$4 sm:$0xff]   ;;  %v1009_v52 = vld [vmem:[%s1294_s1 + $0x128] sm:$0xff]  }
  0x12   :  { %897 = vmatprep.subr.bf16.mxu1 %v975_v18  ;;  %v1012_v49 = vld [vmem:[%s1295_s0 + $0x40] ss:$28 sps:$4 sm:$0xff]   ;;  %v1014_v53 = vld [vmem:[%s1294_s1 + $0x170] sm:$0xff]   ;;  %v1021_v56 = vld [vmem:[%s1294_s1 + $0x188] sm:$0xff]  }
  0x13   :  { %870 = vmatpush3.bf16.msra.mxu0 %v974_v17  ;;  %v1013_v50 = vld [vmem:[%s1294_s1 + $0x180] sm:$0xff]   ;;  %v1020_v54 = vld [vmem:[%s1295_s0 + $0x14] ss:$28 sps:$4 sm:$0xff]   ;;  %v1016_v59 = vld [vmem:[%s1294_s1 + $0x178] sm:$0xff]  }
  0x14   :  { %871 = vmatprep.subr.bf16.mxu0 %v977_v20  ;;  %v1015_v55 = vld [vmem:[%s1294_s1 + $0x130] sm:$0xff]   ;;  %v1017_v60 = vld [vmem:[%s1294_s1 + $0x138] sm:$0xff]   ;;  %v1024_v62 = vld [vmem:[%s1295_s0 + $0x4c] ss:$28 sps:$4 sm:$0xff]  }
  0x15   :  { %898 = vmatpush3.bf16.msra.mxu1 %v976_v19  ;;  %v1022_v57 = vld [vmem:[%s1295_s0 + $0x18] ss:$28 sps:$4 sm:$0xff]   ;;  %v1023_v58 = vld [vmem:[%s1295_s0 + $0x50] ss:$28 sps:$4 sm:$0xff]   ;;  %v1026_v63 = vld [vmem:[%s1295_s0 + $0x48] ss:$28 sps:$4 sm:$0xff]  }
  0x16   :  { %899 = vmatprep.subr.bf16.mxu1 %v979_v22  ;;  %v1018_v61 = vld [vmem:[%s1295_s0 + $0x10] ss:$28 sps:$4 sm:$0xff]   ;;  %v794_v1 = vld [vmem:[%s1296_s2] ss:$0 sm:$0xff] }
  0x17   :  { %872 = vmatpush3.bf16.msra.mxu0 %v978_v21 }
  0x18   :  { %873 = vmatprep.subr.bf16.mxu0 %v981_v24 }
  0x19   :  { %900 = vmatpush3.bf16.msra.mxu1 %v980_v23 }
  0x1a   :  { %901 = vmatprep.subr.bf16.mxu1 %v983_v26 }
  0x1b   :  { %874 = vmatpush3.bf16.msra.mxu0 %v982_v25 }
  0x1c   :  { %875 = vmatprep.subr.bf16.mxu0 %v985_v28 }
  0x1d   :  { %902 = vmatpush3.bf16.msra.mxu1 %v984_v27 }
  0x1e   :  { %903 = vmatprep.subr.bf16.mxu1 %v987_v30 }
  0x1f   :  { %876 = vmatpush3.bf16.msra.mxu0 %v986_v29 }
  0x20   :  { %917 = vmatprep.subr.bf16.mxu0 %v992_v34 }
  0x21   :  { %904 = vmatpush3.bf16.msra.mxu1 %v991_v33 }
  0x22   :  { %554 = vmatmul.mubr.bf16.vlgmr.msra.gmra.mrb[0].mxu0 %v988_v31  ;;  %949 = vmatprep.subr.bf16.mxu1 %v1013_v50 }
  0x23   :  { %918 = vmatpush3.bf16.msra.mxu0 %v996_v37  ;;  %561 = vmatprep.mubr.bf16.mxu0 %v1005_v43 }
  0x24   :  { %603 = vmatmul.mubr.bf16.vlgmr.msra.gmra.mrb[0].mxu1 %v993_v35  ;;  %919 = vmatprep.subr.bf16.mxu0 %v997_v38 }
  0x25   :  { %610 = vmatprep.mubr.bf16.mxu1 %v1010_v48  ;;  %950 = vmatpush3.bf16.msra.mxu1 %v1013_v50 }
  0x26   :  { %951 = vmatprep.subr.bf16.mxu1 %v1021_v56 }
  0x27   :  { %920 = vmatpush3.bf16.msra.mxu0 %v998_v39 }
  0x28   :  { %921 = vmatprep.subr.bf16.mxu0 %v999_v40 }
  0x29   :  { %952 = vmatpush3.bf16.msra.mxu1 %v1021_v56 }
  0x2a   :  { %562 = vmatmul.mubr.bf16.gmra.mrb[4].mxu0 %v1008_v45 }
  0x2b   :  { %922 = vmatpush3.bf16.msra.mxu0 %v1000_v41  ;;  %651 = vmatprep.mubr.bf16.mxu0 %v1020_v54 }
  0x2c   :  { %923 = vmatprep.subr.bf16.mxu0 %v1001_v42  ;;  %611 = vmatmul.mubr.bf16.gmra.mrb[4].mxu1 %v1012_v49 }
  0x2d   :  { %953 = vmatprep.mubr.msk.bf16.mxu1 %vm514_vm0, %v1022_v57 }
  0x2f   :  { %924 = vmatpush3.bf16.msra.mxu0 %v1002_v44 }
  0x30   :  { %925 = vmatprep.subr.bf16.mxu0 %v1003_v46 }
  0x33   :  { %926 = vmatpush3.bf16.msra.mxu0 %v1004_v47 }
  0x34   :  { %927 = vmatprep.subr.bf16.mxu0 %v1007_v51  ;;  %954 = vmatmul.mubr.msk.bf16.vlgmr.msra.gmra.mrb[8].mxu1 %vm514_vm0, %v1023_v58 }
  0x37   :  { %928 = vmatpush3.bf16.msra.mxu0 %v1009_v52 }
  0x38   :  { %929 = vmatprep.subr.bf16.mxu0 %v1014_v53 }
  0x3b   :  { %930 = vmatpush3.bf16.msra.mxu0 %v1015_v55 }
  0x3c   :  { %931 = vmatprep.subr.bf16.mxu0 %v1016_v59 }
  0x3f   :  { %932 = vmatpush3.bf16.msra.mxu0 %v1017_v60 }
  0x42   :  { %652 = vmatmul.mubr.bf16.vlgmr.msra.gmra.mrb[8].mxu0 %v1018_v61 }
  0x43   :  { %659 = vmatprep.mubr.bf16.mxu0 %v1024_v62 }
  0x4a   :  { %660 = vmatmul.mubr.bf16.gmra.mrb[12].mxu0 %v1026_v63 }
  0xf5   :  { %v877_v0 = vpop.f32.mrb[0].mxu0 }
  0xf6   :  { %v878_v2 = vpop.f32.mrb[1].mxu0 }
  0xf7   :  { %v879_v3 = vadd.f32 %v878_v2, %v877_v0  ;;  %v880_v4 = vpop.f32.mrb[2].mxu0  ;;  %v905_v5 = vpop.f32.mrb[0].mxu1 }
  0xf8   :  { %v881_v6 = vpop.f32.mrb[3].mxu0  ;;  %v906_v9 = vpop.f32.mrb[1].mxu1 }
  0xf9   :  { %v556_v7 = vadd.f32 %v879_v3, %v794_v1  ;;  %v882_v8 = vadd.f32 %v881_v6, %v880_v4  ;;  %v907_v10 = vadd.f32 %v906_v9, %v905_v5  ;;  %v908_v11 = vpop.f32.mrb[2].mxu1 }
  0xfa   :  { %v909_v13 = vpop.f32.mrb[3].mxu1 }
  0xfb   :  { %v559_v12 = vadd.f32 %v882_v8, %v794_v1  ;;  %v605_v14 = vadd.f32 %v907_v10, %v556_v7  ;;  %v910_v15 = vadd.f32 %v909_v13, %v908_v11 }
  0xfd   :  { %v608_v16 = vadd.f32 %v910_v15, %v559_v12  ;;  %v883_v17 = vpop.f32.mrb[4].mxu0 }
  0xfe   :  { %v884_v18 = vpop.f32.mrb[5].mxu0 }
  0xff   :  { %v885_v19 = vadd.f32 %v884_v18, %v883_v17  ;;  %v886_v20 = vpop.f32.mrb[6].mxu0  ;;  %v911_v21 = vpop.f32.mrb[4].mxu1 }
 0x100   :  { %v887_v22 = vpop.f32.mrb[7].mxu0  ;;  %v912_v25 = vpop.f32.mrb[5].mxu1 }
 0x101   :  { %v564_v23 = vadd.f32 %v885_v19, %v794_v1  ;;  %v888_v24 = vadd.f32 %v887_v22, %v886_v20  ;;  %v913_v26 = vadd.f32 %v912_v25, %v911_v21  ;;  %v914_v27 = vpop.f32.mrb[6].mxu1 }
 0x102   :  { %v915_v29 = vpop.f32.mrb[7].mxu1 }
 0x103   :  { %v567_v28 = vadd.f32 %v888_v24, %v794_v1  ;;  %v613_v30 = vadd.f32 %v913_v26, %v564_v23  ;;  %v916_v31 = vadd.f32 %v915_v29, %v914_v27 }
 0x105   :  { %v616_v32 = vadd.f32 %v916_v31, %v567_v28 }
 0x107   :  { %v955_v33 = vpop.f32.mrb[8].mxu1 }
 0x108   :  { %v702_v34 = vpop.f32.mrb[9].mxu1 }
 0x109   :  { %v956_v35 = vpop.f32.mrb[10].mxu1 }
 0x10a   :  { %v705_v36 = vpop.f32.mrb[11].mxu1 }
 0x115   :  { %v933_v37 = vpop.f32.mrb[8].mxu0 }
 0x116   :  { %v934_v38 = vpop.f32.mrb[9].mxu0 }
 0x117   :  { %v935_v39 = vadd.f32 %v934_v38, %v933_v37  ;;  %v936_v40 = vpop.f32.mrb[10].mxu0 }
 0x118   :  { %v937_v41 = vpop.f32.mrb[11].mxu0 }
 0x119   :  { %v938_v42 = vadd.f32 %v937_v41, %v936_v40  ;;  %v654_v43 = vadd.f32 %v935_v39, %v605_v14 }
 0x11b   :  { %v1254_v44 = vadd.f32 %v702_v34, %v654_v43  ;;  %v657_v45 = vadd.f32 %v938_v42, %v608_v16 }
 0x11d   :  { %v1256_v46 = vadd.f32 %v705_v36, %v657_v45  ;;  %v939_v47 = vpop.f32.mrb[12].mxu0  ;;  %v718_v55 = vsel %vm717_vm1, %v1254_v44, 0.0  ;;  %v759_v36 = vld [vmem:[%s1298_s4] sm:$0x1] }
 0x11e   :  { %v940_v48 = vpop.f32.mrb[13].mxu0 }
 0x11f   :  { %v941_v49 = vadd.f32 %v940_v48, %v939_v47  ;;  %v942_v50 = vpop.f32.mrb[14].mxu0  ;;  %v719_v52 = vsel %vm717_vm1, %v1256_v46, 0.0 }
 0x120   :  { %v943_v51 = vpop.f32.mrb[15].mxu0  ;;  %v720_v58 = vadd.f32 %v719_v52, %v718_v55 }
 0x121   :  { %v662_v53 = vadd.f32 %v941_v49, %v613_v30  ;;  %v944_v54 = vadd.f32 %v943_v51, %v942_v50  ;;  %v763_v30 = vlaneseq }
 0x123   :  { %v711_v56 = vadd.f32 %v955_v33, %v662_v53  ;;  %v665_v57 = vadd.f32 %v944_v54, %v616_v32  ;;  %v764_v31 = vshrl.u32 %v763_v30, 7  ;;  %v755_v32 = vld [vmem:[%s1297_s3] sm:$0x1] }
 0x125   :  { %v721_v59 = vsel %vm717_vm1, %v711_v56, 0.0  ;;  %v714_v60 = vadd.f32 %v956_v35, %v665_v57  ;;  %v765_v33 = vsub.s32 0, %v764_v31 }
 0x126   :  { %v722_v61 = vadd.f32 %v721_v59, %v720_v58 }
 0x127   :  { %v723_v62 = vsel %vm717_vm1, %v714_v60, 0.0 }
 0x128   :  { %v724_v63 = vadd.f32 %v723_v62, %v722_v61 }
 0x12a   :  { %v725_v0 = vrot.slane %v724_v63, 4 }
 0x12c   :  { %v726_v1 = vadd.f32 %v725_v0, %v724_v63 }
 0x12e   :  { %v727_v2 = vrot.slane %v726_v1, 2 }
 0x130   :  { %v728_v3 = vadd.f32 %v727_v2, %v726_v1 }
 0x132   :  { %v729_v4 = vrot.slane %v728_v3, 1 }
 0x134   :  { %v730_v5 = vadd.f32 %v729_v4, %v728_v3 }
 0x136   :  { %v732_v6 = vmul.f32 0.03125, %v730_v5 }
 0x138   :  { %v733_v7 = vsub.f32 %v1254_v44, %v732_v6  ;;  %v734_v8 = vsub.f32 %v1256_v46, %v732_v6  ;;  %v735_v9 = vsub.f32 %v711_v56, %v732_v6  ;;  %v736_v10 = vsub.f32 %v714_v60, %v732_v6 }
 0x13a   :  { %v737_v11 = vmul.f32 %v733_v7, %v733_v7  ;;  %v738_v12 = vmul.f32 %v734_v8, %v734_v8  ;;  %v739_v13 = vmul.f32 %v735_v9, %v735_v9  ;;  %v740_v14 = vmul.f32 %v736_v10, %v736_v10 }
 0x13c   :  { %v741_v15 = vsel %vm717_vm1, %v737_v11, 0.0  ;;  %v742_v16 = vsel %vm717_vm1, %v738_v12, 0.0  ;;  %v744_v18 = vsel %vm717_vm1, %v739_v13, 0.0  ;;  %v746_v20 = vsel %vm717_vm1, %v740_v14, 0.0 }
 0x13d   :  { %v743_v17 = vadd.f32 %v742_v16, %v741_v15 }
 0x13f   :  { %v745_v19 = vadd.f32 %v744_v18, %v743_v17 }
 0x141   :  { %v747_v21 = vadd.f32 %v746_v20, %v745_v19 }
 0x143   :  { %v748_v22 = vrot.slane %v747_v21, 4 }
 0x145   :  { %v749_v23 = vadd.f32 %v748_v22, %v747_v21 }
 0x147   :  { %v750_v24 = vrot.slane %v749_v23, 2 }
 0x149   :  { %v751_v25 = vadd.f32 %v750_v24, %v749_v23 }
 0x14b   :  { %v752_v26 = vrot.slane %v751_v25, 1 }
 0x14d   :  { %v753_v27 = vadd.f32 %v752_v26, %v751_v25 }
 0x14f   :  { %v754_v28 = vmul.f32 0.03125, %v753_v27 }
 0x151   :  { %v756_v29 = vadd.f32 1e-05, %v754_v28 }
 0x153   :  { %1027 = vrsqrt.f32 %v756_v29 }
 0x15d   :  { %v1028_v34 = vpop.eup %1027 }
 0x15e   :  { %v758_v35 = vmul.f32 %v1028_v34, %v755_v32 }
 0x160   :  { %v760_v37 = vmul.f32 %v758_v35, %v732_v6  ;;  %v766_v38 = vrot.slane %v758_v35, %v765_v33 }
 0x162   :  { %v761_v39 = vsub.f32 %v759_v36, %v760_v37  ;;  %v770_v40 = vmul.f32 %v766_v38, %v711_v56  ;;  %v771_v41 = vmul.f32 %v766_v38, %v714_v60  ;;  %v768_v42 = vmul.f32 %v766_v38, %v1254_v44 }
 0x163   :  { %v769_v43 = vmul.f32 %v766_v38, %v1256_v46 }
 0x164   :  { %v776_v45 = vrot.slane %v761_v39, %v765_v33 }
 0x166   :  { %v778_v47 = vadd.f32 %v776_v45, %v768_v42  ;;  %v779_v48 = vadd.f32 %v776_v45, %v769_v43  ;;  %v780_v49 = vadd.f32 %v776_v45, %v770_v40  ;;  %v781_v50 = vadd.f32 %v776_v45, %v771_v41 }
 0x168   :  { %v782_v51 = vmax.f32 %v778_v47, 0.0  ;;  %v783_v52 = vmax.f32 %v779_v48, 0.0  ;;  %v784_v53 = vmax.f32 %v780_v49, 0.0  ;;  %v785_v54 = vmax.f32 %v781_v50, 0.0 }
 0x16a   :  { %786 = vst.msk [vmem:[%s1299_s5] sm:$0xff] %vm717_vm1, %v782_v51  ;;  %787 = vst.msk [vmem:[%s1299_s5 + $0x8] sm:$0xff] %vm717_vm1, %v783_v52 }
 0x16b   :  { %788 = vst.msk [vmem:[%s1299_s5 + $0x10] sm:$0xff] %vm717_vm1, %v784_v53  ;;  %789 = vst.msk [vmem:[%s1299_s5 + $0x18] sm:$0xff] %vm717_vm1, %v785_v54 }

// kernel: dqn_cnn_forward.5
= control target key start
LH: loop header
LB: loop body
LE: loop exit
PB: predicated region body
PF: predicated region fallthrough
CT: control target
= control target key end

     0   :  { %s6011_s0 = inlined_call_operand.vmem [shape: bf16[32,1600], index: 0, kind: input, shape index: {}]   ;;  %s6012_s1 = inlined_call_operand.vmem [shape: bf16[1600,128], index: 1, kind: input, shape index: {}]   ;;  %s6013_s2 = inlined_call_operand.vmem [shape: f32[1,128], index: 2, kind: input, shape index: {}]   ;;  %s6014_s3 = inlined_call_operand.vmem [shape: f32[1,128], index: 3, kind: input, shape index: {}]   ;;  %s6015_s4 = inlined_call_operand.vmem [shape: f32[1,128], index: 4, kind: input, shape index: {}]   ;;  %s6016_s5 = inlined_call_operand.vmem [shape: f32[2048,4], index: 5, kind: input, shape index: {}]   ;;  %s6017_s6 = inlined_call_operand.vmem [shape: f32[1,4], index: 6, kind: input, shape index: {}]   ;;  %s6018_s7 = inlined_call_operand.hbm [shape: f32[2,4], index: 7, kind: output, shape index: {}]  }
   0x1   :  { %v4424_v0 = vld [vmem:[%s6012_s1 + $0x40] sm:$0xff]   ;;  %v4426_v2 = vld [vmem:[%s6012_s1 + $0x48] sm:$0xff]   ;;  %v4428_v4 = vld [vmem:[%s6012_s1 + $0x50] sm:$0xff]  }
   0x2   :  { %v4425_v1 = vld [vmem:[%s6012_s1] sm:$0xff]   ;;  %2988 = vmatprep.subr.bf16.mxu0 %v4424_v0  ;;  %v4427_v3 = vld [vmem:[%s6012_s1 + $0x8] sm:$0xff]   ;;  %v4429_v5 = vld [vmem:[%s6012_s1 + $0x10] sm:$0xff]  }
   0x3   :  { %2989 = vmatpush3.bf16.msra.mxu0 %v4425_v1  ;;  %v4430_v6 = vld [vmem:[%s6012_s1 + $0x58] sm:$0xff]   ;;  %v4432_v8 = vld [vmem:[%s6012_s1 + $0x60] sm:$0xff]   ;;  %v4434_v10 = vld [vmem:[%s6012_s1 + $0x68] sm:$0xff]  }
   0x4   :  { %2990 = vmatprep.subr.bf16.mxu0 %v4426_v2  ;;  %v4431_v7 = vld [vmem:[%s6012_s1 + $0x18] sm:$0xff]   ;;  %v4433_v9 = vld [vmem:[%s6012_s1 + $0x20] sm:$0xff]   ;;  %v4435_v12 = vld [vmem:[%s6012_s1 + $0x28] sm:$0xff]  }
   0x5   :  { %v4442_v11 = vld [vmem:[%s6011_s0 + $0x4] ss:$52 sps:$4 sm:$0xff]   ;;  %v4436_v13 = vld [vmem:[%s6012_s1 + $0x70] sm:$0xff]   ;;  %v4454_v20 = vld [vmem:[%s6011_s0 + $0x6c] ss:$52 sps:$4 sm:$0xff]  }
   0x6   :  { %1032 = vmatprep.mubr.bf16.mxu0 %v4442_v11  ;;  %v4437_v14 = vld [vmem:[%s6012_s1 + $0x30] sm:$0xff]   ;;  %v4438_v15 = vld [vmem:[%s6012_s1 + $0x78] sm:$0xff]   ;;  %v4443_v17 = vld [vmem:[%s6012_s1 + $0xc0] sm:$0xff]  }
   0x7   :  { %2991 = vmatpush3.bf16.msra.mxu0 %v4427_v3  ;;  %v4439_v16 = vld [vmem:[%s6012_s1 + $0x38] sm:$0xff]   ;;  %v4440_v18 = vld [vmem:[%s6011_s0] ss:$52 sps:$4 sm:$0xff]   ;;  %v4445_v21 = vld [vmem:[%s6012_s1 + $0xc8] sm:$0xff]  }
   0x8   :  { %2992 = vmatprep.subr.bf16.mxu0 %v4428_v4  ;;  %v4444_v19 = vld [vmem:[%s6012_s1 + $0x80] sm:$0xff]   ;;  %v4446_v22 = vld [vmem:[%s6012_s1 + $0x88] sm:$0xff]   ;;  %v4447_v23 = vld [vmem:[%s6012_s1 + $0xd0] sm:$0xff]  }
   0x9   :  { %v4448_v24 = vld [vmem:[%s6012_s1 + $0x90] sm:$0xff]   ;;  %v4457_v25 = vld [vmem:[%s6011_s0 + $0x68] ss:$52 sps:$4 sm:$0xff]   ;;  %v4464_v26 = vld [vmem:[%s6011_s0 + $0xc] ss:$52 sps:$4 sm:$0xff]  }
   0xa   :  { %v4449_v27 = vld [vmem:[%s6012_s1 + $0xd8] sm:$0xff]   ;;  %v4451_v29 = vld [vmem:[%s6012_s1 + $0xe0] sm:$0xff]   ;;  %v4453_v31 = vld [vmem:[%s6012_s1 + $0xe8] sm:$0xff]  }
   0xb   :  { %2993 = vmatpush3.bf16.msra.mxu0 %v4429_v5  ;;  %v4450_v28 = vld [vmem:[%s6012_s1 + $0x98] sm:$0xff]   ;;  %v4452_v30 = vld [vmem:[%s6012_s1 + $0xa0] sm:$0xff]   ;;  %v4456_v32 = vld [vmem:[%s6012_s1 + $0xa8] sm:$0xff]  }
   0xc   :  { %2994 = vmatprep.subr.bf16.mxu0 %v4430_v6  ;;  %v4458_v33 = vld [vmem:[%s6012_s1 + $0xf0] sm:$0xff]   ;;  %v4460_v35 = vld [vmem:[%s6012_s1 + $0xf8] sm:$0xff]   ;;  %v4465_v37 = vld [vmem:[%s6012_s1 + $0x140] sm:$0xff]  }
   0xd   :  { %v4459_v34 = vld [vmem:[%s6012_s1 + $0xb0] sm:$0xff]   ;;  %v4461_v36 = vld [vmem:[%s6012_s1 + $0xb8] sm:$0xff]   ;;  %v4466_v39 = vld [vmem:[%s6012_s1 + $0x100] sm:$0xff]  }
   0xe   :  { %v4462_v38 = vld [vmem:[%s6011_s0 + $0x8] ss:$52 sps:$4 sm:$0xff]   ;;  %v4472_v43 = vld [vmem:[%s6012_s1 + $0x150] sm:$0xff]   ;;  %v4476_v49 = vld [vmem:[%s6012_s1 + $0x160] sm:$0xff]  }
   0xf   :  { %2995 = vmatpush3.bf16.msra.mxu0 %v4431_v7  ;;  %v4469_v40 = vld [vmem:[%s6011_s0 + $0x74] ss:$52 sps:$4 sm:$0xff]   ;;  %v4471_v44 = vld [vmem:[%s6011_s0 + $0x70] ss:$52 sps:$4 sm:$0xff]   ;;  %v4474_v47 = vld [vmem:[%s6012_s1 + $0x158] sm:$0xff]  }
  0x10   :  { %2996 = vmatprep.subr.bf16.mxu0 %v4432_v8  ;;  %v4467_v41 = vld [vmem:[%s6012_s1 + $0x148] sm:$0xff]   ;;  %v4473_v45 = vld [vmem:[%s6012_s1 + $0x110] sm:$0xff]   ;;  %v4475_v48 = vld [vmem:[%s6012_s1 + $0x118] sm:$0xff]  }
  0x11   :  { %v4468_v42 = vld [vmem:[%s6012_s1 + $0x108] sm:$0xff]   ;;  %v4477_v50 = vld [vmem:[%s6012_s1 + $0x120] sm:$0xff]   ;;  %v4480_v53 = vld [vmem:[%s6012_s1 + $0x170] sm:$0xff]  }
  0x12   :  { %v4486_v46 = vld [vmem:[%s6011_s0 + $0x14] ss:$52 sps:$4 sm:$0xff]   ;;  %v4482_v55 = vld [vmem:[%s6012_s1 + $0x178] sm:$0xff]   ;;  %v4487_v57 = vld [vmem:[%s6012_s1 + $0x1c0] sm:$0xff]  }
  0x13   :  { %2997 = vmatpush3.bf16.msra.mxu0 %v4433_v9  ;;  %v4478_v51 = vld [vmem:[%s6012_s1 + $0x168] sm:$0xff]   ;;  %v4481_v54 = vld [vmem:[%s6012_s1 + $0x130] sm:$0xff]   ;;  %v4483_v56 = vld [vmem:[%s6012_s1 + $0x138] sm:$0xff]  }
  0x14   :  { %2998 = vmatprep.subr.bf16.mxu0 %v4434_v10  ;;  %v4479_v52 = vld [vmem:[%s6012_s1 + $0x128] sm:$0xff]   ;;  %v4484_v58 = vld [vmem:[%s6011_s0 + $0x10] ss:$52 sps:$4 sm:$0xff]   ;;  %v4496_v3 = vld [vmem:[%s6012_s1 + $0x1d8] sm:$0xff]  }
  0x15   :  { %v4488_v59 = vld [vmem:[%s6012_s1 + $0x180] sm:$0xff]   ;;  %v4491_v60 = vld [vmem:[%s6011_s0 + $0x7c] ss:$52 sps:$4 sm:$0xff]   ;;  %v4489_v61 = vld [vmem:[%s6012_s1 + $0x1c8] sm:$0xff]  }
  0x16   :  { %v4490_v62 = vld [vmem:[%s6012_s1 + $0x188] sm:$0xff]   ;;  %v4494_v63 = vld [vmem:[%s6012_s1 + $0x1d0] sm:$0xff]   ;;  %v4497_v4 = vld [vmem:[%s6012_s1 + $0x198] sm:$0xff]  }
  0x17   :  { %2999 = vmatpush3.bf16.msra.mxu0 %v4435_v12  ;;  %v4493_v0 = vld [vmem:[%s6011_s0 + $0x78] ss:$52 sps:$4 sm:$0xff]   ;;  %v4495_v1 = vld [vmem:[%s6012_s1 + $0x190] sm:$0xff]   ;;  %v4498_v5 = vld [vmem:[%s6012_s1 + $0x1e0] sm:$0xff]  }
  0x18   :  { %3000 = vmatprep.subr.bf16.mxu0 %v4436_v13  ;;  %v4508_v2 = vld [vmem:[%s6011_s0 + $0x1c] ss:$52 sps:$4 sm:$0xff]   ;;  %v4499_v6 = vld [vmem:[%s6012_s1 + $0x1a0] sm:$0xff]   ;;  %v4500_v7 = vld [vmem:[%s6012_s1 + $0x1e8] sm:$0xff]  }
  0x19   :  { %v4501_v8 = vld [vmem:[%s6012_s1 + $0x1a8] sm:$0xff]   ;;  %v4502_v9 = vld [vmem:[%s6012_s1 + $0x1f0] sm:$0xff]  }
  0x1b   :  { %3001 = vmatpush3.bf16.msra.mxu0 %v4437_v14 }
  0x1c   :  { %3002 = vmatprep.subr.bf16.mxu0 %v4438_v15 }
  0x1f   :  { %3003 = vmatpush3.bf16.msra.mxu0 %v4439_v16 }
  0x20   :  { %3016 = vmatprep.subr.bf16.mxu0 %v4443_v17 }
  0x22   :  { %1033 = vmatmul.mubr.bf16.vlgmr.msra.gmra.mrb[0].mxu0 %v4440_v18 }
  0x23   :  { %3017 = vmatpush3.bf16.msra.mxu0 %v4444_v19  ;;  %1040 = vmatprep.mubr.bf16.mxu0 %v4454_v20 }
  0x24   :  { %3018 = vmatprep.subr.bf16.mxu0 %v4445_v21 }
  0x27   :  { %3019 = vmatpush3.bf16.msra.mxu0 %v4446_v22 }
  0x28   :  { %3020 = vmatprep.subr.bf16.mxu0 %v4447_v23 }
  0x2a   :  { %1041 = vmatmul.mubr.bf16.gmra.mrb[4].mxu0 %v4457_v25 }
  0x2b   :  { %3021 = vmatpush3.bf16.msra.mxu0 %v4448_v24  ;;  %1081 = vmatprep.mubr.bf16.mxu0 %v4464_v26 }
  0x2c   :  { %3022 = vmatprep.subr.bf16.mxu0 %v4449_v27 }
  0x2f   :  { %3023 = vmatpush3.bf16.msra.mxu0 %v4450_v28 }
  0x30   :  { %3024 = vmatprep.subr.bf16.mxu0 %v4451_v29 }
  0x33   :  { %3025 = vmatpush3.bf16.msra.mxu0 %v4452_v30 }
  0x34   :  { %3026 = vmatprep.subr.bf16.mxu0 %v4453_v31 }
  0x37   :  { %3027 = vmatpush3.bf16.msra.mxu0 %v4456_v32 }
  0x38   :  { %3028 = vmatprep.subr.bf16.mxu0 %v4458_v33 }
  0x3b   :  { %3029 = vmatpush3.bf16.msra.mxu0 %v4459_v34 }
  0x3c   :  { %3030 = vmatprep.subr.bf16.mxu0 %v4460_v35 }
  0x3f   :  { %3031 = vmatpush3.bf16.msra.mxu0 %v4461_v36 }
  0x40   :  { %3044 = vmatprep.subr.bf16.mxu0 %v4465_v37 }
  0x42   :  { %1082 = vmatmul.mubr.bf16.vlgmr.msra.gmra.mrb[8].mxu0 %v4462_v38 }
  0x43   :  { %3045 = vmatpush3.bf16.msra.mxu0 %v4466_v39  ;;  %1089 = vmatprep.mubr.bf16.mxu0 %v4469_v40 }
  0x44   :  { %3046 = vmatprep.subr.bf16.mxu0 %v4467_v41 }
  0x47   :  { %3047 = vmatpush3.bf16.msra.mxu0 %v4468_v42 }
  0x48   :  { %3048 = vmatprep.subr.bf16.mxu0 %v4472_v43 }
  0x4a   :  { %1090 = vmatmul.mubr.bf16.gmra.mrb[12].mxu0 %v4471_v44 }
  0x4b   :  { %3049 = vmatpush3.bf16.msra.mxu0 %v4473_v45  ;;  %1130 = vmatprep.mubr.bf16.mxu0 %v4486_v46 }
  0x4c   :  { %3050 = vmatprep.subr.bf16.mxu0 %v4474_v47 }
  0x4f   :  { %3051 = vmatpush3.bf16.msra.mxu0 %v4475_v48 }
  0x50   :  { %3052 = vmatprep.subr.bf16.mxu0 %v4476_v49 }
  0x53   :  { %3053 = vmatpush3.bf16.msra.mxu0 %v4477_v50 }
  0x54   :  { %3054 = vmatprep.subr.bf16.mxu0 %v4478_v51 }
  0x57   :  { %3055 = vmatpush3.bf16.msra.mxu0 %v4479_v52 }
  0x58   :  { %3056 = vmatprep.subr.bf16.mxu0 %v4480_v53 }
  0x5b   :  { %3057 = vmatpush3.bf16.msra.mxu0 %v4481_v54 }
  0x5c   :  { %3058 = vmatprep.subr.bf16.mxu0 %v4482_v55 }
  0x5f   :  { %3059 = vmatpush3.bf16.msra.mxu0 %v4483_v56 }
  0x60   :  { %3072 = vmatprep.subr.bf16.mxu0 %v4487_v57 }
  0x62   :  { %1131 = vmatmul.mubr.bf16.vlgmr.msra.gmra.mrb[16].mxu0 %v4484_v58 }
  0x63   :  { %3073 = vmatpush3.bf16.msra.mxu0 %v4488_v59  ;;  %1138 = vmatprep.mubr.bf16.mxu0 %v4491_v60 }
  0x64   :  { %3074 = vmatprep.subr.bf16.mxu0 %v4489_v61 }
  0x67   :  { %3075 = vmatpush3.bf16.msra.mxu0 %v4490_v62 }
  0x68   :  { %3076 = vmatprep.subr.bf16.mxu0 %v4494_v63 }
  0x6a   :  { %1139 = vmatmul.mubr.bf16.gmra.mrb[20].mxu0 %v4493_v0 }
  0x6b   :  { %3077 = vmatpush3.bf16.msra.mxu0 %v4495_v1  ;;  %1179 = vmatprep.mubr.bf16.mxu0 %v4508_v2 }
  0x6c   :  { %3078 = vmatprep.subr.bf16.mxu0 %v4496_v3 }
  0x6f   :  { %3079 = vmatpush3.bf16.msra.mxu0 %v4497_v4 }
  0x70   :  { %3080 = vmatprep.subr.bf16.mxu0 %v4498_v5 }
  0x73   :  { %3081 = vmatpush3.bf16.msra.mxu0 %v4499_v6 }
  0x74   :  { %3082 = vmatprep.subr.bf16.mxu0 %v4500_v7 }
  0x75   :  { %12 = vsyncpa [#allocation3], 0  ;;  %v4503_v10 = vld [vmem:[%s6012_s1 + $0x1b0] sm:$0xff]   ;;  %v4504_v11 = vld [vmem:[%s6012_s1 + $0x1f8] sm:$0xff]   ;;  %vm993_vm0 = vcmask 523264   ;;  %vm4593_vm1 = vmmov 0  }
  0x76   :  { %v4505_v12 = vld [vmem:[%s6012_s1 + $0x1b8] sm:$0xff]   ;;  %v4509_v13 = vld [vmem:[%s6012_s1 + $0x240] sm:$0xff]   ;;  %v4511_v17 = vld [vmem:[%s6012_s1 + $0x248] sm:$0xff]   ;;  %vm2831_vm2 = vcmask 25600  }
  0x77   :  { %3083 = vmatpush3.bf16.msra.mxu0 %v4501_v8  ;;  %v4506_v14 = vld [vmem:[%s6011_s0 + $0x18] ss:$52 sps:$4 sm:$0xff]   ;;  %v4510_v15 = vld [vmem:[%s6012_s1 + $0x200] sm:$0xff]   ;;  %v4516_v19 = vld [vmem:[%s6012_s1 + $0x250] sm:$0xff]  }
  0x78   :  { %3084 = vmatprep.subr.bf16.mxu0 %v4502_v9  ;;  %v4513_v16 = vld [vmem:[%s6011_s0 + $0x84] ss:$52 sps:$4 sm:$0xff]   ;;  %v4512_v18 = vld [vmem:[%s6012_s1 + $0x208] sm:$0xff]   ;;  %v4515_v20 = vld [vmem:[%s6011_s0 + $0x80] ss:$52 sps:$4 sm:$0xff]  }
  0x79   :  { %v4517_v21 = vld [vmem:[%s6012_s1 + $0x210] sm:$0xff]   ;;  %v4530_v22 = vld [vmem:[%s6011_s0 + $0x24] ss:$52 sps:$4 sm:$0xff]   ;;  %v4522_v27 = vld [vmem:[%s6012_s1 + $0x268] sm:$0xff]  }
  0x7a   :  { %v4518_v23 = vld [vmem:[%s6012_s1 + $0x258] sm:$0xff]   ;;  %v4520_v25 = vld [vmem:[%s6012_s1 + $0x260] sm:$0xff]   ;;  %v4523_v28 = vld [vmem:[%s6012_s1 + $0x228] sm:$0xff]  }
  0x7b   :  { %3085 = vmatpush3.bf16.msra.mxu0 %v4503_v10  ;;  %v4519_v24 = vld [vmem:[%s6012_s1 + $0x218] sm:$0xff]   ;;  %v4521_v26 = vld [vmem:[%s6012_s1 + $0x220] sm:$0xff]   ;;  %v4524_v29 = vld [vmem:[%s6012_s1 + $0x270] sm:$0xff]  }
  0x7c   :  { %3086 = vmatprep.subr.bf16.mxu0 %v4504_v11  ;;  %v4525_v30 = vld [vmem:[%s6012_s1 + $0x230] sm:$0xff]   ;;  %v4526_v31 = vld [vmem:[%s6012_s1 + $0x278] sm:$0xff]   ;;  %v4531_v33 = vld [vmem:[%s6012_s1 + $0x2c0] sm:$0xff]  }
  0x7d   :  { %v4527_v32 = vld [vmem:[%s6012_s1 + $0x238] sm:$0xff]   ;;  %v4528_v34 = vld [vmem:[%s6011_s0 + $0x20] ss:$52 sps:$4 sm:$0xff]   ;;  %v4533_v37 = vld [vmem:[%s6012_s1 + $0x2c8] sm:$0xff]  }
  0x7e   :  { %v4532_v35 = vld [vmem:[%s6012_s1 + $0x280] sm:$0xff]   ;;  %v4534_v38 = vld [vmem:[%s6012_s1 + $0x288] sm:$0xff]   ;;  %v4538_v39 = vld [vmem:[%s6012_s1 + $0x2d0] sm:$0xff]  }
  0x7f   :  { %3087 = vmatpush3.bf16.msra.mxu0 %v4505_v12  ;;  %v4535_v36 = vld [vmem:[%s6011_s0 + $0x8c] ss:$52 sps:$4 sm:$0xff]   ;;  %v4537_v40 = vld [vmem:[%s6011_s0 + $0x88] ss:$52 sps:$4 sm:$0xff]   ;;  %v4539_v41 = vld [vmem:[%s6012_s1 + $0x290] sm:$0xff]  }
  0x80   :  { %3100 = vmatprep.subr.bf16.mxu0 %v4509_v13  ;;  %v4552_v42 = vld [vmem:[%s6011_s0 + $0x2c] ss:$52 sps:$4 sm:$0xff]   ;;  %v4540_v43 = vld [vmem:[%s6012_s1 + $0x2d8] sm:$0xff]   ;;  %v4546_v49 = vld [vmem:[%s6012_s1 + $0x2f0] sm:$0xff]  }
  0x81   :  { %v4541_v44 = vld [vmem:[%s6012_s1 + $0x298] sm:$0xff]   ;;  %v4542_v45 = vld [vmem:[%s6012_s1 + $0x2e0] sm:$0xff]   ;;  %v4544_v47 = vld [vmem:[%s6012_s1 + $0x2e8] sm:$0xff]  }
  0x82   :  { %1180 = vmatmul.mubr.bf16.vlgmr.msra.gmra.mrb[24].mxu0 %v4506_v14  ;;  %v4543_v46 = vld [vmem:[%s6012_s1 + $0x2a0] sm:$0xff]   ;;  %v4545_v48 = vld [vmem:[%s6012_s1 + $0x2a8] sm:$0xff]   ;;  %v4547_v50 = vld [vmem:[%s6012_s1 + $0x2b0] sm:$0xff]  }
  0x83   :  { %3101 = vmatpush3.bf16.msra.mxu0 %v4510_v15  ;;  %1187 = vmatprep.mubr.bf16.mxu0 %v4513_v16  ;;  %v4548_v51 = vld [vmem:[%s6012_s1 + $0x2f8] sm:$0xff]   ;;  %v4553_v53 = vld [vmem:[%s6012_s1 + $0x300] sm:$0xff]   ;;  %v4555_v55 = vld [vmem:[%s6011_s0 + $0x94] ss:$52 sps:$4 sm:$0xff]  }
  0x84   :  { %3102 = vmatprep.subr.bf16.mxu0 %v4511_v17  ;;  %v4549_v52 = vld [vmem:[%s6012_s1 + $0x2b8] sm:$0xff]   ;;  %v4554_v56 = vld [vmem:[%s6012_s1 + $0x308] sm:$0xff]   ;;  %v4558_v57 = vld [vmem:[%s6012_s1 + $0x310] sm:$0xff]  }
  0x85   :  { %v4550_v54 = vld [vmem:[%s6011_s0 + $0x28] ss:$52 sps:$4 sm:$0xff]   ;;  %v4557_v58 = vld [vmem:[%s6011_s0 + $0x90] ss:$52 sps:$4 sm:$0xff]   ;;  %v4561_v61 = vld [vmem:[%s6011_s0 + $0x98] ss:$52 sps:$4 sm:$0xff]  }
  0x86   :  { %v4560_v59 = vld [vmem:[%s6011_s0 + $0x30] ss:$52 sps:$4 sm:$0xff]   ;;  %v4559_v60 = vld [vmem:[%s6012_s1 + $0x318] sm:$0xff]   ;;  %v2858_v10 = vld [vmem:[%s6013_s2] ss:$0 sm:$0xff] }
  0x87   :  { %3103 = vmatpush3.bf16.msra.mxu0 %v4512_v18 }
  0x88   :  { %3104 = vmatprep.subr.bf16.mxu0 %v4516_v19 }
  0x8a   :  { %1188 = vmatmul.mubr.bf16.gmra.mrb[28].mxu0 %v4515_v20 }
  0x8b   :  { %3105 = vmatpush3.bf16.msra.mxu0 %v4517_v21  ;;  %1228 = vmatprep.mubr.bf16.mxu0 %v4530_v22 }
  0x8c   :  { %3106 = vmatprep.subr.bf16.mxu0 %v4518_v23 }
  0x8f   :  { %3107 = vmatpush3.bf16.msra.mxu0 %v4519_v24 }
  0x90   :  { %3108 = vmatprep.subr.bf16.mxu0 %v4520_v25 }
  0x93   :  { %3109 = vmatpush3.bf16.msra.mxu0 %v4521_v26 }
  0x94   :  { %3110 = vmatprep.subr.bf16.mxu0 %v4522_v27 }
  0x97   :  { %3111 = vmatpush3.bf16.msra.mxu0 %v4523_v28 }
  0x98   :  { %3112 = vmatprep.subr.bf16.mxu0 %v4524_v29 }
  0x9b   :  { %3113 = vmatpush3.bf16.msra.mxu0 %v4525_v30 }
  0x9c   :  { %3114 = vmatprep.subr.bf16.mxu0 %v4526_v31 }
  0x9f   :  { %3115 = vmatpush3.bf16.msra.mxu0 %v4527_v32 }
  0xa0   :  { %3128 = vmatprep.subr.bf16.mxu0 %v4531_v33 }
  0xa2   :  { %1229 = vmatmul.mubr.bf16.vlgmr.msra.gmra.mrb[32].mxu0 %v4528_v34 }
  0xa3   :  { %3129 = vmatpush3.bf16.msra.mxu0 %v4532_v35  ;;  %1236 = vmatprep.mubr.bf16.mxu0 %v4535_v36 }
  0xa4   :  { %3130 = vmatprep.subr.bf16.mxu0 %v4533_v37 }
  0xa7   :  { %3131 = vmatpush3.bf16.msra.mxu0 %v4534_v38 }
  0xa8   :  { %3132 = vmatprep.subr.bf16.mxu0 %v4538_v39 }
  0xaa   :  { %1237 = vmatmul.mubr.bf16.gmra.mrb[36].mxu0 %v4537_v40 }
  0xab   :  { %3133 = vmatpush3.bf16.msra.mxu0 %v4539_v41  ;;  %1277 = vmatprep.mubr.bf16.mxu0 %v4552_v42 }
  0xac   :  { %3134 = vmatprep.subr.bf16.mxu0 %v4540_v43 }
  0xaf   :  { %3135 = vmatpush3.bf16.msra.mxu0 %v4541_v44 }
  0xb0   :  { %3136 = vmatprep.subr.bf16.mxu0 %v4542_v45 }
  0xb3   :  { %3137 = vmatpush3.bf16.msra.mxu0 %v4543_v46 }
  0xb4   :  { %3138 = vmatprep.subr.bf16.mxu0 %v4544_v47  ;;  %v1403_v47 = vld [vmem:[%s6016_s5] sm:$0xff] }
  0xb7   :  { %3139 = vmatpush3.bf16.msra.mxu0 %v4545_v48  ;;  %v1404_v48 = vld [vmem:[%s6016_s5 + $0x8] sm:$0xff] }
  0xb8   :  { %3140 = vmatprep.subr.bf16.mxu0 %v4546_v49  ;;  %v4007_v49 = vpack.c.bf16 %v1404_v48, %v1403_v47  ;;  %v4594_v48 = vmov 0.0  }
  0xb9   :  { %3653 = vmatprep.mubr.msk.f32.mxu1 %vm4593_vm1, %v4594_v48 }
  0xbb   :  { %3141 = vmatpush3.bf16.msra.mxu0 %v4547_v50  ;;  %v4592_v50 = vmov 0.0|0.0  }
  0xbc   :  { %3142 = vmatprep.subr.bf16.mxu0 %v4548_v51  ;;  %4126 = vmatprep.subr.bf16.mxu1 %v4592_v50  ;;  %v1483_v51 = vld [vmem:[%s6016_s5 + $0x280] sm:$0xff] }
  0xbf   :  { %3143 = vmatpush3.bf16.msra.mxu0 %v4549_v52  ;;  %v1484_v52 = vld [vmem:[%s6016_s5 + $0x288] sm:$0xff] }
  0xc0   :  { %3434 = vmatprep.subr.bf16.mxu0 %v4553_v53 }
  0xc2   :  { %1278 = vmatmul.mubr.bf16.vlgmr.msra.gmra.mrb[40].mxu0 %v4550_v54  ;;  %v1405_v54 = vld [vmem:[%s6016_s5 + $0x10] sm:$0xff] }
  0xc3   :  { %3435 = vmatpush3.bf16.msra.mxu0 %v4553_v53  ;;  %1285 = vmatprep.mubr.bf16.mxu0 %v4555_v55  ;;  %v4127_v53 = vpack.c.bf16 %v1484_v52, %v1483_v51  ;;  %v1406_v55 = vld [vmem:[%s6016_s5 + $0x18] sm:$0xff] }
  0xc4   :  { %3436 = vmatprep.subr.bf16.mxu0 %v4554_v56 }
  0xc5   :  { %4128 = vmatpush3.bf16.msra.mxu1 %v4127_v53 }
  0xc6   :  { %4129 = vmatprep.subr.bf16.mxu1 %v4592_v50 }
  0xc7   :  { %3437 = vmatpush3.bf16.msra.mxu0 %v4554_v56  ;;  %v4010_v56 = vpack.c.bf16 %v1406_v55, %v1405_v54 }
  0xc8   :  { %3438 = vmatprep.subr.bf16.mxu0 %v4558_v57 }
  0xca   :  { %1286 = vmatmul.mubr.bf16.gmra.mrb[44].mxu0 %v4557_v58  ;;  %v1486_v58 = vld [vmem:[%s6016_s5 + $0x298] sm:$0xff] }
  0xcb   :  { %3439 = vmatpush3.bf16.msra.mxu0 %v4558_v57  ;;  %3442 = vmatprep.mubr.msk.bf16.mxu0 %vm993_vm0, %v4560_v59  ;;  %v1485_v57 = vld [vmem:[%s6016_s5 + $0x290] sm:$0xff] }
  0xcc   :  { %3440 = vmatprep.subr.bf16.mxu0 %v4559_v60  ;;  %v4130_v59 = vpack.c.bf16 %v1486_v58, %v1485_v57 }
  0xce   :  { %4131 = vmatpush3.bf16.msra.mxu1 %v4130_v59 }
  0xcf   :  { %3441 = vmatpush3.bf16.msra.mxu0 %v4559_v60  ;;  %4132 = vmatprep.subr.bf16.mxu1 %v4592_v50 }
  0xd0   :  { %4006 = vmatprep.subr.bf16.mxu0 %v4592_v50 }
  0xd2   :  { %3443 = vmatmul.mubr.msk.bf16.vlgmr.msra.gmra.mrb[48].mxu0 %vm993_vm0, %v4561_v61  ;;  %v1407_v61 = vld [vmem:[%s6016_s5 + $0x20] sm:$0xff] }
  0xd3   :  { %4008 = vmatpush3.bf16.msra.mxu0 %v4007_v49  ;;  %3478 = vmatprep.mubr.msk.f32.mxu0 %vm4593_vm1, %v4594_v48 }
  0xd4   :  { %4009 = vmatprep.subr.bf16.mxu0 %v4592_v50 }
  0xd7   :  { %4011 = vmatpush3.bf16.msra.mxu0 %v4010_v56 }
  0xd8   :  { %4012 = vmatprep.subr.bf16.mxu0 %v4592_v50 }
  0xf5   :  { %v3004_v62 = vpop.f32.mrb[0].mxu0 }
  0xf6   :  { %v3005_v63 = vpop.f32.mrb[1].mxu0 }
  0xf7   :  { %v3006_v0 = vadd.f32 %v3005_v63, %v3004_v62  ;;  %v3007_v1 = vpop.f32.mrb[2].mxu0  ;;  %v1408_v62 = vld [vmem:[%s6016_s5 + $0x28] sm:$0xff] }
  0xf8   :  { %v3008_v2 = vpop.f32.mrb[3].mxu0 }
  0xf9   :  { %v3009_v3 = vadd.f32 %v3008_v2, %v3007_v1  ;;  %v1035_v13 = vadd.f32 %v3006_v0, %v2858_v10  ;;  %v4013_v0 = vpack.c.bf16 %v1408_v62, %v1407_v61 }
  0xfb   :  { %v1038_v17 = vadd.f32 %v3009_v3, %v2858_v10  ;;  %v1487_v3 = vld [vmem:[%s6016_s5 + $0x2a0] sm:$0xff]  ;;  %4014 = vmatpush3.bf16.msra.mxu0 %v4013_v0 }
  0xfc   :  { %4015 = vmatprep.subr.bf16.mxu0 %v4592_v50 }
  0xfd   :  { %v3010_v4 = vpop.f32.mrb[4].mxu0 }
  0xfe   :  { %v3011_v5 = vpop.f32.mrb[5].mxu0 }
  0xff   :  { %v3012_v6 = vadd.f32 %v3011_v5, %v3010_v4  ;;  %v3013_v7 = vpop.f32.mrb[6].mxu0  ;;  %v1488_v4 = vld [vmem:[%s6016_s5 + $0x2a8] sm:$0xff] }
 0x100   :  { %v3014_v8 = vpop.f32.mrb[7].mxu0 }
 0x101   :  { %v3015_v9 = vadd.f32 %v3014_v8, %v3013_v7  ;;  %v1043_v23 = vadd.f32 %v3012_v6, %v2858_v10  ;;  %v4133_v6 = vpack.c.bf16 %v1488_v4, %v1487_v3 }
 0x103   :  { %v1046_v27 = vadd.f32 %v3015_v9, %v2858_v10  ;;  %v1409_v9 = vld [vmem:[%s6016_s5 + $0x30] sm:$0xff]  ;;  %v1410_v10 = vld [vmem:[%s6016_s5 + $0x38] sm:$0xff]  ;;  %4134 = vmatpush3.bf16.msra.mxu1 %v4133_v6 }
 0x104   :  { %4135 = vmatprep.subr.bf16.mxu1 %v4592_v50 }
 0x115   :  { %v3032_v11 = vpop.f32.mrb[8].mxu0 }
 0x116   :  { %v3033_v12 = vpop.f32.mrb[9].mxu0 }
 0x117   :  { %v3034_v14 = vadd.f32 %v3033_v12, %v3032_v11  ;;  %v3035_v15 = vpop.f32.mrb[10].mxu0  ;;  %v4016_v11 = vpack.c.bf16 %v1410_v10, %v1409_v9 }
 0x118   :  { %v3036_v16 = vpop.f32.mrb[11].mxu0 }
 0x119   :  { %v1084_v18 = vadd.f32 %v3034_v14, %v1035_v13  ;;  %v3037_v19 = vadd.f32 %v3036_v16, %v3035_v15  ;;  %v1489_v13 = vld [vmem:[%s6016_s5 + $0x2b0] sm:$0xff]  ;;  %v1490_v14 = vld [vmem:[%s6016_s5 + $0x2b8] sm:$0xff]  ;;  %4017 = vmatpush3.bf16.msra.mxu0 %v4016_v11 }
 0x11a   :  { %v4136_v15 = vpack.c.bf16 %v1490_v14, %v1489_v13  ;;  %4018 = vmatprep.subr.bf16.mxu0 %v4592_v50 }
 0x11b   :  { %v1087_v20 = vadd.f32 %v3037_v19, %v1038_v17  ;;  %v1411_v17 = vld [vmem:[%s6016_s5 + $0x40] sm:$0xff] }
 0x11c   :  { %4137 = vmatpush3.bf16.msra.mxu1 %v4136_v15 }
 0x11d   :  { %v3038_v21 = vpop.f32.mrb[12].mxu0  ;;  %4138 = vmatprep.subr.bf16.mxu1 %v4592_v50 }
 0x11e   :  { %v3039_v22 = vpop.f32.mrb[13].mxu0 }
 0x11f   :  { %v3040_v24 = vadd.f32 %v3039_v22, %v3038_v21  ;;  %v3041_v25 = vpop.f32.mrb[14].mxu0 }
 0x120   :  { %v3042_v26 = vpop.f32.mrb[15].mxu0 }
 0x121   :  { %v1092_v28 = vadd.f32 %v3040_v24, %v1043_v23  ;;  %v3043_v29 = vadd.f32 %v3042_v26, %v3041_v25  ;;  %v1491_v23 = vld [vmem:[%s6016_s5 + $0x2c0] sm:$0xff]  ;;  %v1492_v24 = vld [vmem:[%s6016_s5 + $0x2c8] sm:$0xff] }
 0x122   :  { %v4139_v26 = vpack.c.bf16 %v1492_v24, %v1491_v23 }
 0x123   :  { %v1095_v30 = vadd.f32 %v3043_v29, %v1046_v27  ;;  %v1413_v29 = vld [vmem:[%s6016_s5 + $0x50] sm:$0xff] }
 0x124   :  { %4140 = vmatpush3.bf16.msra.mxu1 %v4139_v26 }
 0x125   :  { %4141 = vmatprep.subr.bf16.mxu1 %v4592_v50 }
 0x135   :  { %v3060_v31 = vpop.f32.mrb[16].mxu0 }
 0x136   :  { %v3061_v32 = vpop.f32.mrb[17].mxu0 }
 0x137   :  { %v3062_v33 = vadd.f32 %v3061_v32, %v3060_v31  ;;  %v3063_v34 = vpop.f32.mrb[18].mxu0 }
 0x138   :  { %v3064_v35 = vpop.f32.mrb[19].mxu0 }
 0x139   :  { %v1133_v36 = vadd.f32 %v3062_v33, %v1084_v18  ;;  %v3065_v37 = vadd.f32 %v3064_v35, %v3063_v34  ;;  %v1412_v18 = vld [vmem:[%s6016_s5 + $0x48] sm:$0xff]  ;;  %v1493_v33 = vld [vmem:[%s6016_s5 + $0x2d0] sm:$0xff]  ;;  %v1494_v34 = vld [vmem:[%s6016_s5 + $0x2d8] sm:$0xff] }
 0x13a   :  { %v4142_v35 = vpack.c.bf16 %v1494_v34, %v1493_v33 }
 0x13b   :  { %v1136_v38 = vadd.f32 %v3065_v37, %v1087_v20  ;;  %v4019_v20 = vpack.c.bf16 %v1412_v18, %v1411_v17  ;;  %v1416_v37 = vld [vmem:[%s6016_s5 + $0x68] sm:$0xff] }
 0x13c   :  { %4143 = vmatpush3.bf16.msra.mxu1 %v4142_v35 }
 0x13d   :  { %v3066_v39 = vpop.f32.mrb[20].mxu0  ;;  %4020 = vmatpush3.bf16.msra.mxu0 %v4019_v20  ;;  %4144 = vmatprep.subr.bf16.mxu1 %v4592_v50 }
 0x13e   :  { %v3067_v40 = vpop.f32.mrb[21].mxu0  ;;  %4021 = vmatprep.subr.bf16.mxu0 %v4592_v50 }
 0x13f   :  { %v3068_v41 = vadd.f32 %v3067_v40, %v3066_v39  ;;  %v3069_v42 = vpop.f32.mrb[22].mxu0  ;;  %v1495_v39 = vld [vmem:[%s6016_s5 + $0x2e0] sm:$0xff]  ;;  %v1496_v40 = vld [vmem:[%s6016_s5 + $0x2e8] sm:$0xff] }
 0x140   :  { %v3070_v43 = vpop.f32.mrb[23].mxu0 }
 0x141   :  { %v5017_v44 = vadd.f32 %v3068_v41, %v1092_v28  ;;  %v3071_v45 = vadd.f32 %v3070_v43, %v3069_v42  ;;  %v4145_v41 = vpack.c.bf16 %v1496_v40, %v1495_v39  ;;  %v1417_v42 = vld [vmem:[%s6016_s5 + $0x70] sm:$0xff]  ;;  %v1418_v43 = vld [vmem:[%s6016_s5 + $0x78] sm:$0xff] }
 0x143   :  { %v5019_v46 = vadd.f32 %v3071_v45, %v1095_v30  ;;  %v1414_v30 = vld [vmem:[%s6016_s5 + $0x58] sm:$0xff]  ;;  %4146 = vmatpush3.bf16.msra.mxu1 %v4145_v41  ;;  %v1497_v45 = vld [vmem:[%s6016_s5 + $0x2f0] sm:$0xff] }
 0x144   :  { %v4022_v31 = vpack.c.bf16 %v1414_v30, %v1413_v29  ;;  %4147 = vmatprep.subr.bf16.mxu1 %v4592_v50 }
 0x146   :  { %4023 = vmatpush3.bf16.msra.mxu0 %v4022_v31 }
 0x147   :  { %4024 = vmatprep.subr.bf16.mxu0 %v4592_v50 }
 0x155   :  { %v3088_v60 = vpop.f32.mrb[24].mxu0 }
 0x156   :  { %v3089_v63 = vpop.f32.mrb[25].mxu0 }
 0x157   :  { %v3090_v1 = vadd.f32 %v3089_v63, %v3088_v60  ;;  %v3091_v2 = vpop.f32.mrb[26].mxu0 }
 0x158   :  { %v3092_v5 = vpop.f32.mrb[27].mxu0 }
 0x159   :  { %v5063_v7 = vadd.f32 %v3090_v1, %v1133_v36  ;;  %v3093_v8 = vadd.f32 %v3092_v5, %v3091_v2  ;;  %v1415_v36 = vld [vmem:[%s6016_s5 + $0x60] sm:$0xff] }
 0x15b   :  { %v5072_v12 = vadd.f32 %v3093_v8, %v1136_v38  ;;  %v4025_v38 = vpack.c.bf16 %v1416_v37, %v1415_v36 }
 0x15d   :  { %v3094_v16 = vpop.f32.mrb[28].mxu0  ;;  %4026 = vmatpush3.bf16.msra.mxu0 %v4025_v38 }
 0x15e   :  { %v3095_v19 = vpop.f32.mrb[29].mxu0  ;;  %4027 = vmatprep.subr.bf16.mxu0 %v4592_v50 }
 0x15f   :  { %v3096_v21 = vadd.f32 %v3095_v19, %v3094_v16  ;;  %v3097_v22 = vpop.f32.mrb[30].mxu0 }
 0x160   :  { %v3098_v25 = vpop.f32.mrb[31].mxu0 }
 0x161   :  { %v1190_v27 = vadd.f32 %v3096_v21, %v5017_v44  ;;  %v3099_v28 = vadd.f32 %v3098_v25, %v3097_v22  ;;  %v4028_v44 = vpack.c.bf16 %v1418_v43, %v1417_v42 }
 0x163   :  { %v1193_v32 = vadd.f32 %v3099_v28, %v5019_v46  ;;  %v1498_v46 = vld [vmem:[%s6016_s5 + $0x2f8] sm:$0xff]  ;;  %4029 = vmatpush3.bf16.msra.mxu0 %v4028_v44 }
 0x164   :  { %v4148_v47 = vpack.c.bf16 %v1498_v46, %v1497_v45  ;;  %4030 = vmatprep.subr.bf16.mxu0 %v4592_v50 }
 0x166   :  { %4149 = vmatpush3.bf16.msra.mxu1 %v4148_v47 }
 0x167   :  { %4150 = vmatprep.subr.bf16.mxu1 %v4592_v50 }
 0x175   :  { %v3116_v49 = vpop.f32.mrb[32].mxu0 }
 0x176   :  { %v3117_v51 = vpop.f32.mrb[33].mxu0 }
 0x177   :  { %v3118_v52 = vadd.f32 %v3117_v51, %v3116_v49  ;;  %v3119_v53 = vpop.f32.mrb[34].mxu0 }
 0x178   :  { %v3120_v54 = vpop.f32.mrb[35].mxu0 }
 0x179   :  { %v1231_v55 = vadd.f32 %v3118_v52, %v5063_v7  ;;  %v3121_v56 = vadd.f32 %v3120_v54, %v3119_v53 }
 0x17b   :  { %v1234_v57 = vadd.f32 %v3121_v56, %v5072_v12 }
 0x17d   :  { %v3122_v58 = vpop.f32.mrb[36].mxu0 }
 0x17e   :  { %v3123_v59 = vpop.f32.mrb[37].mxu0 }
 0x17f   :  { %v3124_v60 = vadd.f32 %v3123_v59, %v3122_v58  ;;  %v3125_v61 = vpop.f32.mrb[38].mxu0  ;;  %v1372_v59 = vld [vmem:[%s6014_s3] sm:$0x1] }
 0x180   :  { %v3126_v62 = vpop.f32.mrb[39].mxu0 }
 0x181   :  { %v1239_v63 = vadd.f32 %v3124_v60, %v1190_v27  ;;  %v3127_v0 = vadd.f32 %v3126_v62, %v3125_v61 }
 0x183   :  { %v1242_v1 = vadd.f32 %v3127_v0, %v1193_v32 }
 0x195   :  { %v3144_v2 = vpop.f32.mrb[40].mxu0 }
 0x196   :  { %v3145_v3 = vpop.f32.mrb[41].mxu0 }
 0x197   :  { %v3146_v4 = vadd.f32 %v3145_v3, %v3144_v2  ;;  %v3147_v5 = vpop.f32.mrb[42].mxu0 }
 0x198   :  { %v3148_v6 = vpop.f32.mrb[43].mxu0 }
 0x199   :  { %v3149_v8 = vadd.f32 %v3148_v6, %v3147_v5  ;;  %v1280_v9 = vadd.f32 %v3146_v4, %v1231_v55 }
 0x19b   :  { %v1283_v10 = vadd.f32 %v3149_v8, %v1234_v57  ;;  %v1380_v57 = vlaneseq }
 0x19d   :  { %v3150_v7 = vpop.f32.mrb[44].mxu0  ;;  %v1381_v58 = vshrl.u32 %v1380_v57, 7 }
 0x19e   :  { %v3151_v11 = vpop.f32.mrb[45].mxu0 }
 0x19f   :  { %v3152_v13 = vadd.f32 %v3151_v11, %v3150_v7  ;;  %v3153_v12 = vpop.f32.mrb[46].mxu0  ;;  %v1382_v60 = vsub.s32 0, %v1381_v58  ;;  %v1433_v58 = vld [vmem:[%s6016_s5 + $0xf0] sm:$0xff] }
 0x1a0   :  { %v3154_v14 = vpop.f32.mrb[47].mxu0 }
 0x1a1   :  { %v3155_v15 = vadd.f32 %v3154_v14, %v3153_v12  ;;  %v1288_v16 = vadd.f32 %v3152_v13, %v1239_v63  ;;  %v1376_v63 = vld [vmem:[%s6015_s4] sm:$0x1]  ;;  %v1500_v12 = vld [vmem:[%s6016_s5 + $0x308] sm:$0xff] }
 0x1a2   :  { %v1499_v13 = vld [vmem:[%s6016_s5 + $0x300] sm:$0xff] }
 0x1a3   :  { %v1291_v17 = vadd.f32 %v3155_v15, %v1242_v1 }
 0x1a5   :  { %v3444_v18 = vpop.f32.mrb[48].mxu0 }
 0x1a6   :  { %v1337_v19 = vadd.f32 %v3444_v18, %v1288_v16  ;;  %v1328_v20 = vpop.f32.mrb[49].mxu0 }
 0x1a7   :  { %v1329_v21 = vadd.f32 %v1328_v20, %v1280_v9  ;;  %v3445_v22 = vpop.f32.mrb[50].mxu0  ;;  %v1419_v9 = vld [vmem:[%s6016_s5 + $0x80] sm:$0xff]  ;;  %v1422_v20 = vld [vmem:[%s6016_s5 + $0x98] sm:$0xff] }
 0x1a8   :  { %v1340_v23 = vadd.f32 %v3445_v22, %v1291_v17  ;;  %v1331_v24 = vpop.f32.mrb[51].mxu0 }
 0x1a9   :  { %v1332_v25 = vadd.f32 %v1331_v24, %v1283_v10  ;;  %v1420_v10 = vld [vmem:[%s6016_s5 + $0x88] sm:$0xff]  ;;  %v1502_v24 = vld [vmem:[%s6016_s5 + $0x318] sm:$0xff] }
 0x1aa   :  { %v4031_v16 = vpack.c.bf16 %v1420_v10, %v1419_v9  ;;  %v1438_v9 = vld [vmem:[%s6016_s5 + $0x118] sm:$0xff] }
 0x1ab   :  { %v1343_v26 = vadd.f32 %v1332_v25, %v1329_v21 }
 0x1ad   :  { %v1344_v27 = vadd.f32 %v1343_v26, %v1337_v19  ;;  %v1423_v26 = vld [vmem:[%s6016_s5 + $0xa0] sm:$0xff] }
 0x1af   :  { %v1345_v28 = vadd.f32 %v1344_v27, %v1340_v23  ;;  %v1424_v27 = vld [vmem:[%s6016_s5 + $0xa8] sm:$0xff] }
 0x1b1   :  { %v1346_v29 = vrot.slane %v1345_v28, 4 }
 0x1b3   :  { %v1347_v30 = vadd.f32 %v1346_v29, %v1345_v28  ;;  %v1503_v29 = vld [vmem:[%s6016_s5 + $0x320] sm:$0xff] }
 0x1b5   :  { %v1348_v31 = vrot.slane %v1347_v30, 2 }
 0x1b7   :  { %v1349_v32 = vadd.f32 %v1348_v31, %v1347_v30  ;;  %v1504_v30 = vld [vmem:[%s6016_s5 + $0x328] sm:$0xff]  ;;  %v4037_v31 = vpack.c.bf16 %v1424_v27, %v1423_v26  ;;  %v1521_v27 = vld [vmem:[%s6016_s5 + $0x3b0] sm:$0xff] }
 0x1b9   :  { %v1350_v33 = vrot.slane %v1349_v32, 1 }
 0x1bb   :  { %v1351_v34 = vadd.f32 %v1350_v33, %v1349_v32  ;;  %v1425_v32 = vld [vmem:[%s6016_s5 + $0xb0] sm:$0xff]  ;;  %v1426_v33 = vld [vmem:[%s6016_s5 + $0xb8] sm:$0xff] }
 0x1bd   :  { %v1353_v35 = vmul.f32 0.03125, %v1351_v34  ;;  %v4157_v34 = vpack.c.bf16 %v1504_v30, %v1503_v29  ;;  %v1443_v30 = vld [vmem:[%s6016_s5 + $0x140] sm:$0xff] }
 0x1bf   :  { %v1354_v36 = vsub.f32 %v1329_v21, %v1353_v35  ;;  %v1355_v37 = vsub.f32 %v1332_v25, %v1353_v35  ;;  %v1356_v38 = vsub.f32 %v1337_v19, %v1353_v35  ;;  %v1357_v39 = vsub.f32 %v1340_v23, %v1353_v35 }
 0x1c1   :  { %v1358_v40 = vmul.f32 %v1354_v36, %v1354_v36  ;;  %v1359_v41 = vmul.f32 %v1355_v37, %v1355_v37  ;;  %v1360_v42 = vmul.f32 %v1356_v38, %v1356_v38  ;;  %v1361_v44 = vmul.f32 %v1357_v39, %v1357_v39  ;;  %v1506_v36 = vld [vmem:[%s6016_s5 + $0x338] sm:$0xff]  ;;  %v1427_v38 = vld [vmem:[%s6016_s5 + $0xc0] sm:$0xff]  ;;  %v1428_v39 = vld [vmem:[%s6016_s5 + $0xc8] sm:$0xff] }
 0x1c2   :  { %v4040_v37 = vpack.c.bf16 %v1426_v33, %v1425_v32  ;;  %v1523_v33 = vld [vmem:[%s6016_s5 + $0x3c0] sm:$0xff] }
 0x1c3   :  { %v1362_v43 = vadd.f32 %v1359_v41, %v1358_v40  ;;  %v1507_v41 = vld [vmem:[%s6016_s5 + $0x340] sm:$0xff] }
 0x1c5   :  { %v1363_v45 = vadd.f32 %v1362_v43, %v1360_v42  ;;  %v1508_v42 = vld [vmem:[%s6016_s5 + $0x348] sm:$0xff]  ;;  %v4043_v43 = vpack.c.bf16 %v1428_v39, %v1427_v38  ;;  %v1525_v39 = vld [vmem:[%s6016_s5 + $0x3d0] sm:$0xff] }
 0x1c7   :  { %v1364_v46 = vadd.f32 %v1363_v45, %v1361_v44  ;;  %v1429_v44 = vld [vmem:[%s6016_s5 + $0xd0] sm:$0xff]  ;;  %v1430_v45 = vld [vmem:[%s6016_s5 + $0xd8] sm:$0xff] }
 0x1c9   :  { %v1365_v47 = vrot.slane %v1364_v46, 4 }
 0x1cb   :  { %v1366_v49 = vadd.f32 %v1365_v47, %v1364_v46  ;;  %v4163_v46 = vpack.c.bf16 %v1508_v42, %v1507_v41  ;;  %v1509_v47 = vld [vmem:[%s6016_s5 + $0x350] sm:$0xff]  ;;  %v1447_v42 = vld [vmem:[%s6016_s5 + $0x160] sm:$0xff] }
 0x1cd   :  { %v1367_v51 = vrot.slane %v1366_v49, 2 }
 0x1cf   :  { %v1368_v52 = vadd.f32 %v1367_v51, %v1366_v49  ;;  %v1510_v49 = vld [vmem:[%s6016_s5 + $0x358] sm:$0xff]  ;;  %v4046_v51 = vpack.c.bf16 %v1430_v45, %v1429_v44  ;;  %v1527_v45 = vld [vmem:[%s6016_s5 + $0x3e0] sm:$0xff] }
 0x1d1   :  { %v1369_v53 = vrot.slane %v1368_v52, 1 }
 0x1d3   :  { %v1370_v54 = vadd.f32 %v1369_v53, %v1368_v52  ;;  %v1431_v52 = vld [vmem:[%s6016_s5 + $0xe0] sm:$0xff]  ;;  %v1432_v53 = vld [vmem:[%s6016_s5 + $0xe8] sm:$0xff] }
 0x1d4   :  { %v4049_v57 = vpack.c.bf16 %v1432_v53, %v1431_v52  ;;  %v1529_v53 = vld [vmem:[%s6016_s5 + $0x3f0] sm:$0xff] }
 0x1d5   :  { %v1371_v55 = vmul.f32 0.03125, %v1370_v54  ;;  %v4166_v54 = vpack.c.bf16 %v1510_v49, %v1509_v47  ;;  %v1449_v49 = vld [vmem:[%s6016_s5 + $0x170] sm:$0xff] }
 0x1d7   :  { %v1373_v56 = vadd.f32 1e-05, %v1371_v55  ;;  %v1511_v55 = vld [vmem:[%s6016_s5 + $0x360] sm:$0xff] }
 0x1d9   :  { %4562 = vrsqrt.f32 %v1373_v56  ;;  %v1512_v56 = vld [vmem:[%s6016_s5 + $0x368] sm:$0xff] }
 0x1e3   :  { %v4563_v61 = vpop.eup %4562 }
 0x1e4   :  { %v1375_v62 = vmul.f32 %v4563_v61, %v1372_v59  ;;  %v1434_v59 = vld [vmem:[%s6016_s5 + $0xf8] sm:$0xff]  ;;  %v1513_v61 = vld [vmem:[%s6016_s5 + $0x370] sm:$0xff] }
 0x1e6   :  { %v1377_v0 = vmul.f32 %v1375_v62, %v1353_v35  ;;  %v1383_v1 = vrot.slane %v1375_v62, %v1382_v60  ;;  %v1505_v35 = vld [vmem:[%s6016_s5 + $0x330] sm:$0xff]  ;;  %v1514_v62 = vld [vmem:[%s6016_s5 + $0x378] sm:$0xff] }
 0x1e7   :  { %v4160_v40 = vpack.c.bf16 %v1506_v36, %v1505_v35  ;;  %v1445_v36 = vld [vmem:[%s6016_s5 + $0x150] sm:$0xff] }
 0x1e8   :  { %v1378_v2 = vsub.f32 %v1376_v63, %v1377_v0  ;;  %v1386_v3 = vmul.f32 %v1383_v1, %v1332_v25  ;;  %v1385_v4 = vmul.f32 %v1383_v1, %v1329_v21  ;;  %v1387_v5 = vmul.f32 %v1383_v1, %v1337_v19  ;;  %v1421_v19 = vld [vmem:[%s6016_s5 + $0x90] sm:$0xff]  ;;  %v1435_v0 = vld [vmem:[%s6016_s5 + $0x100] sm:$0xff] }
 0x1e9   :  { %v1388_v6 = vmul.f32 %v1383_v1, %v1340_v23  ;;  %v4151_v21 = vpack.c.bf16 %v1500_v12, %v1499_v13  ;;  %v1501_v23 = vld [vmem:[%s6016_s5 + $0x310] sm:$0xff]  ;;  %v4034_v25 = vpack.c.bf16 %v1422_v20, %v1421_v19  ;;  %v4052_v63 = vpack.c.bf16 %v1434_v59, %v1433_v58  ;;  %v1436_v1 = vld [vmem:[%s6016_s5 + $0x108] sm:$0xff]  ;;  %v1518_v13 = vld [vmem:[%s6016_s5 + $0x398] sm:$0xff] }
 0x1ea   :  { %v1393_v8 = vrot.slane %v1378_v2, %v1382_v60  ;;  %v4154_v28 = vpack.c.bf16 %v1502_v24, %v1501_v23  ;;  %v4169_v60 = vpack.c.bf16 %v1512_v56, %v1511_v55  ;;  %v4172_v2 = vpack.c.bf16 %v1514_v62, %v1513_v61  ;;  %v1440_v19 = vld [vmem:[%s6016_s5 + $0x128] sm:$0xff]  ;;  %v1441_v24 = vld [vmem:[%s6016_s5 + $0x130] sm:$0xff]  ;;  %v1451_v56 = vld [vmem:[%s6016_s5 + $0x180] sm:$0xff] }
 0x1eb   :  { %v1531_v59 = vld [vmem:[%s6016_s5 + $0x400] sm:$0xff] }
 0x1ec   :  { %v1396_v7 = vadd.f32 %v1393_v8, %v1386_v3  ;;  %v1395_v11 = vadd.f32 %v1393_v8, %v1385_v4  ;;  %v5165_v14 = vadd.f32 %v1393_v8, %v1387_v5  ;;  %v5167_v15 = vadd.f32 %v1393_v8, %v1388_v6  ;;  %v1515_v3 = vld [vmem:[%s6016_s5 + $0x380] sm:$0xff]  ;;  %v1516_v4 = vld [vmem:[%s6016_s5 + $0x388] sm:$0xff]  ;;  %v1437_v8 = vld [vmem:[%s6016_s5 + $0x110] sm:$0xff] }
 0x1ed   :  { %v4055_v5 = vpack.c.bf16 %v1436_v1, %v1435_v0  ;;  %v4175_v10 = vpack.c.bf16 %v1516_v4, %v1515_v3  ;;  %v4058_v12 = vpack.c.bf16 %v1438_v9, %v1437_v8  ;;  %v1454_v0 = vld [vmem:[%s6016_s5 + $0x198] sm:$0xff]  ;;  %v1533_v3 = vld [vmem:[%s6016_s5 + $0x410] sm:$0xff]  ;;  %v1456_v8 = vld [vmem:[%s6016_s5 + $0x1a8] sm:$0xff] }
 0x1ee   :  { %v5169_v17 = vmax.f32 %v1396_v7, 0.0  ;;  %v5171_v18 = vmax.f32 %v1395_v11, 0.0  ;;  %v1517_v11 = vld [vmem:[%s6016_s5 + $0x390] sm:$0xff]  ;;  %v1534_v4 = vld [vmem:[%s6016_s5 + $0x418] sm:$0xff] }
 0x1ef   :  { %v4178_v20 = vpack.c.bf16 %v1518_v13, %v1517_v11  ;;  %v4202_v9 = vpack.c.bf16 %v1534_v4, %v1533_v3  ;;  %v1457_v13 = vld [vmem:[%s6016_s5 + $0x1b0] sm:$0xff]  ;;  %v1474_v3 = vld [vmem:[%s6016_s5 + $0x238] sm:$0xff] }
 0x1f0   :  { %3479 = vmatmul.mubr.f32.vlgmr.msra.gmra.mrb[52].mxu0 %v5171_v18  ;;  %v2030_v22 = vrot.slane %v5169_v17, 2  ;;  %v1739_v6 = vrot.slane %v5171_v18, 2  ;;  %v2103_v7 = vrot.slane %v5169_v17, 4  ;;  %v1812_v62 = vrot.slane %v5171_v18, 4 }
 0x1f1   :  { %4032 = vmatpush3.bf16.msra.mxu0 %v4031_v16  ;;  %3513 = vmatprep.mubr.msk.f32.mxu0 %vm4593_vm1, %v4594_v48  ;;  %v1439_v16 = vld [vmem:[%s6016_s5 + $0x120] sm:$0xff] }
 0x1f2   :  { %3654 = vmatmul.mubr.f32.vlgmr.msra.gmra.mrb[0].mxu1 %v2030_v22  ;;  %4033 = vmatprep.subr.bf16.mxu0 %v4592_v50  ;;  %v1520_v22 = vld [vmem:[%s6016_s5 + $0x3a8] sm:$0xff]  ;;  %v4061_v23 = vpack.c.bf16 %v1440_v19, %v1439_v16  ;;  %v1537_v19 = vld [vmem:[%s6016_s5 + $0x430] sm:$0xff] }
 0x1f3   :  { %4152 = vmatpush3.bf16.msra.mxu1 %v4151_v21  ;;  %3688 = vmatprep.mubr.msk.f32.mxu1 %vm4593_vm1, %v4594_v48  ;;  %v1519_v21 = vld [vmem:[%s6016_s5 + $0x3a0] sm:$0xff] }
 0x1f4   :  { %4153 = vmatprep.subr.bf16.mxu1 %v4592_v50  ;;  %v4181_v26 = vpack.c.bf16 %v1520_v22, %v1519_v21  ;;  %v1459_v22 = vld [vmem:[%s6016_s5 + $0x1c0] sm:$0xff] }
 0x1f5   :  { %4035 = vmatpush3.bf16.msra.mxu0 %v4034_v25  ;;  %v1442_v25 = vld [vmem:[%s6016_s5 + $0x138] sm:$0xff] }
 0x1f6   :  { %4036 = vmatprep.subr.bf16.mxu0 %v4592_v50  ;;  %v4064_v29 = vpack.c.bf16 %v1442_v25, %v1441_v24  ;;  %v1539_v25 = vld [vmem:[%s6016_s5 + $0x440] sm:$0xff] }
 0x1f7   :  { %4155 = vmatpush3.bf16.msra.mxu1 %v4154_v28  ;;  %v1522_v28 = vld [vmem:[%s6016_s5 + $0x3b8] sm:$0xff] }
 0x1f8   :  { %4156 = vmatprep.subr.bf16.mxu1 %v4592_v50  ;;  %v4184_v32 = vpack.c.bf16 %v1522_v28, %v1521_v27  ;;  %v1461_v28 = vld [vmem:[%s6016_s5 + $0x1d0] sm:$0xff] }
 0x1f9   :  { %4038 = vmatpush3.bf16.msra.mxu0 %v4037_v31  ;;  %v1444_v31 = vld [vmem:[%s6016_s5 + $0x148] sm:$0xff] }
 0x1fa   :  { %4039 = vmatprep.subr.bf16.mxu0 %v4592_v50  ;;  %v4067_v35 = vpack.c.bf16 %v1444_v31, %v1443_v30  ;;  %v1541_v31 = vld [vmem:[%s6016_s5 + $0x450] sm:$0xff] }
 0x1fb   :  { %4158 = vmatpush3.bf16.msra.mxu1 %v4157_v34  ;;  %v1524_v34 = vld [vmem:[%s6016_s5 + $0x3c8] sm:$0xff] }
 0x1fc   :  { %4159 = vmatprep.subr.bf16.mxu1 %v4592_v50  ;;  %v4187_v38 = vpack.c.bf16 %v1524_v34, %v1523_v33  ;;  %v1463_v34 = vld [vmem:[%s6016_s5 + $0x1e0] sm:$0xff] }
 0x1fd   :  { %4041 = vmatpush3.bf16.msra.mxu0 %v4040_v37  ;;  %v1446_v37 = vld [vmem:[%s6016_s5 + $0x158] sm:$0xff] }
 0x1fe   :  { %4042 = vmatprep.subr.bf16.mxu0 %v4592_v50  ;;  %v4070_v41 = vpack.c.bf16 %v1446_v37, %v1445_v36  ;;  %v1543_v37 = vld [vmem:[%s6016_s5 + $0x460] sm:$0xff] }
 0x1ff   :  { %4161 = vmatpush3.bf16.msra.mxu1 %v4160_v40  ;;  %v1526_v40 = vld [vmem:[%s6016_s5 + $0x3d8] sm:$0xff] }
 0x200   :  { %4162 = vmatprep.subr.bf16.mxu1 %v4592_v50  ;;  %v4190_v44 = vpack.c.bf16 %v1526_v40, %v1525_v39  ;;  %v1465_v40 = vld [vmem:[%s6016_s5 + $0x1f0] sm:$0xff] }
 0x201   :  { %4044 = vmatpush3.bf16.msra.mxu0 %v4043_v43  ;;  %v1448_v43 = vld [vmem:[%s6016_s5 + $0x168] sm:$0xff] }
 0x202   :  { %4045 = vmatprep.subr.bf16.mxu0 %v4592_v50  ;;  %v4073_v47 = vpack.c.bf16 %v1448_v43, %v1447_v42  ;;  %v1545_v43 = vld [vmem:[%s6016_s5 + $0x470] sm:$0xff] }
 0x203   :  { %4164 = vmatpush3.bf16.msra.mxu1 %v4163_v46  ;;  %v1528_v46 = vld [vmem:[%s6016_s5 + $0x3e8] sm:$0xff] }
 0x204   :  { %4165 = vmatprep.subr.bf16.mxu1 %v4592_v50  ;;  %v4193_v52 = vpack.c.bf16 %v1528_v46, %v1527_v45  ;;  %v1467_v46 = vld [vmem:[%s6016_s5 + $0x200] sm:$0xff] }
 0x205   :  { %4047 = vmatpush3.bf16.msra.mxu0 %v4046_v51  ;;  %v1450_v51 = vld [vmem:[%s6016_s5 + $0x178] sm:$0xff] }
 0x206   :  { %4048 = vmatprep.subr.bf16.mxu0 %v4592_v50  ;;  %v4076_v55 = vpack.c.bf16 %v1450_v51, %v1449_v49  ;;  %v1547_v51 = vld [vmem:[%s6016_s5 + $0x480] sm:$0xff] }
 0x207   :  { %4167 = vmatpush3.bf16.msra.mxu1 %v4166_v54  ;;  %v1530_v54 = vld [vmem:[%s6016_s5 + $0x3f8] sm:$0xff] }
 0x208   :  { %4168 = vmatprep.subr.bf16.mxu1 %v4592_v50  ;;  %v4196_v58 = vpack.c.bf16 %v1530_v54, %v1529_v53  ;;  %v1885_v54 = vrot.slane %v5171_v18, 6  ;;  %v1549_v18 = vld [vmem:[%s6016_s5 + $0x490] sm:$0xff] }
 0x209   :  { %4050 = vmatpush3.bf16.msra.mxu0 %v4049_v57  ;;  %v1452_v57 = vld [vmem:[%s6016_s5 + $0x188] sm:$0xff] }
 0x20a   :  { %4051 = vmatprep.subr.bf16.mxu0 %v4592_v50  ;;  %v4079_v61 = vpack.c.bf16 %v1452_v57, %v1451_v56  ;;  %v1470_v56 = vld [vmem:[%s6016_s5 + $0x218] sm:$0xff] }
 0x20b   :  { %4170 = vmatpush3.bf16.msra.mxu1 %v4169_v60  ;;  %v1532_v60 = vld [vmem:[%s6016_s5 + $0x408] sm:$0xff] }
 0x20c   :  { %4171 = vmatprep.subr.bf16.mxu1 %v4592_v50  ;;  %v4199_v1 = vpack.c.bf16 %v1532_v60, %v1531_v59  ;;  %v1550_v59 = vld [vmem:[%s6016_s5 + $0x498] sm:$0xff] }
 0x20d   :  { %4053 = vmatpush3.bf16.msra.mxu0 %v4052_v63  ;;  %v1453_v63 = vld [vmem:[%s6016_s5 + $0x190] sm:$0xff] }
 0x20e   :  { %4054 = vmatprep.subr.bf16.mxu0 %v4592_v50 }
 0x20f   :  { %4173 = vmatpush3.bf16.msra.mxu1 %v4172_v2  ;;  %v2176_v2 = vrot.slane %v5169_v17, 6 }
 0x210   :  { %3514 = vmatmul.mubr.f32.vlgmr.msra.gmra.mrb[52].mxu0 %v1739_v6  ;;  %4174 = vmatprep.subr.bf16.mxu1 %v4592_v50  ;;  %v1455_v6 = vld [vmem:[%s6016_s5 + $0x1a0] sm:$0xff] }
 0x211   :  { %4056 = vmatpush3.bf16.msra.mxu0 %v4055_v5  ;;  %3548 = vmatprep.mubr.msk.f32.mxu0 %vm4593_vm1, %v4594_v48  ;;  %v4082_v5 = vpack.c.bf16 %v1454_v0, %v1453_v63  ;;  %v4085_v11 = vpack.c.bf16 %v1456_v8, %v1455_v6  ;;  %v1551_v63 = vld [vmem:[%s6016_s5 + $0x4a0] sm:$0xff]  ;;  %v1552_v0 = vld [vmem:[%s6016_s5 + $0x4a8] sm:$0xff]  ;;  %v1554_v6 = vld [vmem:[%s6016_s5 + $0x4b8] sm:$0xff] }
 0x212   :  { %3689 = vmatmul.mubr.f32.vlgmr.msra.gmra.mrb[0].mxu1 %v2103_v7  ;;  %4057 = vmatprep.subr.bf16.mxu0 %v4592_v50  ;;  %v1536_v7 = vld [vmem:[%s6016_s5 + $0x428] sm:$0xff]  ;;  %v4229_v4 = vpack.c.bf16 %v1552_v0, %v1551_v63 }
 0x213   :  { %4176 = vmatpush3.bf16.msra.mxu1 %v4175_v10  ;;  %3723 = vmatprep.mubr.msk.f32.mxu1 %vm4593_vm1, %v4594_v48  ;;  %v1535_v10 = vld [vmem:[%s6016_s5 + $0x420] sm:$0xff]  ;;  %v1580_v63 = vld [vmem:[%s6016_s5 + $0x588] sm:$0xff] }
 0x214   :  { %4177 = vmatprep.subr.bf16.mxu1 %v4592_v50  ;;  %v4205_v16 = vpack.c.bf16 %v1536_v7, %v1535_v10  ;;  %v1476_v10 = vld [vmem:[%s6016_s5 + $0x248] sm:$0xff] }
 0x215   :  { %4059 = vmatpush3.bf16.msra.mxu0 %v4058_v12  ;;  %v1458_v12 = vld [vmem:[%s6016_s5 + $0x1b8] sm:$0xff] }
 0x216   :  { %4060 = vmatprep.subr.bf16.mxu0 %v4592_v50  ;;  %v4088_v21 = vpack.c.bf16 %v1458_v12, %v1457_v13  ;;  %v1556_v13 = vld [vmem:[%s6016_s5 + $0x4c8] sm:$0xff] }
 0x217   :  { %4179 = vmatpush3.bf16.msra.mxu1 %v4178_v20  ;;  %v1538_v20 = vld [vmem:[%s6016_s5 + $0x438] sm:$0xff] }
 0x218   :  { %4180 = vmatprep.subr.bf16.mxu1 %v4592_v50  ;;  %v4208_v24 = vpack.c.bf16 %v1538_v20, %v1537_v19  ;;  %v1478_v19 = vld [vmem:[%s6016_s5 + $0x258] sm:$0xff] }
 0x219   :  { %4062 = vmatpush3.bf16.msra.mxu0 %v4061_v23  ;;  %v1460_v23 = vld [vmem:[%s6016_s5 + $0x1c8] sm:$0xff] }
 0x21a   :  { %4063 = vmatprep.subr.bf16.mxu0 %v4592_v50  ;;  %v4091_v27 = vpack.c.bf16 %v1460_v23, %v1459_v22  ;;  %v1558_v22 = vld [vmem:[%s6016_s5 + $0x4d8] sm:$0xff] }
 0x21b   :  { %4182 = vmatpush3.bf16.msra.mxu1 %v4181_v26  ;;  %v1540_v26 = vld [vmem:[%s6016_s5 + $0x448] sm:$0xff] }
 0x21c   :  { %4183 = vmatprep.subr.bf16.mxu1 %v4592_v50  ;;  %v4211_v30 = vpack.c.bf16 %v1540_v26, %v1539_v25  ;;  %v1480_v25 = vld [vmem:[%s6016_s5 + $0x268] sm:$0xff] }
 0x21d   :  { %4065 = vmatpush3.bf16.msra.mxu0 %v4064_v29  ;;  %v1462_v29 = vld [vmem:[%s6016_s5 + $0x1d8] sm:$0xff] }
 0x21e   :  { %4066 = vmatprep.subr.bf16.mxu0 %v4592_v50  ;;  %v4094_v33 = vpack.c.bf16 %v1462_v29, %v1461_v28  ;;  %v1560_v28 = vld [vmem:[%s6016_s5 + $0x4e8] sm:$0xff] }
 0x21f   :  { %4185 = vmatpush3.bf16.msra.mxu1 %v4184_v32  ;;  %v1542_v32 = vld [vmem:[%s6016_s5 + $0x458] sm:$0xff] }
 0x220   :  { %4186 = vmatprep.subr.bf16.mxu1 %v4592_v50  ;;  %v4214_v36 = vpack.c.bf16 %v1542_v32, %v1541_v31  ;;  %v1482_v31 = vld [vmem:[%s6016_s5 + $0x278] sm:$0xff] }
 0x221   :  { %4068 = vmatpush3.bf16.msra.mxu0 %v4067_v35  ;;  %v1464_v35 = vld [vmem:[%s6016_s5 + $0x1e8] sm:$0xff] }
 0x222   :  { %4069 = vmatprep.subr.bf16.mxu0 %v4592_v50  ;;  %v4097_v39 = vpack.c.bf16 %v1464_v35, %v1463_v34  ;;  %v1562_v34 = vld [vmem:[%s6016_s5 + $0x4f8] sm:$0xff] }
 0x223   :  { %4188 = vmatpush3.bf16.msra.mxu1 %v4187_v38  ;;  %v1544_v38 = vld [vmem:[%s6016_s5 + $0x468] sm:$0xff] }
 0x224   :  { %4189 = vmatprep.subr.bf16.mxu1 %v4592_v50  ;;  %v4217_v42 = vpack.c.bf16 %v1544_v38, %v1543_v37  ;;  %v1563_v37 = vld [vmem:[%s6016_s5 + $0x500] sm:$0xff]  ;;  %v1564_v38 = vld [vmem:[%s6016_s5 + $0x508] sm:$0xff] }
 0x225   :  { %4071 = vmatpush3.bf16.msra.mxu0 %v4070_v41  ;;  %v1466_v41 = vld [vmem:[%s6016_s5 + $0x1f8] sm:$0xff] }
 0x226   :  { %4072 = vmatprep.subr.bf16.mxu0 %v4592_v50  ;;  %v4100_v45 = vpack.c.bf16 %v1466_v41, %v1465_v40  ;;  %v1565_v41 = vld [vmem:[%s6016_s5 + $0x510] sm:$0xff] }
 0x227   :  { %4191 = vmatpush3.bf16.msra.mxu1 %v4190_v44  ;;  %v1546_v44 = vld [vmem:[%s6016_s5 + $0x478] sm:$0xff] }
 0x228   :  { %4192 = vmatprep.subr.bf16.mxu1 %v4592_v50  ;;  %v4220_v49 = vpack.c.bf16 %v1546_v44, %v1545_v43  ;;  %v1568_v44 = vld [vmem:[%s6016_s5 + $0x528] sm:$0xff] }
 0x229   :  { %4074 = vmatpush3.bf16.msra.mxu0 %v4073_v47  ;;  %v1468_v47 = vld [vmem:[%s6016_s5 + $0x208] sm:$0xff] }
 0x22a   :  { %4075 = vmatprep.subr.bf16.mxu0 %v4592_v50  ;;  %v4103_v53 = vpack.c.bf16 %v1468_v47, %v1467_v46  ;;  %v1569_v46 = vld [vmem:[%s6016_s5 + $0x530] sm:$0xff]  ;;  %v1570_v47 = vld [vmem:[%s6016_s5 + $0x538] sm:$0xff] }
 0x22b   :  { %4194 = vmatpush3.bf16.msra.mxu1 %v4193_v52  ;;  %v1548_v52 = vld [vmem:[%s6016_s5 + $0x488] sm:$0xff] }
 0x22c   :  { %4195 = vmatprep.subr.bf16.mxu1 %v4592_v50  ;;  %v4223_v57 = vpack.c.bf16 %v1548_v52, %v1547_v51  ;;  %v1571_v51 = vld [vmem:[%s6016_s5 + $0x540] sm:$0xff]  ;;  %v1572_v52 = vld [vmem:[%s6016_s5 + $0x548] sm:$0xff] }
 0x22d   :  { %4077 = vmatpush3.bf16.msra.mxu0 %v4076_v55  ;;  %v1469_v55 = vld [vmem:[%s6016_s5 + $0x210] sm:$0xff] }
 0x22e   :  { %4078 = vmatprep.subr.bf16.mxu0 %v4592_v50  ;;  %v4106_v60 = vpack.c.bf16 %v1470_v56, %v1469_v55  ;;  %v1574_v55 = vld [vmem:[%s6016_s5 + $0x558] sm:$0xff] }
 0x22f   :  { %4197 = vmatpush3.bf16.msra.mxu1 %v4196_v58  ;;  %v5534_v58 = vmax.f32 %v5165_v14, 0.0  ;;  %v1471_v14 = vld [vmem:[%s6016_s5 + $0x220] sm:$0xff] }
 0x230   :  { %3549 = vmatmul.mubr.f32.vlgmr.msra.gmra.mrb[52].mxu0 %v1812_v62  ;;  %4198 = vmatprep.subr.bf16.mxu1 %v4592_v50  ;;  %v4226_v62 = vpack.c.bf16 %v1550_v59, %v1549_v18  ;;  %v1576_v18 = vld [vmem:[%s6016_s5 + $0x568] sm:$0xff] }
 0x231   :  { %4080 = vmatpush3.bf16.msra.mxu0 %v4079_v61  ;;  %3583 = vmatprep.mubr.msk.f32.mxu0 %vm4593_vm1, %v4594_v48  ;;  %v1472_v61 = vld [vmem:[%s6016_s5 + $0x228] sm:$0xff]  ;;  %v2321_v40 = vrot.slane %v5534_v58, 2 }
 0x232   :  { %3724 = vmatmul.mubr.f32.vlgmr.msra.gmra.mrb[0].mxu1 %v2176_v2  ;;  %4081 = vmatprep.subr.bf16.mxu0 %v4592_v50  ;;  %v1473_v2 = vld [vmem:[%s6016_s5 + $0x230] sm:$0xff] }
 0x233   :  { %4200 = vmatpush3.bf16.msra.mxu1 %v4199_v1  ;;  %3758 = vmatprep.mubr.msk.f32.mxu1 %vm4593_vm1, %v4594_v48  ;;  %v4109_v1 = vpack.c.bf16 %v1472_v61, %v1471_v14  ;;  %v4112_v8 = vpack.c.bf16 %v1474_v3, %v1473_v2  ;;  %v1578_v14 = vld [vmem:[%s6016_s5 + $0x578] sm:$0xff]  ;;  %v1581_v2 = vld [vmem:[%s6016_s5 + $0x590] sm:$0xff] }
 0x234   :  { %4201 = vmatprep.subr.bf16.mxu1 %v4592_v50  ;;  %v1582_v3 = vld [vmem:[%s6016_s5 + $0x598] sm:$0xff] }
 0x235   :  { %4083 = vmatpush3.bf16.msra.mxu0 %v4082_v5  ;;  %v1553_v5 = vld [vmem:[%s6016_s5 + $0x4b0] sm:$0xff] }
 0x236   :  { %4084 = vmatprep.subr.bf16.mxu0 %v4592_v50  ;;  %v4232_v7 = vpack.c.bf16 %v1554_v6, %v1553_v5  ;;  %v1583_v5 = vld [vmem:[%s6016_s5 + $0x5a0] sm:$0xff]  ;;  %v1584_v6 = vld [vmem:[%s6016_s5 + $0x5a8] sm:$0xff] }
 0x237   :  { %4203 = vmatpush3.bf16.msra.mxu1 %v4202_v9  ;;  %v1475_v9 = vld [vmem:[%s6016_s5 + $0x240] sm:$0xff] }
 0x238   :  { %4204 = vmatprep.subr.bf16.mxu1 %v4592_v50  ;;  %v4115_v12 = vpack.c.bf16 %v1476_v10, %v1475_v9  ;;  %v1585_v9 = vld [vmem:[%s6016_s5 + $0x5b0] sm:$0xff]  ;;  %v1586_v10 = vld [vmem:[%s6016_s5 + $0x5b8] sm:$0xff] }
 0x239   :  { %4086 = vmatpush3.bf16.msra.mxu0 %v4085_v11  ;;  %v1555_v11 = vld [vmem:[%s6016_s5 + $0x4c0] sm:$0xff] }
 0x23a   :  { %4087 = vmatprep.subr.bf16.mxu0 %v4592_v50  ;;  %v4235_v20 = vpack.c.bf16 %v1556_v13, %v1555_v11  ;;  %v1587_v11 = vld [vmem:[%s6016_s5 + $0x5c0] sm:$0xff]  ;;  %v1588_v13 = vld [vmem:[%s6016_s5 + $0x5c8] sm:$0xff] }
 0x23b   :  { %4206 = vmatpush3.bf16.msra.mxu1 %v4205_v16  ;;  %v1477_v16 = vld [vmem:[%s6016_s5 + $0x250] sm:$0xff] }
 0x23c   :  { %4207 = vmatprep.subr.bf16.mxu1 %v4592_v50  ;;  %v4118_v23 = vpack.c.bf16 %v1478_v19, %v1477_v16  ;;  %v1589_v16 = vld [vmem:[%s6016_s5 + $0x5d0] sm:$0xff]  ;;  %v1590_v19 = vld [vmem:[%s6016_s5 + $0x5d8] sm:$0xff] }
 0x23d   :  { %4089 = vmatpush3.bf16.msra.mxu0 %v4088_v21  ;;  %v1557_v21 = vld [vmem:[%s6016_s5 + $0x4d0] sm:$0xff] }
 0x23e   :  { %4090 = vmatprep.subr.bf16.mxu0 %v4592_v50  ;;  %v4238_v26 = vpack.c.bf16 %v1558_v22, %v1557_v21  ;;  %v1591_v21 = vld [vmem:[%s6016_s5 + $0x5e0] sm:$0xff]  ;;  %v1592_v22 = vld [vmem:[%s6016_s5 + $0x5e8] sm:$0xff] }
 0x23f   :  { %4209 = vmatpush3.bf16.msra.mxu1 %v4208_v24  ;;  %v1479_v24 = vld [vmem:[%s6016_s5 + $0x260] sm:$0xff] }
 0x240   :  { %4210 = vmatprep.subr.bf16.mxu1 %v4592_v50  ;;  %v4121_v29 = vpack.c.bf16 %v1480_v25, %v1479_v24  ;;  %v1593_v24 = vld [vmem:[%s6016_s5 + $0x5f0] sm:$0xff]  ;;  %v1594_v25 = vld [vmem:[%s6016_s5 + $0x5f8] sm:$0xff] }
 0x241   :  { %4092 = vmatpush3.bf16.msra.mxu0 %v4091_v27  ;;  %v1559_v27 = vld [vmem:[%s6016_s5 + $0x4e0] sm:$0xff] }
 0x242   :  { %4093 = vmatprep.subr.bf16.mxu0 %v4592_v50  ;;  %v4241_v32 = vpack.c.bf16 %v1560_v28, %v1559_v27  ;;  %v1595_v27 = vld [vmem:[%s6016_s5 + $0x600] sm:$0xff]  ;;  %v1596_v28 = vld [vmem:[%s6016_s5 + $0x608] sm:$0xff] }
 0x243   :  { %4212 = vmatpush3.bf16.msra.mxu1 %v4211_v30  ;;  %v1481_v30 = vld [vmem:[%s6016_s5 + $0x270] sm:$0xff] }
 0x244   :  { %4213 = vmatprep.subr.bf16.mxu1 %v4592_v50  ;;  %v4124_v35 = vpack.c.bf16 %v1482_v31, %v1481_v30  ;;  %v2467_v30 = vrot.slane %v5534_v58, 6  ;;  %v1597_v31 = vld [vmem:[%s6016_s5 + $0x610] sm:$0xff] }
 0x245   :  { %4095 = vmatpush3.bf16.msra.mxu0 %v4094_v33  ;;  %v1561_v33 = vld [vmem:[%s6016_s5 + $0x4f0] sm:$0xff] }
 0x246   :  { %4096 = vmatprep.subr.bf16.mxu0 %v4592_v50 }
 0x247   :  { %4215 = vmatpush3.bf16.msra.mxu1 %v4214_v36  ;;  %v4244_v36 = vpack.c.bf16 %v1562_v34, %v1561_v33  ;;  %v1600_v34 = vld [vmem:[%s6016_s5 + $0x628] sm:$0xff] }
 0x248   :  { %4216 = vmatprep.subr.bf16.mxu1 %v4592_v50 }
 0x249   :  { %4098 = vmatpush3.bf16.msra.mxu0 %v4097_v39  ;;  %v4247_v39 = vpack.c.bf16 %v1564_v38, %v1563_v37  ;;  %v1602_v37 = vld [vmem:[%s6016_s5 + $0x638] sm:$0xff] }
 0x24a   :  { %4099 = vmatprep.subr.bf16.mxu0 %v4592_v50 }
 0x24b   :  { %4218 = vmatpush3.bf16.msra.mxu1 %v4217_v42  ;;  %v1566_v42 = vld [vmem:[%s6016_s5 + $0x518] sm:$0xff] }
 0x24c   :  { %4219 = vmatprep.subr.bf16.mxu1 %v4592_v50  ;;  %v4250_v43 = vpack.c.bf16 %v1566_v42, %v1565_v41  ;;  %v1605_v42 = vld [vmem:[%s6016_s5 + $0x650] sm:$0xff] }
 0x24d   :  { %4101 = vmatpush3.bf16.msra.mxu0 %v4100_v45 }
 0x24e   :  { %4102 = vmatprep.subr.bf16.mxu0 %v4592_v50 }
 0x24f   :  { %4221 = vmatpush3.bf16.msra.mxu1 %v4220_v49  ;;  %v4256_v49 = vpack.c.bf16 %v1570_v47, %v1569_v46  ;;  %v1609_v47 = vld [vmem:[%s6016_s5 + $0x670] sm:$0xff] }
 0x250   :  { %3584 = vmatmul.mubr.f32.vlgmr.msra.gmra.mrb[52].mxu0 %v1885_v54  ;;  %4222 = vmatprep.subr.bf16.mxu1 %v4592_v50  ;;  %v1573_v54 = vld [vmem:[%s6016_s5 + $0x550] sm:$0xff] }
 0x251   :  { %4104 = vmatpush3.bf16.msra.mxu0 %v4103_v53  ;;  %3618 = vmatprep.mubr.msk.f32.mxu0 %vm4593_vm1, %v4594_v48  ;;  %v4259_v53 = vpack.c.bf16 %v1572_v52, %v1571_v51  ;;  %v4262_v56 = vpack.c.bf16 %v1574_v55, %v1573_v54  ;;  %v1611_v52 = vld [vmem:[%s6016_s5 + $0x680] sm:$0xff]  ;;  %v5819_v55 = vmax.f32 %v5167_v15, 0.0 }
 0x252   :  { %3759 = vmatmul.mubr.f32.vlgmr.msra.gmra.mrb[0].mxu1 %v5534_v58  ;;  %4105 = vmatprep.subr.bf16.mxu0 %v4592_v50  ;;  %v1615_v15 = vld [vmem:[%s6016_s5 + $0x6a0] sm:$0xff] }
 0x253   :  { %4224 = vmatpush3.bf16.msra.mxu1 %v4223_v57  ;;  %3793 = vmatprep.mubr.msk.f32.mxu1 %vm4593_vm1, %v4594_v48  ;;  %v1575_v57 = vld [vmem:[%s6016_s5 + $0x560] sm:$0xff] }
 0x254   :  { %4225 = vmatprep.subr.bf16.mxu1 %v4592_v50  ;;  %v4265_v59 = vpack.c.bf16 %v1576_v18, %v1575_v57  ;;  %v1614_v57 = vld [vmem:[%s6016_s5 + $0x698] sm:$0xff] }
 0x255   :  { %4107 = vmatpush3.bf16.msra.mxu0 %v4106_v60  ;;  %v1577_v60 = vld [vmem:[%s6016_s5 + $0x570] sm:$0xff] }
 0x256   :  { %4108 = vmatprep.subr.bf16.mxu0 %v4592_v50  ;;  %v4268_v61 = vpack.c.bf16 %v1578_v14, %v1577_v60  ;;  %v1617_v14 = vld [vmem:[%s6016_s5 + $0x6b0] sm:$0xff] }
 0x257   :  { %4227 = vmatpush3.bf16.msra.mxu1 %v4226_v62  ;;  %v1579_v62 = vld [vmem:[%s6016_s5 + $0x580] sm:$0xff] }
 0x258   :  { %4228 = vmatprep.subr.bf16.mxu1 %v4592_v50  ;;  %v4271_v0 = vpack.c.bf16 %v1580_v63, %v1579_v62  ;;  %v1619_v63 = vld [vmem:[%s6016_s5 + $0x6c0] sm:$0xff] }
 0x259   :  { %4110 = vmatpush3.bf16.msra.mxu0 %v4109_v1  ;;  %v2394_v1 = vrot.slane %v5534_v58, 4  ;;  %v1599_v58 = vld [vmem:[%s6016_s5 + $0x620] sm:$0xff] }
 0x25a   :  { %4111 = vmatprep.subr.bf16.mxu0 %v4592_v50 }
 0x25b   :  { %4230 = vmatpush3.bf16.msra.mxu1 %v4229_v4  ;;  %v4274_v4 = vpack.c.bf16 %v1582_v3, %v1581_v2  ;;  %v1621_v2 = vld [vmem:[%s6016_s5 + $0x6d0] sm:$0xff]  ;;  %v1622_v3 = vld [vmem:[%s6016_s5 + $0x6d8] sm:$0xff] }
 0x25c   :  { %4231 = vmatprep.subr.bf16.mxu1 %v4592_v50 }
 0x25d   :  { %4113 = vmatpush3.bf16.msra.mxu0 %v4112_v8  ;;  %v4277_v8 = vpack.c.bf16 %v1584_v6, %v1583_v5  ;;  %v1623_v5 = vld [vmem:[%s6016_s5 + $0x6e0] sm:$0xff]  ;;  %v1624_v6 = vld [vmem:[%s6016_s5 + $0x6e8] sm:$0xff] }
 0x25e   :  { %4114 = vmatprep.subr.bf16.mxu0 %v4592_v50 }
 0x25f   :  { %4233 = vmatpush3.bf16.msra.mxu1 %v4232_v7  ;;  %v4280_v7 = vpack.c.bf16 %v1586_v10, %v1585_v9  ;;  %v1625_v9 = vld [vmem:[%s6016_s5 + $0x6f0] sm:$0xff]  ;;  %v1626_v10 = vld [vmem:[%s6016_s5 + $0x6f8] sm:$0xff] }
 0x260   :  { %4234 = vmatprep.subr.bf16.mxu1 %v4592_v50 }
 0x261   :  { %4116 = vmatpush3.bf16.msra.mxu0 %v4115_v12  ;;  %v4283_v12 = vpack.c.bf16 %v1588_v13, %v1587_v11  ;;  %v1627_v11 = vld [vmem:[%s6016_s5 + $0x700] sm:$0xff]  ;;  %v1628_v13 = vld [vmem:[%s6016_s5 + $0x708] sm:$0xff] }
 0x262   :  { %4117 = vmatprep.subr.bf16.mxu0 %v4592_v50 }
 0x263   :  { %4236 = vmatpush3.bf16.msra.mxu1 %v4235_v20  ;;  %v4286_v20 = vpack.c.bf16 %v1590_v19, %v1589_v16  ;;  %v2612_v16 = vrot.slane %v5819_v55, 2  ;;  %v1629_v19 = vld [vmem:[%s6016_s5 + $0x710] sm:$0xff] }
 0x264   :  { %4237 = vmatprep.subr.bf16.mxu1 %v4592_v50 }
 0x265   :  { %4119 = vmatpush3.bf16.msra.mxu0 %v4118_v23  ;;  %v4289_v23 = vpack.c.bf16 %v1592_v22, %v1591_v21  ;;  %v1631_v22 = vld [vmem:[%s6016_s5 + $0x720] sm:$0xff] }
 0x266   :  { %4120 = vmatprep.subr.bf16.mxu0 %v4592_v50 }
 0x267   :  { %4239 = vmatpush3.bf16.msra.mxu1 %v4238_v26  ;;  %v4292_v26 = vpack.c.bf16 %v1594_v25, %v1593_v24  ;;  %v1633_v25 = vld [vmem:[%s6016_s5 + $0x730] sm:$0xff] }
 0x268   :  { %4240 = vmatprep.subr.bf16.mxu1 %v4592_v50 }
 0x269   :  { %4122 = vmatpush3.bf16.msra.mxu0 %v4121_v29  ;;  %v4295_v29 = vpack.c.bf16 %v1596_v28, %v1595_v27  ;;  %v1635_v28 = vld [vmem:[%s6016_s5 + $0x740] sm:$0xff] }
 0x26a   :  { %4123 = vmatprep.subr.bf16.mxu0 %v4592_v50 }
 0x26b   :  { %4242 = vmatpush3.bf16.msra.mxu1 %v4241_v32  ;;  %v1598_v32 = vld [vmem:[%s6016_s5 + $0x618] sm:$0xff] }
 0x26c   :  { %4243 = vmatprep.subr.bf16.mxu1 %v4592_v50  ;;  %v4298_v33 = vpack.c.bf16 %v1598_v32, %v1597_v31  ;;  %v1637_v31 = vld [vmem:[%s6016_s5 + $0x750] sm:$0xff]  ;;  %v1638_v32 = vld [vmem:[%s6016_s5 + $0x758] sm:$0xff] }
 0x26d   :  { %4125 = vmatpush3.bf16.msra.mxu0 %v4124_v35  ;;  %v4301_v35 = vpack.c.bf16 %v1600_v34, %v1599_v58  ;;  %v1639_v58 = vld [vmem:[%s6016_s5 + $0x760] sm:$0xff]  ;;  %v1640_v34 = vld [vmem:[%s6016_s5 + $0x768] sm:$0xff] }
 0x26f   :  { %4245 = vmatpush3.bf16.msra.mxu1 %v4244_v36  ;;  %v1601_v36 = vld [vmem:[%s6016_s5 + $0x630] sm:$0xff] }
 0x270   :  { %3619 = vmatmul.mubr.f32.vlgmr.msra.gmra.mrb[52].mxu0 %v5169_v17  ;;  %4246 = vmatprep.subr.bf16.mxu1 %v4592_v50  ;;  %v1567_v17 = vld [vmem:[%s6016_s5 + $0x520] sm:$0xff]  ;;  %v4304_v38 = vpack.c.bf16 %v1602_v37, %v1601_v36  ;;  %v1641_v36 = vld [vmem:[%s6016_s5 + $0x770] sm:$0xff]  ;;  %v1642_v37 = vld [vmem:[%s6016_s5 + $0x778] sm:$0xff] }
 0x271   :  { %v4253_v45 = vpack.c.bf16 %v1568_v44, %v1567_v17  ;;  %v1607_v44 = vld [vmem:[%s6016_s5 + $0x660] sm:$0xff] }
 0x272   :  { %3794 = vmatmul.mubr.f32.vlgmr.msra.gmra.mrb[0].mxu1 %v2321_v40  ;;  %v1604_v40 = vld [vmem:[%s6016_s5 + $0x648] sm:$0xff] }
 0x273   :  { %4248 = vmatpush3.bf16.msra.mxu1 %v4247_v39  ;;  %3828 = vmatprep.mubr.msk.f32.mxu1 %vm4593_vm1, %v4594_v48  ;;  %v1603_v39 = vld [vmem:[%s6016_s5 + $0x640] sm:$0xff] }
 0x274   :  { %4249 = vmatprep.subr.bf16.mxu1 %v4592_v50  ;;  %v4307_v41 = vpack.c.bf16 %v1604_v40, %v1603_v39  ;;  %v1643_v39 = vld [vmem:[%s6016_s5 + $0x780] sm:$0xff]  ;;  %v1644_v40 = vld [vmem:[%s6016_s5 + $0x788] sm:$0xff] }
 0x277   :  { %4251 = vmatpush3.bf16.msra.mxu1 %v4250_v43  ;;  %v1606_v43 = vld [vmem:[%s6016_s5 + $0x658] sm:$0xff] }
 0x278   :  { %4252 = vmatprep.subr.bf16.mxu1 %v4592_v50  ;;  %v4310_v17 = vpack.c.bf16 %v1606_v43, %v1605_v42  ;;  %v2685_v42 = vrot.slane %v5819_v55, 4  ;;  %v1645_v43 = vld [vmem:[%s6016_s5 + $0x790] sm:$0xff] }
 0x27b   :  { %4254 = vmatpush3.bf16.msra.mxu1 %v4253_v45  ;;  %v1608_v45 = vld [vmem:[%s6016_s5 + $0x668] sm:$0xff] }
 0x27c   :  { %4255 = vmatprep.subr.bf16.mxu1 %v4592_v50  ;;  %v4313_v46 = vpack.c.bf16 %v1608_v45, %v1607_v44  ;;  %v1647_v45 = vld [vmem:[%s6016_s5 + $0x7a0] sm:$0xff] }
 0x27f   :  { %4257 = vmatpush3.bf16.msra.mxu1 %v4256_v49  ;;  %v1610_v49 = vld [vmem:[%s6016_s5 + $0x678] sm:$0xff] }
 0x280   :  { %4258 = vmatprep.subr.bf16.mxu1 %v4592_v50  ;;  %v4316_v51 = vpack.c.bf16 %v1610_v49, %v1609_v47  ;;  %v1649_v49 = vld [vmem:[%s6016_s5 + $0x7b0] sm:$0xff] }
 0x283   :  { %4260 = vmatpush3.bf16.msra.mxu1 %v4259_v53  ;;  %v1612_v53 = vld [vmem:[%s6016_s5 + $0x688] sm:$0xff] }
 0x284   :  { %4261 = vmatprep.subr.bf16.mxu1 %v4592_v50  ;;  %v4319_v54 = vpack.c.bf16 %v1612_v53, %v1611_v52  ;;  %v1651_v52 = vld [vmem:[%s6016_s5 + $0x7c0] sm:$0xff]  ;;  %v1652_v53 = vld [vmem:[%s6016_s5 + $0x7c8] sm:$0xff] }
 0x287   :  { %4263 = vmatpush3.bf16.msra.mxu1 %v4262_v56  ;;  %v1613_v56 = vld [vmem:[%s6016_s5 + $0x690] sm:$0xff] }
 0x288   :  { %4264 = vmatprep.subr.bf16.mxu1 %v4592_v50  ;;  %v4322_v18 = vpack.c.bf16 %v1614_v57, %v1613_v56  ;;  %v1653_v56 = vld [vmem:[%s6016_s5 + $0x7d0] sm:$0xff]  ;;  %v1654_v57 = vld [vmem:[%s6016_s5 + $0x7d8] sm:$0xff] }
 0x28b   :  { %4266 = vmatpush3.bf16.msra.mxu1 %v4265_v59  ;;  %v1616_v59 = vld [vmem:[%s6016_s5 + $0x6a8] sm:$0xff] }
 0x28c   :  { %4267 = vmatprep.subr.bf16.mxu1 %v4592_v50  ;;  %v4325_v60 = vpack.c.bf16 %v1616_v59, %v1615_v15  ;;  %v1655_v15 = vld [vmem:[%s6016_s5 + $0x7e0] sm:$0xff]  ;;  %v1656_v59 = vld [vmem:[%s6016_s5 + $0x7e8] sm:$0xff] }
 0x28f   :  { %4269 = vmatpush3.bf16.msra.mxu1 %v4268_v61  ;;  %v1618_v61 = vld [vmem:[%s6016_s5 + $0x6b8] sm:$0xff] }
 0x290   :  { %4270 = vmatprep.subr.bf16.mxu1 %v4592_v50  ;;  %v4328_v62 = vpack.c.bf16 %v1618_v61, %v1617_v14  ;;  %v1657_v14 = vld [vmem:[%s6016_s5 + $0x7f0] sm:$0xff]  ;;  %v1658_v61 = vld [vmem:[%s6016_s5 + $0x7f8] sm:$0xff] }
 0x292   :  { %3829 = vmatmul.mubr.f32.vlgmr.msra.gmra.mrb[0].mxu1 %v2394_v1 }
 0x293   :  { %4272 = vmatpush3.bf16.msra.mxu1 %v4271_v0  ;;  %3863 = vmatprep.mubr.msk.f32.mxu1 %vm4593_vm1, %v4594_v48  ;;  %v1620_v0 = vld [vmem:[%s6016_s5 + $0x6c8] sm:$0xff] }
 0x294   :  { %4273 = vmatprep.subr.bf16.mxu1 %v4592_v50  ;;  %v4331_v1 = vpack.c.bf16 %v1620_v0, %v1619_v63  ;;  %v2758_v63 = vrot.slane %v5819_v55, 6 }
 0x297   :  { %4275 = vmatpush3.bf16.msra.mxu1 %v4274_v4  ;;  %v4334_v4 = vpack.c.bf16 %v1622_v3, %v1621_v2  ;;  %v2987_v2 = vld [vmem:[%s6017_s6] ss:$0 sm:$0xff] }
 0x298   :  { %4276 = vmatprep.subr.bf16.mxu1 %v4592_v50 }
 0x29b   :  { %4278 = vmatpush3.bf16.msra.mxu1 %v4277_v8  ;;  %v4337_v8 = vpack.c.bf16 %v1624_v6, %v1623_v5 }
 0x29c   :  { %4279 = vmatprep.subr.bf16.mxu1 %v4592_v50 }
 0x29f   :  { %4281 = vmatpush3.bf16.msra.mxu1 %v4280_v7  ;;  %v4340_v7 = vpack.c.bf16 %v1626_v10, %v1625_v9 }
 0x2a0   :  { %4282 = vmatprep.subr.bf16.mxu1 %v4592_v50 }
 0x2a3   :  { %4284 = vmatpush3.bf16.msra.mxu1 %v4283_v12  ;;  %v4343_v12 = vpack.c.bf16 %v1628_v13, %v1627_v11 }
 0x2a4   :  { %4285 = vmatprep.subr.bf16.mxu1 %v4592_v50 }
 0x2a7   :  { %4287 = vmatpush3.bf16.msra.mxu1 %v4286_v20  ;;  %v1630_v20 = vld [vmem:[%s6016_s5 + $0x718] sm:$0xff] }
 0x2a8   :  { %4288 = vmatprep.subr.bf16.mxu1 %v4592_v50  ;;  %v4346_v21 = vpack.c.bf16 %v1630_v20, %v1629_v19 }
 0x2ab   :  { %4290 = vmatpush3.bf16.msra.mxu1 %v4289_v23  ;;  %v1632_v23 = vld [vmem:[%s6016_s5 + $0x728] sm:$0xff] }
 0x2ac   :  { %4291 = vmatprep.subr.bf16.mxu1 %v4592_v50  ;;  %v4349_v24 = vpack.c.bf16 %v1632_v23, %v1631_v22 }
 0x2af   :  { %4293 = vmatpush3.bf16.msra.mxu1 %v4292_v26  ;;  %v1634_v26 = vld [vmem:[%s6016_s5 + $0x738] sm:$0xff] }
 0x2b0   :  { %4294 = vmatprep.subr.bf16.mxu1 %v4592_v50  ;;  %v4352_v27 = vpack.c.bf16 %v1634_v26, %v1633_v25 }
 0x2b2   :  { %3864 = vmatmul.mubr.f32.vlgmr.msra.gmra.mrb[0].mxu1 %v2467_v30 }
 0x2b3   :  { %4296 = vmatpush3.bf16.msra.mxu1 %v4295_v29  ;;  %3898 = vmatprep.mubr.msk.f32.mxu1 %vm4593_vm1, %v4594_v48  ;;  %v1636_v29 = vld [vmem:[%s6016_s5 + $0x748] sm:$0xff] }
 0x2b4   :  { %4297 = vmatprep.subr.bf16.mxu1 %v4592_v50  ;;  %v4355_v30 = vpack.c.bf16 %v1636_v29, %v1635_v28 }
 0x2b7   :  { %4299 = vmatpush3.bf16.msra.mxu1 %v4298_v33  ;;  %v4358_v33 = vpack.c.bf16 %v1638_v32, %v1637_v31 }
 0x2b8   :  { %4300 = vmatprep.subr.bf16.mxu1 %v4592_v50 }
 0x2bb   :  { %4302 = vmatpush3.bf16.msra.mxu1 %v4301_v35  ;;  %v4361_v35 = vpack.c.bf16 %v1640_v34, %v1639_v58 }
 0x2bc   :  { %4303 = vmatprep.subr.bf16.mxu1 %v4592_v50 }
 0x2bf   :  { %4305 = vmatpush3.bf16.msra.mxu1 %v4304_v38  ;;  %v4364_v38 = vpack.c.bf16 %v1642_v37, %v1641_v36 }
 0x2c0   :  { %4306 = vmatprep.subr.bf16.mxu1 %v4592_v50 }
 0x2c3   :  { %4308 = vmatpush3.bf16.msra.mxu1 %v4307_v41  ;;  %v4367_v41 = vpack.c.bf16 %v1644_v40, %v1643_v39 }
 0x2c4   :  { %4309 = vmatprep.subr.bf16.mxu1 %v4592_v50 }
 0x2c7   :  { %4311 = vmatpush3.bf16.msra.mxu1 %v4310_v17  ;;  %v1646_v17 = vld [vmem:[%s6016_s5 + $0x798] sm:$0xff] }
 0x2c8   :  { %4312 = vmatprep.subr.bf16.mxu1 %v4592_v50  ;;  %v4370_v44 = vpack.c.bf16 %v1646_v17, %v1645_v43 }
 0x2cb   :  { %4314 = vmatpush3.bf16.msra.mxu1 %v4313_v46  ;;  %v1648_v46 = vld [vmem:[%s6016_s5 + $0x7a8] sm:$0xff] }
 0x2cc   :  { %4315 = vmatprep.subr.bf16.mxu1 %v4592_v50  ;;  %v4373_v47 = vpack.c.bf16 %v1648_v46, %v1647_v45 }
 0x2cf   :  { %4317 = vmatpush3.bf16.msra.mxu1 %v4316_v51 }
 0x2d0   :  { %4318 = vmatprep.subr.bf16.mxu1 %v4592_v50 }
 0x2d2   :  { %3899 = vmatmul.mubr.f32.vlgmr.msra.gmra.mrb[0].mxu1 %v5819_v55 }
 0x2d3   :  { %4320 = vmatpush3.bf16.msra.mxu1 %v4319_v54  ;;  %3933 = vmatprep.mubr.msk.f32.mxu1 %vm4593_vm1, %v4594_v48  ;;  %v4379_v54 = vpack.c.bf16 %v1652_v53, %v1651_v52 }
 0x2d4   :  { %4321 = vmatprep.subr.bf16.mxu1 %v4592_v50 }
 0x2d7   :  { %4323 = vmatpush3.bf16.msra.mxu1 %v4322_v18  ;;  %v4382_v18 = vpack.c.bf16 %v1654_v57, %v1653_v56 }
 0x2d8   :  { %4324 = vmatprep.subr.bf16.mxu1 %v4592_v50 }
 0x2db   :  { %4326 = vmatpush3.bf16.msra.mxu1 %v4325_v60  ;;  %v4385_v60 = vpack.c.bf16 %v1656_v59, %v1655_v15 }
 0x2dc   :  { %4327 = vmatprep.subr.bf16.mxu1 %v4592_v50 }
 0x2df   :  { %4329 = vmatpush3.bf16.msra.mxu1 %v4328_v62  ;;  %v4388_v62 = vpack.c.bf16 %v1658_v61, %v1657_v14 }
 0x2e0   :  { %4330 = vmatprep.subr.bf16.mxu1 %v4592_v50 }
 0x2e3   :  { %4332 = vmatpush3.bf16.msra.mxu1 %v4331_v1 }
 0x2e4   :  { %4333 = vmatprep.subr.bf16.mxu1 %v4592_v50 }
 0x2e7   :  { %4335 = vmatpush3.bf16.msra.mxu1 %v4334_v4 }
 0x2e8   :  { %4336 = vmatprep.subr.bf16.mxu1 %v4592_v50 }
 0x2eb   :  { %4338 = vmatpush3.bf16.msra.mxu1 %v4337_v8 }
 0x2ec   :  { %4339 = vmatprep.subr.bf16.mxu1 %v4592_v50 }
 0x2ef   :  { %4341 = vmatpush3.bf16.msra.mxu1 %v4340_v7 }
 0x2f0   :  { %4342 = vmatprep.subr.bf16.mxu1 %v4592_v50 }
 0x2f2   :  { %3934 = vmatmul.mubr.f32.vlgmr.msra.gmra.mrb[0].mxu1 %v2612_v16 }
 0x2f3   :  { %4344 = vmatpush3.bf16.msra.mxu1 %v4343_v12  ;;  %3968 = vmatprep.mubr.msk.f32.mxu1 %vm4593_vm1, %v4594_v48 }
 0x2f4   :  { %4345 = vmatprep.subr.bf16.mxu1 %v4592_v50 }
 0x2f7   :  { %4347 = vmatpush3.bf16.msra.mxu1 %v4346_v21 }
 0x2f8   :  { %4348 = vmatprep.subr.bf16.mxu1 %v4592_v50 }
 0x2fb   :  { %4350 = vmatpush3.bf16.msra.mxu1 %v4349_v24 }
 0x2fc   :  { %4351 = vmatprep.subr.bf16.mxu1 %v4592_v50 }
 0x2ff   :  { %4353 = vmatpush3.bf16.msra.mxu1 %v4352_v27 }
 0x300   :  { %4354 = vmatprep.subr.bf16.mxu1 %v4592_v50 }
 0x303   :  { %4356 = vmatpush3.bf16.msra.mxu1 %v4355_v30 }
 0x304   :  { %4357 = vmatprep.subr.bf16.mxu1 %v4592_v50 }
 0x307   :  { %4359 = vmatpush3.bf16.msra.mxu1 %v4358_v33 }
 0x308   :  { %4360 = vmatprep.subr.bf16.mxu1 %v4592_v50 }
 0x30b   :  { %4362 = vmatpush3.bf16.msra.mxu1 %v4361_v35 }
 0x30c   :  { %4363 = vmatprep.subr.bf16.mxu1 %v4592_v50 }
 0x30f   :  { %4365 = vmatpush3.bf16.msra.mxu1 %v4364_v38 }
 0x310   :  { %4366 = vmatprep.subr.bf16.mxu1 %v4592_v50 }
 0x312   :  { %3969 = vmatmul.mubr.f32.vlgmr.msra.gmra.mrb[0].mxu1 %v2685_v42 }
 0x313   :  { %4368 = vmatpush3.bf16.msra.mxu1 %v4367_v41  ;;  %4003 = vmatprep.mubr.msk.f32.mxu1 %vm4593_vm1, %v4594_v48  ;;  %v1650_v48 = vld [vmem:[%s6016_s5 + $0x7b8] sm:$0xff]  ;;  %s4595_s5 = smov [#allocation2]  }
 0x314   :  { %4369 = vmatprep.subr.bf16.mxu1 %v4592_v50  ;;  %v4376_v51 = vpack.c.bf16 %v1650_v48, %v1649_v49  ;;  %s2850_s6 = sshll.u32 %s4595_s5, 4  ;;  %s2851_s6 = int_to_ptr.vmem [resolvable:$true] %s2850_s6 }
 0x315   :  { %s4568_s3 = scalar_lea.vmem %s2851_s6, 32  ;;  %p4573_p1 = scmp.lt.s32.totalorder %s2851_s6, %s2851_s6 }
 0x316   :  { %p4569_p0 = scmp.ne.s32.totalorder %s2851_s6, %s4568_s3  ;;  %p4574_p2 = scmp.lt.s32.totalorder %s4568_s3, %s4568_s3 }
 0x317   :  { %4371 = vmatpush3.bf16.msra.mxu1 %v4370_v44 }
 0x318   :  { %4372 = vmatprep.subr.bf16.mxu1 %v4592_v50  ;;  %p4575_p3 = por %p4574_p2, %p4573_p1 }
 0x31a   :  { %p4576_p4 = pnand %p4575_p3, %p4569_p0 }
 0x31b   :  { %4374 = vmatpush3.bf16.msra.mxu1 %v4373_v47 }
 0x31c   :  { %4375 = vmatprep.subr.bf16.mxu1 %v4592_v50 }
 0x31f   :  { %4377 = vmatpush3.bf16.msra.mxu1 %v4376_v51 }
 0x320   :  { %4378 = vmatprep.subr.bf16.mxu1 %v4592_v50 }
 0x323   :  { %4380 = vmatpush3.bf16.msra.mxu1 %v4379_v54 }
 0x324   :  { %4381 = vmatprep.subr.bf16.mxu1 %v4592_v50 }
 0x327   :  { %4383 = vmatpush3.bf16.msra.mxu1 %v4382_v18 }
 0x328   :  { %4384 = vmatprep.subr.bf16.mxu1 %v4592_v50 }
 0x32b   :  { %4386 = vmatpush3.bf16.msra.mxu1 %v4385_v60 }
 0x32c   :  { %4387 = vmatprep.subr.bf16.mxu1 %v4592_v50 }
 0x32f   :  { %4389 = vmatpush3.bf16.msra.mxu1 %v4388_v62 }
 0x332   :  { %4004 = vmatmul.mubr.f32.vlgmr.msra.gmra.mrb[0].mxu1 %v2758_v63 }
 0x343   :  { %v2024_v0 = vpop.f32.mrb[52].mxu0 }
 0x344   :  { %v3620_v1 = vpop.f32.mrb[53].mxu0  ;;  %v4390_v3 = vadd.f32 %v2987_v2, %v2024_v0 }
 0x405   :  { %v2826_v4 = vpop.f32.mrb[0].mxu1 }
 0x406   :  { %v4391_v5 = vadd.f32 %v4390_v3, %v2826_v4  ;;  %v4005_v6 = vpop.f32.mrb[1].mxu1 }
 0x408   :  { %v2832_v8 = vsel %vm2831_vm2, %v4391_v5, -inf }
 0x409   :  { %2833 = vmax.xlane.f32.xlu0 %v2832_v8 }
 0x496   :  { %v2834_v9 = vpop.xlane.xlu0 %2833 }
 0x497   :  { %v2835_v50 = vsub.f32 %v4391_v5, %v2834_v9 }
 0x499   :  { %v2836_v10 = vmul.f32 1.442695, %v2835_v50 }
 0x49b   :  { %4564 = vpow2.f32 %v2836_v10 }
 0x4a5   :  { %v4565_v55 = vpop.eup %4564 }
 0x4a6   :  { %v2838_v7 = vsel %vm2831_vm2, %v4565_v55, 0.0 }
 0x4a7   :  { %2839 = vadd.xlane.f32.xlu0 %v2838_v7 }
 0x534   :  { %v2840_v11 = vpop.xlane.xlu0 %2839 }
 0x535   :  { %4566 = vrcp.f32 %v2840_v11 }
 0x53f   :  { %v4567_v13 = vpop.eup %4566 }
 0x540   :  { %v2842_v12 = vmul.f32 %v4567_v13, %v4565_v55 }
 0x542   :  { %2843 = vst.msk [vmem:[#allocation2] sm:$0x3] %vm2831_vm2, %v2842_v12 }
 0x543   :  { %4579 = shalt.err (!%p4576_p4)
}
 0x544   :  { %s4580_s4 = scalar_lea.hbm %s6018_s7, 32 }
 0x545   :  { %p4581_p5 = scmp.ne.s32.totalorder %s6018_s7, %s4580_s4  ;;  %p4584_p6 = scmp.lt.u32.totalorder %s4580_s4, %s6018_s7 }
 0x547   :  { %p4586_p7 = pnand %p4584_p6, %p4581_p5 }
 0x549   :  { %4589 = shalt.err (!%p4586_p7)
}
 0x54a   :  { %2853 = dma.vmem_to_hbm [thread:$0]  %s2851_s6, 32, %s6018_s7, [#allocation3]  }
 0x54b   :  { %4590 = dma.done.wait [#allocation3], 32  }
 0x54c   :  { %4591 = vsyncadd [#allocation3], 4294967264 }
 0x54d   :  { %2857 = vsyncpa [#allocation3], 1 }

</bundles_post_ra>
